<compile_context>
chip_gen: v6e
topology: v6e:2x2x1
jax: 0.10.0
libtpu: 0.0.40
codegen_flags: <defaults>
</compile_context>

<pallas_src>
import functools

import jax
import jax.numpy as jnp
from jax import lax  # noqa: F401
from jax.experimental import pallas as pl
from jax.experimental.pallas import tpu as pltpu


# ----------------------------------------------------------------------------
# Prologue kernel: preprocess + x0 + embedding MLPs, all fused
# ----------------------------------------------------------------------------
def _prologue_kernel(y1_ref, y2_ref,
                     wp1_ref, bp1_ref, wp2_ref, bp2_ref,
                     w1a_ref, b1a_ref, w1b_ref, b1b_ref,
                     w2a_ref, b2a_ref, w2b_ref, b2b_ref,
                     x_ref, x0_ref, *, hidden):
    f32 = jnp.float32
    p1 = jax.nn.sigmoid(
        jnp.dot(y1_ref[...], wp1_ref[...], preferred_element_type=f32) + bp1_ref[...])
    p2 = jax.nn.sigmoid(
        jnp.dot(y2_ref[...], wp2_ref[...], preferred_element_type=f32) + bp2_ref[...])
    x0_ref[...] = (p1 - p2).astype(x0_ref.dtype)
    e1 = jnp.tanh(jnp.dot(p1, w1a_ref[...], preferred_element_type=f32) + b1a_ref[...])
    e1 = jnp.dot(e1, w1b_ref[...], preferred_element_type=f32) + b1b_ref[...]
    e2 = jnp.tanh(jnp.dot(p2, w2a_ref[...], preferred_element_type=f32) + b2a_ref[...])
    e2 = jnp.dot(e2, w2b_ref[...], preferred_element_type=f32) + b2b_ref[...]
    # write the concatenated ODE state directly (no jnp.concatenate copy)
    x_ref[:, :hidden] = e1.astype(x_ref.dtype)
    x_ref[:, hidden:] = e2.astype(x_ref.dtype)


def prologue(params, hidden_size):
    y1p, y2p = params["y1"], params["y2"]
    n, input_size = y1p.shape
    wp1, bp1 = params["pre1"]
    wp2, bp2 = params["pre2"]
    w1a, b1a = params["in1a"]
    w1b, b1b = params["in1b"]
    w2a, b2a = params["in2a"]
    w2b, b2b = params["in2b"]
    return pl.pallas_call(
        functools.partial(_prologue_kernel, hidden=hidden_size),
        out_shape=(jax.ShapeDtypeStruct((n, 2 * hidden_size), jnp.float32),
                   jax.ShapeDtypeStruct((n, input_size), jnp.float32)),
    )(y1p, y2p,
      wp1, bp1.reshape(1, -1), wp2, bp2.reshape(1, -1),
      w1a, b1a.reshape(1, -1), w1b, b1b.reshape(1, -1),
      w2a, b2a.reshape(1, -1), w2b, b2b.reshape(1, -1))


# ----------------------------------------------------------------------------
# Fused RK4 integration kernel (single pallas_call over all time intervals)
# ----------------------------------------------------------------------------
def _rk4_kernel(vt_ref, x0_ref, a_ref, w_ref, b_ref, o_ref, state_ref, *, substeps):
    i = pl.program_id(0)

    @pl.when(i == 0)
    def _():
        state_ref[...] = x0_ref[...]

    @pl.when(i > 0)
    def _():
        # A / fused weight / bias stay resident in VMEM across grid steps
        a = a_ref[...]
        w = w_ref[...]
        bias = jnp.broadcast_to(b_ref[...], state_ref.shape)  # hoisted once
        t0 = vt_ref[i - 1]
        t1 = vt_ref[i]
        h = (t1 - t0) / substeps

        def f_eval(xc):
            # ODEFunc1 (dropout p=0 -> identity):
            #   relu((A @ [y1|y2]) @ [[W1,W3],[W2,W4]] + [b1+b2 | b3+b4])
            ay = jnp.dot(a, xc, preferred_element_type=jnp.float32)
            z = jnp.dot(ay, w, preferred_element_type=jnp.float32) + bias
            return jnp.maximum(z, 0.0)

        xc = state_ref[...]
        for _ in range(substeps):  # static trip count, fully unrolled in-kernel
            k1 = f_eval(xc)
            k2 = f_eval(xc + (0.5 * h) * k1)
            k3 = f_eval(xc + (0.5 * h) * k2)
            k4 = f_eval(xc + h * k3)
            xc = xc + (h / 6.0) * (k1 + 2.0 * k2 + 2.0 * k3 + k4)
        state_ref[...] = xc

    o_ref[0] = state_ref[...]


def integrate_rk4_fused(vt, x0, A, wbig, bbig, substeps=8):
    # TODO(synk): torchdiffeq dopri5 is adaptive, error-controlled; a fixed-step
    # RK4 between the vt grid points is used instead.
    # TODO(synk): for large n (e.g. n>=4096 on v7x's 64 MiB VMEM), tile A by
    # rows with a blocked reduction instead of keeping the full (n,n) adjacency
    # resident in VMEM.
    T = vt.shape[0]
    n, d = x0.shape
    grid_spec = pltpu.PrefetchScalarGridSpec(
        num_scalar_prefetch=1,             # vt -> SMEM
        grid=(T,),
        in_specs=[
            pl.BlockSpec((n, d), lambda i, vt_ref: (0, 0)),   # x0   (resident)
            pl.BlockSpec((n, n), lambda i, vt_ref: (0, 0)),   # A    (resident)
            pl.BlockSpec((d, d), lambda i, vt_ref: (0, 0)),   # Wbig (resident)
            pl.BlockSpec((1, d), lambda i, vt_ref: (0, 0)),   # bbig (resident)
        ],
        out_specs=pl.BlockSpec((1, n, d), lambda i, vt_ref: (i, 0, 0)),
        scratch_shapes=[pltpu.VMEM((n, d), jnp.float32)],     # carried ODE state
    )
    return pl.pallas_call(
        functools.partial(_rk4_kernel, substeps=substeps),
        out_shape=jax.ShapeDtypeStruct((T, n, d), jnp.float32),
        grid_spec=grid_spec,
        compiler_params=pltpu.CompilerParams(
            dimension_semantics=("arbitrary",)),   # serial: state carried
    )(vt, x0, A, wbig, bbig)


# ----------------------------------------------------------------------------
# Fused output heads (both sigmoid heads in one block-diagonal matmul)
# ----------------------------------------------------------------------------
def _outhead_kernel(h_ref, w_ref, b_ref, o_ref):
    y = jnp.dot(h_ref[...], w_ref[...], preferred_element_type=jnp.float32) + b_ref[...]
    o_ref[...] = jax.nn.sigmoid(y).astype(o_ref.dtype)


def output_heads(hflat, wout, bout):
    m = hflat.shape[0]
    ncols = wout.shape[1]
    return pl.pallas_call(
        _outhead_kernel,
        out_shape=jax.ShapeDtypeStruct((m, ncols), jnp.float32),
    )(hflat, wout, bout)


# ----------------------------------------------------------------------------
# Parameter construction (deterministic, mirrors module __init__ shapes)
# ----------------------------------------------------------------------------
def linear_init(key, in_f, out_f):
    kw, kb = jax.random.split(key)
    bound = 1.0 / jnp.sqrt(jnp.float32(in_f))
    w = jax.random.uniform(kw, (in_f, out_f), jnp.float32, -bound, bound)
    b = jax.random.uniform(kb, (out_f,), jnp.float32, -bound, bound)
    return w, b


def build_params(key, n, input_size, hidden_size, num_classes):
    keys = jax.random.split(key, 16)
    p = {}
    # y1 / y2 "node" parameters: shuffled +/-1 -> relu splits
    total = n * input_size
    num_minus = total // 2
    vals = jnp.concatenate([-jnp.ones((num_minus,), jnp.float32),
                            jnp.ones((total - num_minus,), jnp.float32)])
    perm = jax.random.permutation(keys[0], total)
    initial = vals[perm].reshape(n, input_size)
    p["y1"] = jnp.maximum(initial, 0.0)
    p["y2"] = jnp.maximum(-initial, 0.0)
    # adjacency A (row-normalized, deterministic)
    adj = (jax.random.uniform(keys[1], (n, n)) < 0.3).astype(jnp.float32)
    adj = jnp.minimum(adj + jnp.eye(n, dtype=jnp.float32), 1.0)
    p["A"] = adj / adj.sum(axis=1, keepdims=True)
    # preprocess layers
    p["pre1"] = linear_init(keys[2], input_size, input_size)
    p["pre2"] = linear_init(keys[3], input_size, input_size)
    # input (embedding) layers: Linear -> Tanh -> Linear
    p["in1a"] = linear_init(keys[4], input_size, hidden_size)
    p["in1b"] = linear_init(keys[5], hidden_size, hidden_size)
    p["in2a"] = linear_init(keys[6], input_size, hidden_size)
    p["in2b"] = linear_init(keys[7], hidden_size, hidden_size)
    # ODEFunc1(hidden_size*2): wt1..wt4 are Linear(hidden_size, hidden_size)
    p["wt1"] = linear_init(keys[8], hidden_size, hidden_size)
    p["wt2"] = linear_init(keys[9], hidden_size, hidden_size)
    p["wt3"] = linear_init(keys[10], hidden_size, hidden_size)
    p["wt4"] = linear_init(keys[11], hidden_size, hidden_size)
    # output layers
    p["out1"] = linear_init(keys[12], hidden_size, num_classes)
    p["out2"] = linear_init(keys[13], hidden_size, num_classes)
    return p


# ----------------------------------------------------------------------------
# Forward pass (mirrors BDG_ODE.forward)
# ----------------------------------------------------------------------------
def bdg_ode_forward(params, vt, hidden_size, num_classes, substeps=8):
    # preprocess + x0 + embeddings, fused in one kernel
    x, x0 = prologue(params, hidden_size)

    # Fuse ODEFunc1's four (h,h) Linear layers into one (2h,2h) weight:
    #   z = [A@y1 | A@y2] @ [[W1, W3], [W2, W4]] + [b1+b2 | b3+b4]
    w1, b1 = params["wt1"]
    w2, b2 = params["wt2"]
    w3, b3 = params["wt3"]
    w4, b4 = params["wt4"]
    wbig = jnp.block([[w1, w3], [w2, w4]])
    bbig = jnp.concatenate([b1 + b2, b3 + b4]).reshape(1, -1)

    hvx = integrate_rk4_fused(vt, x, params["A"], wbig, bbig, substeps=substeps)

    T, n, _ = hvx.shape
    hflat = hvx.reshape(T * n, 2 * hidden_size)

    # both output heads as one block-diagonal matmul + sigmoid
    wo1, bo1 = params["out1"]
    wo2, bo2 = params["out2"]
    wout = jnp.zeros((2 * hidden_size, 2 * num_classes), jnp.float32)
    wout = wout.at[:hidden_size, :num_classes].set(wo1)
    wout = wout.at[hidden_size:, num_classes:].set(wo2)
    bout = jnp.concatenate([bo1, bo2]).reshape(1, -1)
    out = output_heads(hflat, wout, bout)
    output1 = out[:, :num_classes].reshape(T, n, num_classes)
    output2 = out[:, num_classes:].reshape(T, n, num_classes)
    return output1, output2, x0


# ----------------------------------------------------------------------------
# Demo
# ----------------------------------------------------------------------------
if __name__ == "__main__":
    n = 8            # number of nodes
    input_size = 16
    hidden_size = 32
    num_classes = 4
    T = 5            # number of time ticks

    key = jax.random.PRNGKey(0)
    params = build_params(key, n, input_size, hidden_size, num_classes)
    vt = jnp.linspace(0.0, 1.0, T).astype(jnp.float32)

    fwd = jax.jit(functools.partial(bdg_ode_forward,
                                    hidden_size=hidden_size,
                                    num_classes=num_classes))
    out1, out2, x0 = fwd(params, vt)
    jax.block_until_ready((out1, out2, x0))

    assert out1.shape == (T, n, num_classes)
    assert out2.shape == (T, n, num_classes)
    assert x0.shape == (n, input_size)
    print("KERNEL_OK")
</pallas_src>

<mosaic_0001>
module attributes {stable_mosaic.version = 11 : i64} {
  func.func @_prologue_kernel(%arg0: memref<8x16xf32, #tpu.memory_space<vmem>>, %arg1: memref<8x16xf32, #tpu.memory_space<vmem>>, %arg2: memref<16x16xf32, #tpu.memory_space<vmem>>, %arg3: memref<1x16xf32, #tpu.memory_space<vmem>>, %arg4: memref<16x16xf32, #tpu.memory_space<vmem>>, %arg5: memref<1x16xf32, #tpu.memory_space<vmem>>, %arg6: memref<16x32xf32, #tpu.memory_space<vmem>>, %arg7: memref<1x32xf32, #tpu.memory_space<vmem>>, %arg8: memref<32x32xf32, #tpu.memory_space<vmem>>, %arg9: memref<1x32xf32, #tpu.memory_space<vmem>>, %arg10: memref<16x32xf32, #tpu.memory_space<vmem>>, %arg11: memref<1x32xf32, #tpu.memory_space<vmem>>, %arg12: memref<32x32xf32, #tpu.memory_space<vmem>>, %arg13: memref<1x32xf32, #tpu.memory_space<vmem>>, %arg14: memref<8x64xf32, #tpu.memory_space<vmem>>, %arg15: memref<8x16xf32, #tpu.memory_space<vmem>>) attributes {dimension_semantics = [], scalar_prefetch = 0 : i64, scratch_operands = 0 : i64, tpu.core_type = #tpu.core_type<tc>} {
    %c0 = arith.constant 0 : index
    %c0_0 = arith.constant 0 : index
    %0 = vector.load %arg0[%c0, %c0_0] : memref<8x16xf32, #tpu.memory_space<vmem>>, vector<8x16xf32>
    %c0_1 = arith.constant 0 : index
    %c0_2 = arith.constant 0 : index
    %1 = vector.load %arg2[%c0_1, %c0_2] : memref<16x16xf32, #tpu.memory_space<vmem>>, vector<16x16xf32>
    %cst = arith.constant dense<0.000000e+00> : vector<8x16xf32>
    %2 = tpu.matmul %0, %1, %cst {dimension_numbers = #tpu.dot_dimension_numbers<[1], [0], [0], [1], [0, 0, 1, 1], [], []>} : vector<8x16xf32>, vector<16x16xf32>, vector<8x16xf32> -> vector<8x16xf32>
    %c0_3 = arith.constant 0 : index
    %c0_4 = arith.constant 0 : index
    %3 = vector.load %arg3[%c0_3, %c0_4] : memref<1x16xf32, #tpu.memory_space<vmem>>, vector<1x16xf32>
    %4 = vector.broadcast %3 : vector<1x16xf32> to vector<8x16xf32>
    %5 = arith.addf %2, %4 : vector<8x16xf32>
    %6 = arith.negf %5 : vector<8x16xf32>
    %7 = math.exp %6 : vector<8x16xf32>
    %cst_5 = arith.constant 1.000000e+00 : f32
    %8 = vector.broadcast %cst_5 : f32 to vector<8x16xf32>
    %9 = arith.addf %8, %7 : vector<8x16xf32>
    %10 = arith.divf %8, %9 : vector<8x16xf32>
    %c0_6 = arith.constant 0 : index
    %c0_7 = arith.constant 0 : index
    %11 = vector.load %arg1[%c0_6, %c0_7] : memref<8x16xf32, #tpu.memory_space<vmem>>, vector<8x16xf32>
    %c0_8 = arith.constant 0 : index
    %c0_9 = arith.constant 0 : index
    %12 = vector.load %arg4[%c0_8, %c0_9] : memref<16x16xf32, #tpu.memory_space<vmem>>, vector<16x16xf32>
    %cst_10 = arith.constant dense<0.000000e+00> : vector<8x16xf32>
    %13 = tpu.matmul %11, %12, %cst_10 {dimension_numbers = #tpu.dot_dimension_numbers<[1], [0], [0], [1], [0, 0, 1, 1], [], []>} : vector<8x16xf32>, vector<16x16xf32>, vector<8x16xf32> -> vector<8x16xf32>
    %c0_11 = arith.constant 0 : index
    %c0_12 = arith.constant 0 : index
    %14 = vector.load %arg5[%c0_11, %c0_12] : memref<1x16xf32, #tpu.memory_space<vmem>>, vector<1x16xf32>
    %15 = vector.broadcast %14 : vector<1x16xf32> to vector<8x16xf32>
    %16 = arith.addf %13, %15 : vector<8x16xf32>
    %17 = arith.negf %16 : vector<8x16xf32>
    %18 = math.exp %17 : vector<8x16xf32>
    %cst_13 = arith.constant 1.000000e+00 : f32
    %19 = vector.broadcast %cst_13 : f32 to vector<8x16xf32>
    %20 = arith.addf %19, %18 : vector<8x16xf32>
    %21 = arith.divf %19, %20 : vector<8x16xf32>
    %22 = arith.subf %10, %21 : vector<8x16xf32>
    %c0_14 = arith.constant 0 : index
    %c0_15 = arith.constant 0 : index
    %23 = vector.load %arg15[%c0_14, %c0_15] : memref<8x16xf32, #tpu.memory_space<vmem>>, vector<8x16xf32>
    tpu.vector_store %arg15[%c0_14, %c0_15], %22 {strides = array<i32>} : memref<8x16xf32, #tpu.memory_space<vmem>>, vector<8x16xf32>,
    %c0_16 = arith.constant 0 : index
    %c0_17 = arith.constant 0 : index
    %24 = vector.load %arg6[%c0_16, %c0_17] : memref<16x32xf32, #tpu.memory_space<vmem>>, vector<16x32xf32>
    %cst_18 = arith.constant dense<0.000000e+00> : vector<8x32xf32>
    %25 = tpu.matmul %10, %24, %cst_18 {dimension_numbers = #tpu.dot_dimension_numbers<[1], [0], [0], [1], [0, 0, 1, 1], [], []>} : vector<8x16xf32>, vector<16x32xf32>, vector<8x32xf32> -> vector<8x32xf32>
    %c0_19 = arith.constant 0 : index
    %c0_20 = arith.constant 0 : index
    %26 = vector.load %arg7[%c0_19, %c0_20] : memref<1x32xf32, #tpu.memory_space<vmem>>, vector<1x32xf32>
    %27 = vector.broadcast %26 : vector<1x32xf32> to vector<8x32xf32>
    %28 = arith.addf %25, %27 : vector<8x32xf32>
    %29 = math.tanh %28 : vector<8x32xf32>
    %c0_21 = arith.constant 0 : index
    %c0_22 = arith.constant 0 : index
    %30 = vector.load %arg8[%c0_21, %c0_22] : memref<32x32xf32, #tpu.memory_space<vmem>>, vector<32x32xf32>
    %cst_23 = arith.constant dense<0.000000e+00> : vector<8x32xf32>
    %31 = tpu.matmul %29, %30, %cst_23 {dimension_numbers = #tpu.dot_dimension_numbers<[1], [0], [0], [1], [0, 0, 1, 1], [], []>} : vector<8x32xf32>, vector<32x32xf32>, vector<8x32xf32> -> vector<8x32xf32>
    %c0_24 = arith.constant 0 : index
    %c0_25 = arith.constant 0 : index
    %32 = vector.load %arg9[%c0_24, %c0_25] : memref<1x32xf32, #tpu.memory_space<vmem>>, vector<1x32xf32>
    %33 = vector.broadcast %32 : vector<1x32xf32> to vector<8x32xf32>
    %34 = arith.addf %31, %33 : vector<8x32xf32>
    %c0_26 = arith.constant 0 : index
    %c0_27 = arith.constant 0 : index
    %35 = vector.load %arg10[%c0_26, %c0_27] : memref<16x32xf32, #tpu.memory_space<vmem>>, vector<16x32xf32>
    %cst_28 = arith.constant dense<0.000000e+00> : vector<8x32xf32>
    %36 = tpu.matmul %21, %35, %cst_28 {dimension_numbers = #tpu.dot_dimension_numbers<[1], [0], [0], [1], [0, 0, 1, 1], [], []>} : vector<8x16xf32>, vector<16x32xf32>, vector<8x32xf32> -> vector<8x32xf32>
    %c0_29 = arith.constant 0 : index
    %c0_30 = arith.constant 0 : index
    %37 = vector.load %arg11[%c0_29, %c0_30] : memref<1x32xf32, #tpu.memory_space<vmem>>, vector<1x32xf32>
    %38 = vector.broadcast %37 : vector<1x32xf32> to vector<8x32xf32>
    %39 = arith.addf %36, %38 : vector<8x32xf32>
    %40 = math.tanh %39 : vector<8x32xf32>
    %c0_31 = arith.constant 0 : index
    %c0_32 = arith.constant 0 : index
    %41 = vector.load %arg12[%c0_31, %c0_32] : memref<32x32xf32, #tpu.memory_space<vmem>>, vector<32x32xf32>
    %cst_33 = arith.constant dense<0.000000e+00> : vector<8x32xf32>
    %42 = tpu.matmul %40, %41, %cst_33 {dimension_numbers = #tpu.dot_dimension_numbers<[1], [0], [0], [1], [0, 0, 1, 1], [], []>} : vector<8x32xf32>, vector<32x32xf32>, vector<8x32xf32> -> vector<8x32xf32>
    %c0_34 = arith.constant 0 : index
    %c0_35 = arith.constant 0 : index
    %43 = vector.load %arg13[%c0_34, %c0_35] : memref<1x32xf32, #tpu.memory_space<vmem>>, vector<1x32xf32>
    %44 = vector.broadcast %43 : vector<1x32xf32> to vector<8x32xf32>
    %45 = arith.addf %42, %44 : vector<8x32xf32>
    %c0_36 = arith.constant 0 : index
    %c0_37 = arith.constant 0 : index
    %46 = vector.load %arg14[%c0_36, %c0_37] : memref<8x64xf32, #tpu.memory_space<vmem>>, vector<8x32xf32>
    tpu.vector_store %arg14[%c0_36, %c0_37], %34 {strides = array<i32>} : memref<8x64xf32, #tpu.memory_space<vmem>>, vector<8x32xf32>,
    %c0_38 = arith.constant 0 : index
    %c32 = arith.constant 32 : index
    %47 = vector.load %arg14[%c0_38, %c32] : memref<8x64xf32, #tpu.memory_space<vmem>>, vector<8x32xf32>
    tpu.vector_store %arg14[%c0_38, %c32], %45 {strides = array<i32>} : memref<8x64xf32, #tpu.memory_space<vmem>>, vector<8x32xf32>,
    return
  }
}

module attributes {stable_mosaic.version = 11 : i64} {
  func.func @_outhead_kernel(%arg0: memref<40x64xf32, #tpu.memory_space<vmem>>, %arg1: memref<64x8xf32, #tpu.memory_space<vmem>>, %arg2: memref<1x8xf32, #tpu.memory_space<vmem>>, %arg3: memref<40x8xf32, #tpu.memory_space<vmem>>) attributes {dimension_semantics = [], scalar_prefetch = 0 : i64, scratch_operands = 0 : i64, tpu.core_type = #tpu.core_type<tc>} {
    %c0 = arith.constant 0 : index
    %c0_0 = arith.constant 0 : index
    %0 = vector.load %arg0[%c0, %c0_0] : memref<40x64xf32, #tpu.memory_space<vmem>>, vector<40x64xf32>
    %c0_1 = arith.constant 0 : index
    %c0_2 = arith.constant 0 : index
    %1 = vector.load %arg1[%c0_1, %c0_2] : memref<64x8xf32, #tpu.memory_space<vmem>>, vector<64x8xf32>
    %cst = arith.constant dense<0.000000e+00> : vector<40x8xf32>
    %2 = tpu.matmul %0, %1, %cst {dimension_numbers = #tpu.dot_dimension_numbers<[1], [0], [0], [1], [0, 0, 1, 1], [], []>} : vector<40x64xf32>, vector<64x8xf32>, vector<40x8xf32> -> vector<40x8xf32>
    %c0_3 = arith.constant 0 : index
    %c0_4 = arith.constant 0 : index
    %3 = vector.load %arg2[%c0_3, %c0_4] : memref<1x8xf32, #tpu.memory_space<vmem>>, vector<1x8xf32>
    %4 = vector.broadcast %3 : vector<1x8xf32> to vector<40x8xf32>
    %5 = arith.addf %2, %4 : vector<40x8xf32>
    %6 = arith.negf %5 : vector<40x8xf32>
    %7 = math.exp %6 : vector<40x8xf32>
    %cst_5 = arith.constant 1.000000e+00 : f32
    %8 = vector.broadcast %cst_5 : f32 to vector<40x8xf32>
    %9 = arith.addf %8, %7 : vector<40x8xf32>
    %10 = arith.divf %8, %9 : vector<40x8xf32>
    %c0_6 = arith.constant 0 : index
    %c0_7 = arith.constant 0 : index
    %11 = vector.load %arg3[%c0_6, %c0_7] : memref<40x8xf32, #tpu.memory_space<vmem>>, vector<40x8xf32>
    tpu.vector_store %arg3[%c0_6, %c0_7], %10 {strides = array<i32>} : memref<40x8xf32, #tpu.memory_space<vmem>>, vector<40x8xf32>,
    return
  }
}

module attributes {stable_mosaic.version = 11 : i64} {
  func.func @_rk4_kernel(%arg0: i32, %arg1: memref<5xf32, #tpu.memory_space<smem>>, %arg2: memref<8x64xf32, #tpu.memory_space<vmem>>, %arg3: memref<8x8xf32, #tpu.memory_space<vmem>>, %arg4: memref<64x64xf32, #tpu.memory_space<vmem>>, %arg5: memref<1x64xf32, #tpu.memory_space<vmem>>, %arg6: memref<1x8x64xf32, #tpu.memory_space<vmem>>, %arg7: memref<8x64xf32, #tpu.memory_space<vmem>>) attributes {dimension_semantics = [#tpu.dimension_semantics<arbitrary>], iteration_bounds = array<i64: 5>, scalar_prefetch = 1 : i64, scratch_operands = 1 : i64, tpu.core_type = #tpu.core_type<tc>, window_params = [{pipeline_mode = #tpu.pipeline_mode<synchronous>, transform_indices = @transform_0, window_bounds = array<i64: 8, 64>}, {pipeline_mode = #tpu.pipeline_mode<synchronous>, transform_indices = @transform_1, window_bounds = array<i64: 8, 8>}, {pipeline_mode = #tpu.pipeline_mode<synchronous>, transform_indices = @transform_2, window_bounds = array<i64: 64, 64>}, {pipeline_mode = #tpu.pipeline_mode<synchronous>, transform_indices = @transform_3, window_bounds = array<i64: 1, 64>}, {transform_indices = @transform_4, window_bounds = array<i64: 1, 8, 64>}]} {
    %c0_i32 = arith.constant 0 : i32
    %0 = arith.cmpi eq, %arg0, %c0_i32 : i32
    %1 = arith.extui %0 : i1 to i32
    %c0_i32_0 = arith.constant 0 : i32
    %2 = arith.cmpi ne, %1, %c0_i32_0 : i32
    scf.if %2 {
      %c0_7 = arith.constant 0 : index
      %c0_8 = arith.constant 0 : index
      %10 = vector.load %arg2[%c0_7, %c0_8] : memref<8x64xf32, #tpu.memory_space<vmem>>, vector<8x64xf32>
      %c0_9 = arith.constant 0 : index
      %c0_10 = arith.constant 0 : index
      %11 = vector.load %arg7[%c0_9, %c0_10] : memref<8x64xf32, #tpu.memory_space<vmem>>, vector<8x64xf32>
      tpu.vector_store %arg7[%c0_9, %c0_10], %10 {strides = array<i32>} : memref<8x64xf32, #tpu.memory_space<vmem>>, vector<8x64xf32>,
    } else {
    }
    %c0_i32_1 = arith.constant 0 : i32
    %3 = arith.cmpi sgt, %arg0, %c0_i32_1 : i32
    %4 = arith.extui %3 : i1 to i32
    %c0_i32_2 = arith.constant 0 : i32
    %5 = arith.cmpi ne, %4, %c0_i32_2 : i32
    scf.if %5 {
      %c0_7 = arith.constant 0 : index
      %c0_8 = arith.constant 0 : index
      %10 = vector.load %arg3[%c0_7, %c0_8] : memref<8x8xf32, #tpu.memory_space<vmem>>, vector<8x8xf32>
      %c0_9 = arith.constant 0 : index
      %c0_10 = arith.constant 0 : index
      %11 = vector.load %arg4[%c0_9, %c0_10] : memref<64x64xf32, #tpu.memory_space<vmem>>, vector<64x64xf32>
      %c0_11 = arith.constant 0 : index
      %c0_12 = arith.constant 0 : index
      %12 = vector.load %arg5[%c0_11, %c0_12] : memref<1x64xf32, #tpu.memory_space<vmem>>, vector<1x64xf32>
      %13 = vector.shape_cast %12 : vector<1x64xf32> to vector<1x64xf32>
      %14 = vector.broadcast %13 : vector<1x64xf32> to vector<8x64xf32>
      %c1_i32 = arith.constant 1 : i32
      %15 = arith.subi %arg0, %c1_i32 : i32
      %16 = arith.index_cast %15 : i32 to index
      %17 = memref.load %arg1[%16] : memref<5xf32, #tpu.memory_space<smem>>
      %18 = arith.index_cast %arg0 : i32 to index
      %19 = memref.load %arg1[%18] : memref<5xf32, #tpu.memory_space<smem>>
      %20 = arith.subf %19, %17 : f32
      %cst = arith.constant 8.000000e+00 : f32
      %21 = arith.divf %20, %cst : f32
      %c0_13 = arith.constant 0 : index
      %c0_14 = arith.constant 0 : index
      %22 = vector.load %arg7[%c0_13, %c0_14] : memref<8x64xf32, #tpu.memory_space<vmem>>, vector<8x64xf32>
      %cst_15 = arith.constant dense<0.000000e+00> : vector<8x64xf32>
      %23 = tpu.matmul %10, %22, %cst_15 {dimension_numbers = #tpu.dot_dimension_numbers<[1], [0], [0], [1], [0, 0, 1, 1], [], []>} : vector<8x8xf32>, vector<8x64xf32>, vector<8x64xf32> -> vector<8x64xf32>
      %cst_16 = arith.constant dense<0.000000e+00> : vector<8x64xf32>
      %24 = tpu.matmul %23, %11, %cst_16 {dimension_numbers = #tpu.dot_dimension_numbers<[1], [0], [0], [1], [0, 0, 1, 1], [], []>} : vector<8x64xf32>, vector<64x64xf32>, vector<8x64xf32> -> vector<8x64xf32>
      %25 = arith.addf %24, %14 : vector<8x64xf32>
      %cst_17 = arith.constant 0.000000e+00 : f32
      %26 = vector.broadcast %cst_17 : f32 to vector<8x64xf32>
      %27 = arith.maximumf %25, %26 : vector<8x64xf32>
      %cst_18 = arith.constant 5.000000e-01 : f32
      %28 = arith.mulf %cst_18, %21 : f32
      %29 = vector.broadcast %28 : f32 to vector<8x64xf32>
      %30 = arith.mulf %29, %27 : vector<8x64xf32>
      %31 = arith.addf %22, %30 : vector<8x64xf32>
      %cst_19 = arith.constant dense<0.000000e+00> : vector<8x64xf32>
      %32 = tpu.matmul %10, %31, %cst_19 {dimension_numbers = #tpu.dot_dimension_numbers<[1], [0], [0], [1], [0, 0, 1, 1], [], []>} : vector<8x8xf32>, vector<8x64xf32>, vector<8x64xf32> -> vector<8x64xf32>
      %cst_20 = arith.constant dense<0.000000e+00> : vector<8x64xf32>
      %33 = tpu.matmul %32, %11, %cst_20 {dimension_numbers = #tpu.dot_dimension_numbers<[1], [0], [0], [1], [0, 0, 1, 1], [], []>} : vector<8x64xf32>, vector<64x64xf32>, vector<8x64xf32> -> vector<8x64xf32>
      %34 = arith.addf %33, %14 : vector<8x64xf32>
      %cst_21 = arith.constant 0.000000e+00 : f32
      %35 = vector.broadcast %cst_21 : f32 to vector<8x64xf32>
      %36 = arith.maximumf %34, %35 : vector<8x64xf32>
      %cst_22 = arith.constant 5.000000e-01 : f32
      %37 = arith.mulf %cst_22, %21 : f32
      %38 = vector.broadcast %37 : f32 to vector<8x64xf32>
      %39 = arith.mulf %38, %36 : vector<8x64xf32>
      %40 = arith.addf %22, %39 : vector<8x64xf32>
      %cst_23 = arith.constant dense<0.000000e+00> : vector<8x64xf32>
      %41 = tpu.matmul %10, %40, %cst_23 {dimension_numbers = #tpu.dot_dimension_numbers<[1], [0], [0], [1], [0, 0, 1, 1], [], []>} : vector<8x8xf32>, vector<8x64xf32>, vector<8x64xf32> -> vector<8x64xf32>
      %cst_24 = arith.constant dense<0.000000e+00> : vector<8x64xf32>
      %42 = tpu.matmul %41, %11, %cst_24 {dimension_numbers = #tpu.dot_dimension_numbers<[1], [0], [0], [1], [0, 0, 1, 1], [], []>} : vector<8x64xf32>, vector<64x64xf32>, vector<8x64xf32> -> vector<8x64xf32>
      %43 = arith.addf %42, %14 : vector<8x64xf32>
      %cst_25 = arith.constant 0.000000e+00 : f32
      %44 = vector.broadcast %cst_25 : f32 to vector<8x64xf32>
      %45 = arith.maximumf %43, %44 : vector<8x64xf32>
      %46 = vector.broadcast %21 : f32 to vector<8x64xf32>
      %47 = arith.mulf %46, %45 : vector<8x64xf32>
      %48 = arith.addf %22, %47 : vector<8x64xf32>
      %cst_26 = arith.constant dense<0.000000e+00> : vector<8x64xf32>
      %49 = tpu.matmul %10, %48, %cst_26 {dimension_numbers = #tpu.dot_dimension_numbers<[1], [0], [0], [1], [0, 0, 1, 1], [], []>} : vector<8x8xf32>, vector<8x64xf32>, vector<8x64xf32> -> vector<8x64xf32>
      %cst_27 = arith.constant dense<0.000000e+00> : vector<8x64xf32>
      %50 = tpu.matmul %49, %11, %cst_27 {dimension_numbers = #tpu.dot_dimension_numbers<[1], [0], [0], [1], [0, 0, 1, 1], [], []>} : vector<8x64xf32>, vector<64x64xf32>, vector<8x64xf32> -> vector<8x64xf32>
      %51 = arith.addf %50, %14 : vector<8x64xf32>
      %cst_28 = arith.constant 0.000000e+00 : f32
      %52 = vector.broadcast %cst_28 : f32 to vector<8x64xf32>
      %53 = arith.maximumf %51, %52 : vector<8x64xf32>
      %cst_29 = arith.constant 6.000000e+00 : f32
      %54 = arith.divf %21, %cst_29 : f32
      %cst_30 = arith.constant 2.000000e+00 : f32
      %55 = vector.broadcast %cst_30 : f32 to vector<8x64xf32>
      %56 = arith.mulf %55, %36 : vector<8x64xf32>
      %57 = arith.addf %27, %56 : vector<8x64xf32>
      %cst_31 = arith.constant 2.000000e+00 : f32
      %58 = vector.broadcast %cst_31 : f32 to vector<8x64xf32>
      %59 = arith.mulf %58, %45 : vector<8x64xf32>
      %60 = arith.addf %57, %59 : vector<8x64xf32>
      %61 = arith.addf %60, %53 : vector<8x64xf32>
      %62 = vector.broadcast %54 : f32 to vector<8x64xf32>
      %63 = arith.mulf %62, %61 : vector<8x64xf32>
      %64 = arith.addf %22, %63 : vector<8x64xf32>
      %cst_32 = arith.constant dense<0.000000e+00> : vector<8x64xf32>
      %65 = tpu.matmul %10, %64, %cst_32 {dimension_numbers = #tpu.dot_dimension_numbers<[1], [0], [0], [1], [0, 0, 1, 1], [], []>} : vector<8x8xf32>, vector<8x64xf32>, vector<8x64xf32> -> vector<8x64xf32>
      %cst_33 = arith.constant dense<0.000000e+00> : vector<8x64xf32>
      %66 = tpu.matmul %65, %11, %cst_33 {dimension_numbers = #tpu.dot_dimension_numbers<[1], [0], [0], [1], [0, 0, 1, 1], [], []>} : vector<8x64xf32>, vector<64x64xf32>, vector<8x64xf32> -> vector<8x64xf32>
      %67 = arith.addf %66, %14 : vector<8x64xf32>
      %cst_34 = arith.constant 0.000000e+00 : f32
      %68 = vector.broadcast %cst_34 : f32 to vector<8x64xf32>
      %69 = arith.maximumf %67, %68 : vector<8x64xf32>
      %cst_35 = arith.constant 5.000000e-01 : f32
      %70 = arith.mulf %cst_35, %21 : f32
      %71 = vector.broadcast %70 : f32 to vector<8x64xf32>
      %72 = arith.mulf %71, %69 : vector<8x64xf32>
      %73 = arith.addf %64, %72 : vector<8x64xf32>
      %cst_36 = arith.constant dense<0.000000e+00> : vector<8x64xf32>
      %74 = tpu.matmul %10, %73, %cst_36 {dimension_numbers = #tpu.dot_dimension_numbers<[1], [0], [0], [1], [0, 0, 1, 1], [], []>} : vector<8x8xf32>, vector<8x64xf32>, vector<8x64xf32> -> vector<8x64xf32>
      %cst_37 = arith.constant dense<0.000000e+00> : vector<8x64xf32>
      %75 = tpu.matmul %74, %11, %cst_37 {dimension_numbers = #tpu.dot_dimension_numbers<[1], [0], [0], [1], [0, 0, 1, 1], [], []>} : vector<8x64xf32>, vector<64x64xf32>, vector<8x64xf32> -> vector<8x64xf32>
      %76 = arith.addf %75, %14 : vector<8x64xf32>
      %cst_38 = arith.constant 0.000000e+00 : f32
      %77 = vector.broadcast %cst_38 : f32 to vector<8x64xf32>
      %78 = arith.maximumf %76, %77 : vector<8x64xf32>
      %cst_39 = arith.constant 5.000000e-01 : f32
      %79 = arith.mulf %cst_39, %21 : f32
      %80 = vector.broadcast %79 : f32 to vector<8x64xf32>
      %81 = arith.mulf %80, %78 : vector<8x64xf32>
      %82 = arith.addf %64, %81 : vector<8x64xf32>
      %cst_40 = arith.constant dense<0.000000e+00> : vector<8x64xf32>
      %83 = tpu.matmul %10, %82, %cst_40 {dimension_numbers = #tpu.dot_dimension_numbers<[1], [0], [0], [1], [0, 0, 1, 1], [], []>} : vector<8x8xf32>, vector<8x64xf32>, vector<8x64xf32> -> vector<8x64xf32>
      %cst_41 = arith.constant dense<0.000000e+00> : vector<8x64xf32>
      %84 = tpu.matmul %83, %11, %cst_41 {dimension_numbers = #tpu.dot_dimension_numbers<[1], [0], [0], [1], [0, 0, 1, 1], [], []>} : vector<8x64xf32>, vector<64x64xf32>, vector<8x64xf32> -> vector<8x64xf32>
      %85 = arith.addf %84, %14 : vector<8x64xf32>
      %cst_42 = arith.constant 0.000000e+00 : f32
      %86 = vector.broadcast %cst_42 : f32 to vector<8x64xf32>
      %87 = arith.maximumf %85, %86 : vector<8x64xf32>
      %88 = vector.broadcast %21 : f32 to vector<8x64xf32>
      %89 = arith.mulf %88, %87 : vector<8x64xf32>
      %90 = arith.addf %64, %89 : vector<8x64xf32>
      %cst_43 = arith.constant dense<0.000000e+00> : vector<8x64xf32>
      %91 = tpu.matmul %10, %90, %cst_43 {dimension_numbers = #tpu.dot_dimension_numbers<[1], [0], [0], [1], [0, 0, 1, 1], [], []>} : vector<8x8xf32>, vector<8x64xf32>, vector<8x64xf32> -> vector<8x64xf32>
      %cst_44 = arith.constant dense<0.000000e+00> : vector<8x64xf32>
      %92 = tpu.matmul %91, %11, %cst_44 {dimension_numbers = #tpu.dot_dimension_numbers<[1], [0], [0], [1], [0, 0, 1, 1], [], []>} : vector<8x64xf32>, vector<64x64xf32>, vector<8x64xf32> -> vector<8x64xf32>
      %93 = arith.addf %92, %14 : vector<8x64xf32>
      %cst_45 = arith.constant 0.000000e+00 : f32
      %94 = vector.broadcast %cst_45 : f32 to vector<8x64xf32>
      %95 = arith.maximumf %93, %94 : vector<8x64xf32>
      %cst_46 = arith.constant 6.000000e+00 : f32
      %96 = arith.divf %21, %cst_46 : f32
      %cst_47 = arith.constant 2.000000e+00 : f32
      %97 = vector.broadcast %cst_47 : f32 to vector<8x64xf32>
      %98 = arith.mulf %97, %78 : vector<8x64xf32>
      %99 = arith.addf %69, %98 : vector<8x64xf32>
      %cst_48 = arith.constant 2.000000e+00 : f32
      %100 = vector.broadcast %cst_48 : f32 to vector<8x64xf32>
      %101 = arith.mulf %100, %87 : vector<8x64xf32>
      %102 = arith.addf %99, %101 : vector<8x64xf32>
      %103 = arith.addf %102, %95 : vector<8x64xf32>
      %104 = vector.broadcast %96 : f32 to vector<8x64xf32>
      %105 = arith.mulf %104, %103 : vector<8x64xf32>
      %106 = arith.addf %64, %105 : vector<8x64xf32>
      %cst_49 = arith.constant dense<0.000000e+00> : vector<8x64xf32>
      %107 = tpu.matmul %10, %106, %cst_49 {dimension_numbers = #tpu.dot_dimension_numbers<[1], [0], [0], [1], [0, 0, 1, 1], [], []>} : vector<8x8xf32>, vector<8x64xf32>, vector<8x64xf32> -> vector<8x64xf32>
      %cst_50 = arith.constant dense<0.000000e+00> : vector<8x64xf32>
      %108 = tpu.matmul %107, %11, %cst_50 {dimension_numbers = #tpu.dot_dimension_numbers<[1], [0], [0], [1], [0, 0, 1, 1], [], []>} : vector<8x64xf32>, vector<64x64xf32>, vector<8x64xf32> -> vector<8x64xf32>
      %109 = arith.addf %108, %14 : vector<8x64xf32>
      %cst_51 = arith.constant 0.000000e+00 : f32
      %110 = vector.broadcast %cst_51 : f32 to vector<8x64xf32>
      %111 = arith.maximumf %109, %110 : vector<8x64xf32>
      %cst_52 = arith.constant 5.000000e-01 : f32
      %112 = arith.mulf %cst_52, %21 : f32
      %113 = vector.broadcast %112 : f32 to vector<8x64xf32>
      %114 = arith.mulf %113, %111 : vector<8x64xf32>
      %115 = arith.addf %106, %114 : vector<8x64xf32>
      %cst_53 = arith.constant dense<0.000000e+00> : vector<8x64xf32>
      %116 = tpu.matmul %10, %115, %cst_53 {dimension_numbers = #tpu.dot_dimension_numbers<[1], [0], [0], [1], [0, 0, 1, 1], [], []>} : vector<8x8xf32>, vector<8x64xf32>, vector<8x64xf32> -> vector<8x64xf32>
      %cst_54 = arith.constant dense<0.000000e+00> : vector<8x64xf32>
      %117 = tpu.matmul %116, %11, %cst_54 {dimension_numbers = #tpu.dot_dimension_numbers<[1], [0], [0], [1], [0, 0, 1, 1], [], []>} : vector<8x64xf32>, vector<64x64xf32>, vector<8x64xf32> -> vector<8x64xf32>
      %118 = arith.addf %117, %14 : vector<8x64xf32>
      %cst_55 = arith.constant 0.000000e+00 : f32
      %119 = vector.broadcast %cst_55 : f32 to vector<8x64xf32>
      %120 = arith.maximumf %118, %119 : vector<8x64xf32>
      %cst_56 = arith.constant 5.000000e-01 : f32
      %121 = arith.mulf %cst_56, %21 : f32
      %122 = vector.broadcast %121 : f32 to vector<8x64xf32>
      %123 = arith.mulf %122, %120 : vector<8x64xf32>
      %124 = arith.addf %106, %123 : vector<8x64xf32>
      %cst_57 = arith.constant dense<0.000000e+00> : vector<8x64xf32>
      %125 = tpu.matmul %10, %124, %cst_57 {dimension_numbers = #tpu.dot_dimension_numbers<[1], [0], [0], [1], [0, 0, 1, 1], [], []>} : vector<8x8xf32>, vector<8x64xf32>, vector<8x64xf32> -> vector<8x64xf32>
      %cst_58 = arith.constant dense<0.000000e+00> : vector<8x64xf32>
      %126 = tpu.matmul %125, %11, %cst_58 {dimension_numbers = #tpu.dot_dimension_numbers<[1], [0], [0], [1], [0, 0, 1, 1], [], []>} : vector<8x64xf32>, vector<64x64xf32>, vector<8x64xf32> -> vector<8x64xf32>
      %127 = arith.addf %126, %14 : vector<8x64xf32>
      %cst_59 = arith.constant 0.000000e+00 : f32
      %128 = vector.broadcast %cst_59 : f32 to vector<8x64xf32>
      %129 = arith.maximumf %127, %128 : vector<8x64xf32>
      %130 = vector.broadcast %21 : f32 to vector<8x64xf32>
      %131 = arith.mulf %130, %129 : vector<8x64xf32>
      %132 = arith.addf %106, %131 : vector<8x64xf32>
      %cst_60 = arith.constant dense<0.000000e+00> : vector<8x64xf32>
      %133 = tpu.matmul %10, %132, %cst_60 {dimension_numbers = #tpu.dot_dimension_numbers<[1], [0], [0], [1], [0, 0, 1, 1], [], []>} : vector<8x8xf32>, vector<8x64xf32>, vector<8x64xf32> -> vector<8x64xf32>
      %cst_61 = arith.constant dense<0.000000e+00> : vector<8x64xf32>
      %134 = tpu.matmul %133, %11, %cst_61 {dimension_numbers = #tpu.dot_dimension_numbers<[1], [0], [0], [1], [0, 0, 1, 1], [], []>} : vector<8x64xf32>, vector<64x64xf32>, vector<8x64xf32> -> vector<8x64xf32>
      %135 = arith.addf %134, %14 : vector<8x64xf32>
      %cst_62 = arith.constant 0.000000e+00 : f32
      %136 = vector.broadcast %cst_62 : f32 to vector<8x64xf32>
      %137 = arith.maximumf %135, %136 : vector<8x64xf32>
      %cst_63 = arith.constant 6.000000e+00 : f32
      %138 = arith.divf %21, %cst_63 : f32
      %cst_64 = arith.constant 2.000000e+00 : f32
      %139 = vector.broadcast %cst_64 : f32 to vector<8x64xf32>
      %140 = arith.mulf %139, %120 : vector<8x64xf32>
      %141 = arith.addf %111, %140 : vector<8x64xf32>
      %cst_65 = arith.constant 2.000000e+00 : f32
      %142 = vector.broadcast %cst_65 : f32 to vector<8x64xf32>
      %143 = arith.mulf %142, %129 : vector<8x64xf32>
      %144 = arith.addf %141, %143 : vector<8x64xf32>
      %145 = arith.addf %144, %137 : vector<8x64xf32>
      %146 = vector.broadcast %138 : f32 to vector<8x64xf32>
      %147 = arith.mulf %146, %145 : vector<8x64xf32>
      %148 = arith.addf %106, %147 : vector<8x64xf32>
      %cst_66 = arith.constant dense<0.000000e+00> : vector<8x64xf32>
      %149 = tpu.matmul %10, %148, %cst_66 {dimension_numbers = #tpu.dot_dimension_numbers<[1], [0], [0], [1], [0, 0, 1, 1], [], []>} : vector<8x8xf32>, vector<8x64xf32>, vector<8x64xf32> -> vector<8x64xf32>
      %cst_67 = arith.constant dense<0.000000e+00> : vector<8x64xf32>
      %150 = tpu.matmul %149, %11, %cst_67 {dimension_numbers = #tpu.dot_dimension_numbers<[1], [0], [0], [1], [0, 0, 1, 1], [], []>} : vector<8x64xf32>, vector<64x64xf32>, vector<8x64xf32> -> vector<8x64xf32>
      %151 = arith.addf %150, %14 : vector<8x64xf32>
      %cst_68 = arith.constant 0.000000e+00 : f32
      %152 = vector.broadcast %cst_68 : f32 to vector<8x64xf32>
      %153 = arith.maximumf %151, %152 : vector<8x64xf32>
      %cst_69 = arith.constant 5.000000e-01 : f32
      %154 = arith.mulf %cst_69, %21 : f32
      %155 = vector.broadcast %154 : f32 to vector<8x64xf32>
      %156 = arith.mulf %155, %153 : vector<8x64xf32>
      %157 = arith.addf %148, %156 : vector<8x64xf32>
      %cst_70 = arith.constant dense<0.000000e+00> : vector<8x64xf32>
      %158 = tpu.matmul %10, %157, %cst_70 {dimension_numbers = #tpu.dot_dimension_numbers<[1], [0], [0], [1], [0, 0, 1, 1], [], []>} : vector<8x8xf32>, vector<8x64xf32>, vector<8x64xf32> -> vector<8x64xf32>
      %cst_71 = arith.constant dense<0.000000e+00> : vector<8x64xf32>
      %159 = tpu.matmul %158, %11, %cst_71 {dimension_numbers = #tpu.dot_dimension_numbers<[1], [0], [0], [1], [0, 0, 1, 1], [], []>} : vector<8x64xf32>, vector<64x64xf32>, vector<8x64xf32> -> vector<8x64xf32>
      %160 = arith.addf %159, %14 : vector<8x64xf32>
      %cst_72 = arith.constant 0.000000e+00 : f32
      %161 = vector.broadcast %cst_72 : f32 to vector<8x64xf32>
      %162 = arith.maximumf %160, %161 : vector<8x64xf32>
      %cst_73 = arith.constant 5.000000e-01 : f32
      %163 = arith.mulf %cst_73, %21 : f32
      %164 = vector.broadcast %163 : f32 to vector<8x64xf32>
      %165 = arith.mulf %164, %162 : vector<8x64xf32>
      %166 = arith.addf %148, %165 : vector<8x64xf32>
      %cst_74 = arith.constant dense<0.000000e+00> : vector<8x64xf32>
      %167 = tpu.matmul %10, %166, %cst_74 {dimension_numbers = #tpu.dot_dimension_numbers<[1], [0], [0], [1], [0, 0, 1, 1], [], []>} : vector<8x8xf32>, vector<8x64xf32>, vector<8x64xf32> -> vector<8x64xf32>
      %cst_75 = arith.constant dense<0.000000e+00> : vector<8x64xf32>
      %168 = tpu.matmul %167, %11, %cst_75 {dimension_numbers = #tpu.dot_dimension_numbers<[1], [0], [0], [1], [0, 0, 1, 1], [], []>} : vector<8x64xf32>, vector<64x64xf32>, vector<8x64xf32> -> vector<8x64xf32>
      %169 = arith.addf %168, %14 : vector<8x64xf32>
      %cst_76 = arith.constant 0.000000e+00 : f32
      %170 = vector.broadcast %cst_76 : f32 to vector<8x64xf32>
      %171 = arith.maximumf %169, %170 : vector<8x64xf32>
      %172 = vector.broadcast %21 : f32 to vector<8x64xf32>
      %173 = arith.mulf %172, %171 : vector<8x64xf32>
      %174 = arith.addf %148, %173 : vector<8x64xf32>
      %cst_77 = arith.constant dense<0.000000e+00> : vector<8x64xf32>
      %175 = tpu.matmul %10, %174, %cst_77 {dimension_numbers = #tpu.dot_dimension_numbers<[1], [0], [0], [1], [0, 0, 1, 1], [], []>} : vector<8x8xf32>, vector<8x64xf32>, vector<8x64xf32> -> vector<8x64xf32>
      %cst_78 = arith.constant dense<0.000000e+00> : vector<8x64xf32>
      %176 = tpu.matmul %175, %11, %cst_78 {dimension_numbers = #tpu.dot_dimension_numbers<[1], [0], [0], [1], [0, 0, 1, 1], [], []>} : vector<8x64xf32>, vector<64x64xf32>, vector<8x64xf32> -> vector<8x64xf32>
      %177 = arith.addf %176, %14 : vector<8x64xf32>
      %cst_79 = arith.constant 0.000000e+00 : f32
      %178 = vector.broadcast %cst_79 : f32 to vector<8x64xf32>
      %179 = arith.maximumf %177, %178 : vector<8x64xf32>
      %cst_80 = arith.constant 6.000000e+00 : f32
      %180 = arith.divf %21, %cst_80 : f32
      %cst_81 = arith.constant 2.000000e+00 : f32
      %181 = vector.broadcast %cst_81 : f32 to vector<8x64xf32>
      %182 = arith.mulf %181, %162 : vector<8x64xf32>
      %183 = arith.addf %153, %182 : vector<8x64xf32>
      %cst_82 = arith.constant 2.000000e+00 : f32
      %184 = vector.broadcast %cst_82 : f32 to vector<8x64xf32>
      %185 = arith.mulf %184, %171 : vector<8x64xf32>
      %186 = arith.addf %183, %185 : vector<8x64xf32>
      %187 = arith.addf %186, %179 : vector<8x64xf32>
      %188 = vector.broadcast %180 : f32 to vector<8x64xf32>
      %189 = arith.mulf %188, %187 : vector<8x64xf32>
      %190 = arith.addf %148, %189 : vector<8x64xf32>
      %cst_83 = arith.constant dense<0.000000e+00> : vector<8x64xf32>
      %191 = tpu.matmul %10, %190, %cst_83 {dimension_numbers = #tpu.dot_dimension_numbers<[1], [0], [0], [1], [0, 0, 1, 1], [], []>} : vector<8x8xf32>, vector<8x64xf32>, vector<8x64xf32> -> vector<8x64xf32>
      %cst_84 = arith.constant dense<0.000000e+00> : vector<8x64xf32>
      %192 = tpu.matmul %191, %11, %cst_84 {dimension_numbers = #tpu.dot_dimension_numbers<[1], [0], [0], [1], [0, 0, 1, 1], [], []>} : vector<8x64xf32>, vector<64x64xf32>, vector<8x64xf32> -> vector<8x64xf32>
      %193 = arith.addf %192, %14 : vector<8x64xf32>
      %cst_85 = arith.constant 0.000000e+00 : f32
      %194 = vector.broadcast %cst_85 : f32 to vector<8x64xf32>
      %195 = arith.maximumf %193, %194 : vector<8x64xf32>
      %cst_86 = arith.constant 5.000000e-01 : f32
      %196 = arith.mulf %cst_86, %21 : f32
      %197 = vector.broadcast %196 : f32 to vector<8x64xf32>
      %198 = arith.mulf %197, %195 : vector<8x64xf32>
      %199 = arith.addf %190, %198 : vector<8x64xf32>
      %cst_87 = arith.constant dense<0.000000e+00> : vector<8x64xf32>
      %200 = tpu.matmul %10, %199, %cst_87 {dimension_numbers = #tpu.dot_dimension_numbers<[1], [0], [0], [1], [0, 0, 1, 1], [], []>} : vector<8x8xf32>, vector<8x64xf32>, vector<8x64xf32> -> vector<8x64xf32>
      %cst_88 = arith.constant dense<0.000000e+00> : vector<8x64xf32>
      %201 = tpu.matmul %200, %11, %cst_88 {dimension_numbers = #tpu.dot_dimension_numbers<[1], [0], [0], [1], [0, 0, 1, 1], [], []>} : vector<8x64xf32>, vector<64x64xf32>, vector<8x64xf32> -> vector<8x64xf32>
      %202 = arith.addf %201, %14 : vector<8x64xf32>
      %cst_89 = arith.constant 0.000000e+00 : f32
      %203 = vector.broadcast %cst_89 : f32 to vector<8x64xf32>
      %204 = arith.maximumf %202, %203 : vector<8x64xf32>
      %cst_90 = arith.constant 5.000000e-01 : f32
      %205 = arith.mulf %cst_90, %21 : f32
      %206 = vector.broadcast %205 : f32 to vector<8x64xf32>
      %207 = arith.mulf %206, %204 : vector<8x64xf32>
      %208 = arith.addf %190, %207 : vector<8x64xf32>
      %cst_91 = arith.constant dense<0.000000e+00> : vector<8x64xf32>
      %209 = tpu.matmul %10, %208, %cst_91 {dimension_numbers = #tpu.dot_dimension_numbers<[1], [0], [0], [1], [0, 0, 1, 1], [], []>} : vector<8x8xf32>, vector<8x64xf32>, vector<8x64xf32> -> vector<8x64xf32>
      %cst_92 = arith.constant dense<0.000000e+00> : vector<8x64xf32>
      %210 = tpu.matmul %209, %11, %cst_92 {dimension_numbers = #tpu.dot_dimension_numbers<[1], [0], [0], [1], [0, 0, 1, 1], [], []>} : vector<8x64xf32>, vector<64x64xf32>, vector<8x64xf32> -> vector<8x64xf32>
      %211 = arith.addf %210, %14 : vector<8x64xf32>
      %cst_93 = arith.constant 0.000000e+00 : f32
      %212 = vector.broadcast %cst_93 : f32 to vector<8x64xf32>
      %213 = arith.maximumf %211, %212 : vector<8x64xf32>
      %214 = vector.broadcast %21 : f32 to vector<8x64xf32>
      %215 = arith.mulf %214, %213 : vector<8x64xf32>
      %216 = arith.addf %190, %215 : vector<8x64xf32>
      %cst_94 = arith.constant dense<0.000000e+00> : vector<8x64xf32>
      %217 = tpu.matmul %10, %216, %cst_94 {dimension_numbers = #tpu.dot_dimension_numbers<[1], [0], [0], [1], [0, 0, 1, 1], [], []>} : vector<8x8xf32>, vector<8x64xf32>, vector<8x64xf32> -> vector<8x64xf32>
      %cst_95 = arith.constant dense<0.000000e+00> : vector<8x64xf32>
      %218 = tpu.matmul %217, %11, %cst_95 {dimension_numbers = #tpu.dot_dimension_numbers<[1], [0], [0], [1], [0, 0, 1, 1], [], []>} : vector<8x64xf32>, vector<64x64xf32>, vector<8x64xf32> -> vector<8x64xf32>
      %219 = arith.addf %218, %14 : vector<8x64xf32>
      %cst_96 = arith.constant 0.000000e+00 : f32
      %220 = vector.broadcast %cst_96 : f32 to vector<8x64xf32>
      %221 = arith.maximumf %219, %220 : vector<8x64xf32>
      %cst_97 = arith.constant 6.000000e+00 : f32
      %222 = arith.divf %21, %cst_97 : f32
      %cst_98 = arith.constant 2.000000e+00 : f32
      %223 = vector.broadcast %cst_98 : f32 to vector<8x64xf32>
      %224 = arith.mulf %223, %204 : vector<8x64xf32>
      %225 = arith.addf %195, %224 : vector<8x64xf32>
      %cst_99 = arith.constant 2.000000e+00 : f32
      %226 = vector.broadcast %cst_99 : f32 to vector<8x64xf32>
      %227 = arith.mulf %226, %213 : vector<8x64xf32>
      %228 = arith.addf %225, %227 : vector<8x64xf32>
      %229 = arith.addf %228, %221 : vector<8x64xf32>
      %230 = vector.broadcast %222 : f32 to vector<8x64xf32>
      %231 = arith.mulf %230, %229 : vector<8x64xf32>
      %232 = arith.addf %190, %231 : vector<8x64xf32>
      %cst_100 = arith.constant dense<0.000000e+00> : vector<8x64xf32>
      %233 = tpu.matmul %10, %232, %cst_100 {dimension_numbers = #tpu.dot_dimension_numbers<[1], [0], [0], [1], [0, 0, 1, 1], [], []>} : vector<8x8xf32>, vector<8x64xf32>, vector<8x64xf32> -> vector<8x64xf32>
      %cst_101 = arith.constant dense<0.000000e+00> : vector<8x64xf32>
      %234 = tpu.matmul %233, %11, %cst_101 {dimension_numbers = #tpu.dot_dimension_numbers<[1], [0], [0], [1], [0, 0, 1, 1], [], []>} : vector<8x64xf32>, vector<64x64xf32>, vector<8x64xf32> -> vector<8x64xf32>
      %235 = arith.addf %234, %14 : vector<8x64xf32>
      %cst_102 = arith.constant 0.000000e+00 : f32
      %236 = vector.broadcast %cst_102 : f32 to vector<8x64xf32>
      %237 = arith.maximumf %235, %236 : vector<8x64xf32>
      %cst_103 = arith.constant 5.000000e-01 : f32
      %238 = arith.mulf %cst_103, %21 : f32
      %239 = vector.broadcast %238 : f32 to vector<8x64xf32>
      %240 = arith.mulf %239, %237 : vector<8x64xf32>
      %241 = arith.addf %232, %240 : vector<8x64xf32>
      %cst_104 = arith.constant dense<0.000000e+00> : vector<8x64xf32>
      %242 = tpu.matmul %10, %241, %cst_104 {dimension_numbers = #tpu.dot_dimension_numbers<[1], [0], [0], [1], [0, 0, 1, 1], [], []>} : vector<8x8xf32>, vector<8x64xf32>, vector<8x64xf32> -> vector<8x64xf32>
      %cst_105 = arith.constant dense<0.000000e+00> : vector<8x64xf32>
      %243 = tpu.matmul %242, %11, %cst_105 {dimension_numbers = #tpu.dot_dimension_numbers<[1], [0], [0], [1], [0, 0, 1, 1], [], []>} : vector<8x64xf32>, vector<64x64xf32>, vector<8x64xf32> -> vector<8x64xf32>
      %244 = arith.addf %243, %14 : vector<8x64xf32>
      %cst_106 = arith.constant 0.000000e+00 : f32
      %245 = vector.broadcast %cst_106 : f32 to vector<8x64xf32>
      %246 = arith.maximumf %244, %245 : vector<8x64xf32>
      %cst_107 = arith.constant 5.000000e-01 : f32
      %247 = arith.mulf %cst_107, %21 : f32
      %248 = vector.broadcast %247 : f32 to vector<8x64xf32>
      %249 = arith.mulf %248, %246 : vector<8x64xf32>
      %250 = arith.addf %232, %249 : vector<8x64xf32>
      %cst_108 = arith.constant dense<0.000000e+00> : vector<8x64xf32>
      %251 = tpu.matmul %10, %250, %cst_108 {dimension_numbers = #tpu.dot_dimension_numbers<[1], [0], [0], [1], [0, 0, 1, 1], [], []>} : vector<8x8xf32>, vector<8x64xf32>, vector<8x64xf32> -> vector<8x64xf32>
      %cst_109 = arith.constant dense<0.000000e+00> : vector<8x64xf32>
      %252 = tpu.matmul %251, %11, %cst_109 {dimension_numbers = #tpu.dot_dimension_numbers<[1], [0], [0], [1], [0, 0, 1, 1], [], []>} : vector<8x64xf32>, vector<64x64xf32>, vector<8x64xf32> -> vector<8x64xf32>
      %253 = arith.addf %252, %14 : vector<8x64xf32>
      %cst_110 = arith.constant 0.000000e+00 : f32
      %254 = vector.broadcast %cst_110 : f32 to vector<8x64xf32>
      %255 = arith.maximumf %253, %254 : vector<8x64xf32>
      %256 = vector.broadcast %21 : f32 to vector<8x64xf32>
      %257 = arith.mulf %256, %255 : vector<8x64xf32>
      %258 = arith.addf %232, %257 : vector<8x64xf32>
      %cst_111 = arith.constant dense<0.000000e+00> : vector<8x64xf32>
      %259 = tpu.matmul %10, %258, %cst_111 {dimension_numbers = #tpu.dot_dimension_numbers<[1], [0], [0], [1], [0, 0, 1, 1], [], []>} : vector<8x8xf32>, vector<8x64xf32>, vector<8x64xf32> -> vector<8x64xf32>
      %cst_112 = arith.constant dense<0.000000e+00> : vector<8x64xf32>
      %260 = tpu.matmul %259, %11, %cst_112 {dimension_numbers = #tpu.dot_dimension_numbers<[1], [0], [0], [1], [0, 0, 1, 1], [], []>} : vector<8x64xf32>, vector<64x64xf32>, vector<8x64xf32> -> vector<8x64xf32>
      %261 = arith.addf %260, %14 : vector<8x64xf32>
      %cst_113 = arith.constant 0.000000e+00 : f32
      %262 = vector.broadcast %cst_113 : f32 to vector<8x64xf32>
      %263 = arith.maximumf %261, %262 : vector<8x64xf32>
      %cst_114 = arith.constant 6.000000e+00 : f32
      %264 = arith.divf %21, %cst_114 : f32
      %cst_115 = arith.constant 2.000000e+00 : f32
      %265 = vector.broadcast %cst_115 : f32 to vector<8x64xf32>
      %266 = arith.mulf %265, %246 : vector<8x64xf32>
      %267 = arith.addf %237, %266 : vector<8x64xf32>
      %cst_116 = arith.constant 2.000000e+00 : f32
      %268 = vector.broadcast %cst_116 : f32 to vector<8x64xf32>
      %269 = arith.mulf %268, %255 : vector<8x64xf32>
      %270 = arith.addf %267, %269 : vector<8x64xf32>
      %271 = arith.addf %270, %263 : vector<8x64xf32>
      %272 = vector.broadcast %264 : f32 to vector<8x64xf32>
      %273 = arith.mulf %272, %271 : vector<8x64xf32>
      %274 = arith.addf %232, %273 : vector<8x64xf32>
      %cst_117 = arith.constant dense<0.000000e+00> : vector<8x64xf32>
      %275 = tpu.matmul %10, %274, %cst_117 {dimension_numbers = #tpu.dot_dimension_numbers<[1], [0], [0], [1], [0, 0, 1, 1], [], []>} : vector<8x8xf32>, vector<8x64xf32>, vector<8x64xf32> -> vector<8x64xf32>
      %cst_118 = arith.constant dense<0.000000e+00> : vector<8x64xf32>
      %276 = tpu.matmul %275, %11, %cst_118 {dimension_numbers = #tpu.dot_dimension_numbers<[1], [0], [0], [1], [0, 0, 1, 1], [], []>} : vector<8x64xf32>, vector<64x64xf32>, vector<8x64xf32> -> vector<8x64xf32>
      %277 = arith.addf %276, %14 : vector<8x64xf32>
      %cst_119 = arith.constant 0.000000e+00 : f32
      %278 = vector.broadcast %cst_119 : f32 to vector<8x64xf32>
      %279 = arith.maximumf %277, %278 : vector<8x64xf32>
      %cst_120 = arith.constant 5.000000e-01 : f32
      %280 = arith.mulf %cst_120, %21 : f32
      %281 = vector.broadcast %280 : f32 to vector<8x64xf32>
      %282 = arith.mulf %281, %279 : vector<8x64xf32>
      %283 = arith.addf %274, %282 : vector<8x64xf32>
      %cst_121 = arith.constant dense<0.000000e+00> : vector<8x64xf32>
      %284 = tpu.matmul %10, %283, %cst_121 {dimension_numbers = #tpu.dot_dimension_numbers<[1], [0], [0], [1], [0, 0, 1, 1], [], []>} : vector<8x8xf32>, vector<8x64xf32>, vector<8x64xf32> -> vector<8x64xf32>
      %cst_122 = arith.constant dense<0.000000e+00> : vector<8x64xf32>
      %285 = tpu.matmul %284, %11, %cst_122 {dimension_numbers = #tpu.dot_dimension_numbers<[1], [0], [0], [1], [0, 0, 1, 1], [], []>} : vector<8x64xf32>, vector<64x64xf32>, vector<8x64xf32> -> vector<8x64xf32>
      %286 = arith.addf %285, %14 : vector<8x64xf32>
      %cst_123 = arith.constant 0.000000e+00 : f32
      %287 = vector.broadcast %cst_123 : f32 to vector<8x64xf32>
      %288 = arith.maximumf %286, %287 : vector<8x64xf32>
      %cst_124 = arith.constant 5.000000e-01 : f32
      %289 = arith.mulf %cst_124, %21 : f32
      %290 = vector.broadcast %289 : f32 to vector<8x64xf32>
      %291 = arith.mulf %290, %288 : vector<8x64xf32>
      %292 = arith.addf %274, %291 : vector<8x64xf32>
      %cst_125 = arith.constant dense<0.000000e+00> : vector<8x64xf32>
      %293 = tpu.matmul %10, %292, %cst_125 {dimension_numbers = #tpu.dot_dimension_numbers<[1], [0], [0], [1], [0, 0, 1, 1], [], []>} : vector<8x8xf32>, vector<8x64xf32>, vector<8x64xf32> -> vector<8x64xf32>
      %cst_126 = arith.constant dense<0.000000e+00> : vector<8x64xf32>
      %294 = tpu.matmul %293, %11, %cst_126 {dimension_numbers = #tpu.dot_dimension_numbers<[1], [0], [0], [1], [0, 0, 1, 1], [], []>} : vector<8x64xf32>, vector<64x64xf32>, vector<8x64xf32> -> vector<8x64xf32>
      %295 = arith.addf %294, %14 : vector<8x64xf32>
      %cst_127 = arith.constant 0.000000e+00 : f32
      %296 = vector.broadcast %cst_127 : f32 to vector<8x64xf32>
      %297 = arith.maximumf %295, %296 : vector<8x64xf32>
      %298 = vector.broadcast %21 : f32 to vector<8x64xf32>
      %299 = arith.mulf %298, %297 : vector<8x64xf32>
      %300 = arith.addf %274, %299 : vector<8x64xf32>
      %cst_128 = arith.constant dense<0.000000e+00> : vector<8x64xf32>
      %301 = tpu.matmul %10, %300, %cst_128 {dimension_numbers = #tpu.dot_dimension_numbers<[1], [0], [0], [1], [0, 0, 1, 1], [], []>} : vector<8x8xf32>, vector<8x64xf32>, vector<8x64xf32> -> vector<8x64xf32>
      %cst_129 = arith.constant dense<0.000000e+00> : vector<8x64xf32>
      %302 = tpu.matmul %301, %11, %cst_129 {dimension_numbers = #tpu.dot_dimension_numbers<[1], [0], [0], [1], [0, 0, 1, 1], [], []>} : vector<8x64xf32>, vector<64x64xf32>, vector<8x64xf32> -> vector<8x64xf32>
      %303 = arith.addf %302, %14 : vector<8x64xf32>
      %cst_130 = arith.constant 0.000000e+00 : f32
      %304 = vector.broadcast %cst_130 : f32 to vector<8x64xf32>
      %305 = arith.maximumf %303, %304 : vector<8x64xf32>
      %cst_131 = arith.constant 6.000000e+00 : f32
      %306 = arith.divf %21, %cst_131 : f32
      %cst_132 = arith.constant 2.000000e+00 : f32
      %307 = vector.broadcast %cst_132 : f32 to vector<8x64xf32>
      %308 = arith.mulf %307, %288 : vector<8x64xf32>
      %309 = arith.addf %279, %308 : vector<8x64xf32>
      %cst_133 = arith.constant 2.000000e+00 : f32
      %310 = vector.broadcast %cst_133 : f32 to vector<8x64xf32>
      %311 = arith.mulf %310, %297 : vector<8x64xf32>
      %312 = arith.addf %309, %311 : vector<8x64xf32>
      %313 = arith.addf %312, %305 : vector<8x64xf32>
      %314 = vector.broadcast %306 : f32 to vector<8x64xf32>
      %315 = arith.mulf %314, %313 : vector<8x64xf32>
      %316 = arith.addf %274, %315 : vector<8x64xf32>
      %cst_134 = arith.constant dense<0.000000e+00> : vector<8x64xf32>
      %317 = tpu.matmul %10, %316, %cst_134 {dimension_numbers = #tpu.dot_dimension_numbers<[1], [0], [0], [1], [0, 0, 1, 1], [], []>} : vector<8x8xf32>, vector<8x64xf32>, vector<8x64xf32> -> vector<8x64xf32>
      %cst_135 = arith.constant dense<0.000000e+00> : vector<8x64xf32>
      %318 = tpu.matmul %317, %11, %cst_135 {dimension_numbers = #tpu.dot_dimension_numbers<[1], [0], [0], [1], [0, 0, 1, 1], [], []>} : vector<8x64xf32>, vector<64x64xf32>, vector<8x64xf32> -> vector<8x64xf32>
      %319 = arith.addf %318, %14 : vector<8x64xf32>
      %cst_136 = arith.constant 0.000000e+00 : f32
      %320 = vector.broadcast %cst_136 : f32 to vector<8x64xf32>
      %321 = arith.maximumf %319, %320 : vector<8x64xf32>
      %cst_137 = arith.constant 5.000000e-01 : f32
      %322 = arith.mulf %cst_137, %21 : f32
      %323 = vector.broadcast %322 : f32 to vector<8x64xf32>
      %324 = arith.mulf %323, %321 : vector<8x64xf32>
      %325 = arith.addf %316, %324 : vector<8x64xf32>
      %cst_138 = arith.constant dense<0.000000e+00> : vector<8x64xf32>
      %326 = tpu.matmul %10, %325, %cst_138 {dimension_numbers = #tpu.dot_dimension_numbers<[1], [0], [0], [1], [0, 0, 1, 1], [], []>} : vector<8x8xf32>, vector<8x64xf32>, vector<8x64xf32> -> vector<8x64xf32>
      %cst_139 = arith.constant dense<0.000000e+00> : vector<8x64xf32>
      %327 = tpu.matmul %326, %11, %cst_139 {dimension_numbers = #tpu.dot_dimension_numbers<[1], [0], [0], [1], [0, 0, 1, 1], [], []>} : vector<8x64xf32>, vector<64x64xf32>, vector<8x64xf32> -> vector<8x64xf32>
      %328 = arith.addf %327, %14 : vector<8x64xf32>
      %cst_140 = arith.constant 0.000000e+00 : f32
      %329 = vector.broadcast %cst_140 : f32 to vector<8x64xf32>
      %330 = arith.maximumf %328, %329 : vector<8x64xf32>
      %cst_141 = arith.constant 5.000000e-01 : f32
      %331 = arith.mulf %cst_141, %21 : f32
      %332 = vector.broadcast %331 : f32 to vector<8x64xf32>
      %333 = arith.mulf %332, %330 : vector<8x64xf32>
      %334 = arith.addf %316, %333 : vector<8x64xf32>
      %cst_142 = arith.constant dense<0.000000e+00> : vector<8x64xf32>
      %335 = tpu.matmul %10, %334, %cst_142 {dimension_numbers = #tpu.dot_dimension_numbers<[1], [0], [0], [1], [0, 0, 1, 1], [], []>} : vector<8x8xf32>, vector<8x64xf32>, vector<8x64xf32> -> vector<8x64xf32>
      %cst_143 = arith.constant dense<0.000000e+00> : vector<8x64xf32>
      %336 = tpu.matmul %335, %11, %cst_143 {dimension_numbers = #tpu.dot_dimension_numbers<[1], [0], [0], [1], [0, 0, 1, 1], [], []>} : vector<8x64xf32>, vector<64x64xf32>, vector<8x64xf32> -> vector<8x64xf32>
      %337 = arith.addf %336, %14 : vector<8x64xf32>
      %cst_144 = arith.constant 0.000000e+00 : f32
      %338 = vector.broadcast %cst_144 : f32 to vector<8x64xf32>
      %339 = arith.maximumf %337, %338 : vector<8x64xf32>
      %340 = vector.broadcast %21 : f32 to vector<8x64xf32>
      %341 = arith.mulf %340, %339 : vector<8x64xf32>
      %342 = arith.addf %316, %341 : vector<8x64xf32>
      %cst_145 = arith.constant dense<0.000000e+00> : vector<8x64xf32>
      %343 = tpu.matmul %10, %342, %cst_145 {dimension_numbers = #tpu.dot_dimension_numbers<[1], [0], [0], [1], [0, 0, 1, 1], [], []>} : vector<8x8xf32>, vector<8x64xf32>, vector<8x64xf32> -> vector<8x64xf32>
      %cst_146 = arith.constant dense<0.000000e+00> : vector<8x64xf32>
      %344 = tpu.matmul %343, %11, %cst_146 {dimension_numbers = #tpu.dot_dimension_numbers<[1], [0], [0], [1], [0, 0, 1, 1], [], []>} : vector<8x64xf32>, vector<64x64xf32>, vector<8x64xf32> -> vector<8x64xf32>
      %345 = arith.addf %344, %14 : vector<8x64xf32>
      %cst_147 = arith.constant 0.000000e+00 : f32
      %346 = vector.broadcast %cst_147 : f32 to vector<8x64xf32>
      %347 = arith.maximumf %345, %346 : vector<8x64xf32>
      %cst_148 = arith.constant 6.000000e+00 : f32
      %348 = arith.divf %21, %cst_148 : f32
      %cst_149 = arith.constant 2.000000e+00 : f32
      %349 = vector.broadcast %cst_149 : f32 to vector<8x64xf32>
      %350 = arith.mulf %349, %330 : vector<8x64xf32>
      %351 = arith.addf %321, %350 : vector<8x64xf32>
      %cst_150 = arith.constant 2.000000e+00 : f32
      %352 = vector.broadcast %cst_150 : f32 to vector<8x64xf32>
      %353 = arith.mulf %352, %339 : vector<8x64xf32>
      %354 = arith.addf %351, %353 : vector<8x64xf32>
      %355 = arith.addf %354, %347 : vector<8x64xf32>
      %356 = vector.broadcast %348 : f32 to vector<8x64xf32>
      %357 = arith.mulf %356, %355 : vector<8x64xf32>
      %358 = arith.addf %316, %357 : vector<8x64xf32>
      %c0_151 = arith.constant 0 : index
      %c0_152 = arith.constant 0 : index
      %359 = vector.load %arg7[%c0_151, %c0_152] : memref<8x64xf32, #tpu.memory_space<vmem>>, vector<8x64xf32>
      tpu.vector_store %arg7[%c0_151, %c0_152], %358 {strides = array<i32>} : memref<8x64xf32, #tpu.memory_space<vmem>>, vector<8x64xf32>,
    } else {
    }
    %c0 = arith.constant 0 : index
    %c0_3 = arith.constant 0 : index
    %6 = vector.load %arg7[%c0, %c0_3] : memref<8x64xf32, #tpu.memory_space<vmem>>, vector<8x64xf32>
    %c0_4 = arith.constant 0 : index
    %c0_5 = arith.constant 0 : index
    %c0_6 = arith.constant 0 : index
    %7 = vector.load %arg6[%c0_4, %c0_5, %c0_6] : memref<1x8x64xf32, #tpu.memory_space<vmem>>, vector<1x8x64xf32>
    %8 = vector.shape_cast %7 : vector<1x8x64xf32> to vector<8x64xf32>
    %9 = vector.shape_cast %6 : vector<8x64xf32> to vector<1x8x64xf32>
    tpu.vector_store %arg6[%c0_4, %c0_5, %c0_6], %9 {strides = array<i32>} : memref<1x8x64xf32, #tpu.memory_space<vmem>>, vector<1x8x64xf32>,
    return
  }
  func.func @transform_0(%arg0: i32, %arg1: memref<5xf32, #tpu.memory_space<smem>>) -> (i32, i32) {
    %c0_i32 = arith.constant 0 : i32
    %c0_i32_0 = arith.constant 0 : i32
    %c0_i32_1 = arith.constant 0 : i32
    return %c0_i32, %c0_i32_0 : i32, i32
  }
  func.func @transform_1(%arg0: i32, %arg1: memref<5xf32, #tpu.memory_space<smem>>) -> (i32, i32) {
    %c0_i32 = arith.constant 0 : i32
    %c0_i32_0 = arith.constant 0 : i32
    %c0_i32_1 = arith.constant 0 : i32
    return %c0_i32, %c0_i32_0 : i32, i32
  }
  func.func @transform_2(%arg0: i32, %arg1: memref<5xf32, #tpu.memory_space<smem>>) -> (i32, i32) {
    %c0_i32 = arith.constant 0 : i32
    %c0_i32_0 = arith.constant 0 : i32
    %c0_i32_1 = arith.constant 0 : i32
    return %c0_i32, %c0_i32_0 : i32, i32
  }
  func.func @transform_3(%arg0: i32, %arg1: memref<5xf32, #tpu.memory_space<smem>>) -> (i32, i32) {
    %c0_i32 = arith.constant 0 : i32
    %c0_i32_0 = arith.constant 0 : i32
    %c0_i32_1 = arith.constant 0 : i32
    return %c0_i32, %c0_i32_0 : i32, i32
  }
  func.func @transform_4(%arg0: i32, %arg1: memref<5xf32, #tpu.memory_space<smem>>) -> (i32, i32, i32) {
    %c0_i32 = arith.constant 0 : i32
    %c0_i32_0 = arith.constant 0 : i32
    %c0_i32_1 = arith.constant 0 : i32
    return %arg0, %c0_i32, %c0_i32_0 : i32, i32, i32
  }
}

</mosaic_0001>

<bundles_post_ra>
// kernel: bdg_ode_forward.5
= control target key start
LH: loop header
LB: loop body
LE: loop exit
PB: predicated region body
PF: predicated region fallthrough
CT: control target
= control target key end

     0   :  { %v273_v0 = vmov 0.0   ;;  %vm34_vm0 = vcmask 523264   ;;  %vm274_vm1 = vmmov 0   ;;  %vm170_vm2 = vcmask 64512   ;;  %s357_s1 = inlined_call_operand.vmem [shape: f32[64,8], index: 1, kind: input, shape index: {}]   ;;  %s358_s0 = inlined_call_operand.vmem [shape: f32[40,64], index: 0, kind: input, shape index: {}]   ;;  %s359_s2 = inlined_call_operand.vmem [shape: f32[1,8], index: 2, kind: input, shape index: {}]   ;;  %s360_s3 = inlined_call_operand.vmem [shape: f32[40,8], index: 3, kind: output, shape index: {}]  }
   0x1   :  { %204 = vmatprep.subr.mxu0 %v273_v0  ;;  %v26_v1 = vld [vmem:[%s357_s1 + $0x38] sm:$0xff]  ;;  %235 = vmatprep.subr.mxu1 %v273_v0  ;;  %v25_v2 = vld [vmem:[%s357_s1 + $0x30] sm:$0xff]  ;;  %v24_v3 = vld [vmem:[%s357_s1 + $0x28] sm:$0xff] }
   0x2   :  { %205 = vmatpush3.msra.mxu0 %v26_v1  ;;  %243 = vmatpush3.msra.mxu1 %v26_v1  ;;  %v23_v4 = vld [vmem:[%s357_s1 + $0x20] sm:$0xff]  ;;  %v22_v5 = vld [vmem:[%s357_s1 + $0x18] sm:$0xff]  ;;  %v21_v6 = vld [vmem:[%s357_s1 + $0x10] sm:$0xff] }
   0x3   :  { %206 = vmatprep.subr.mxu0 %v273_v0  ;;  %236 = vmatprep.subr.mxu1 %v273_v0  ;;  %v20_v7 = vld [vmem:[%s357_s1 + $0x8] sm:$0xff]  ;;  %v19_v8 = vld [vmem:[%s357_s1] sm:$0xff]  ;;  %v17_v10 = vld [vmem:[%s358_s0 + $0x18] sm:$0xff] }
   0x4   :  { %207 = vmatpush3.msra.mxu0 %v25_v2  ;;  %244 = vmatpush3.msra.mxu1 %v25_v2  ;;  %v14_v9 = vld [vmem:[%s358_s0] sm:$0xff]  ;;  %v15_v11 = vld [vmem:[%s358_s0 + $0x8] sm:$0xff]  ;;  %v16_v13 = vld [vmem:[%s358_s0 + $0x10] sm:$0xff] }
   0x5   :  { %208 = vmatprep.subr.mxu0 %v273_v0  ;;  %237 = vmatprep.subr.mxu1 %v273_v0  ;;  %v18_v12 = vld [vmem:[%s358_s0 + $0x20] sm:$0xff] }
   0x6   :  { %209 = vmatpush3.msra.mxu0 %v24_v3  ;;  %245 = vmatpush3.msra.mxu1 %v24_v3  ;;  %v180_v14 = vld [vmem:[%s359_s2] ss:$0 sm:$0xff] }
   0x7   :  { %210 = vmatprep.subr.mxu0 %v273_v0  ;;  %238 = vmatprep.subr.mxu1 %v273_v0 }
   0x8   :  { %211 = vmatpush3.msra.mxu0 %v23_v4  ;;  %246 = vmatpush3.msra.mxu1 %v23_v4 }
   0x9   :  { %212 = vmatprep.subr.mxu0 %v273_v0  ;;  %239 = vmatprep.subr.mxu1 %v273_v0 }
   0xa   :  { %213 = vmatpush3.msra.mxu0 %v22_v5  ;;  %247 = vmatpush3.msra.mxu1 %v22_v5 }
   0xb   :  { %214 = vmatprep.subr.mxu0 %v273_v0  ;;  %240 = vmatprep.subr.mxu1 %v273_v0 }
   0xc   :  { %215 = vmatpush3.msra.mxu0 %v21_v6  ;;  %248 = vmatpush3.msra.mxu1 %v21_v6 }
   0xd   :  { %216 = vmatprep.subr.mxu0 %v273_v0  ;;  %241 = vmatprep.subr.mxu1 %v273_v0 }
   0xe   :  { %217 = vmatpush3.msra.mxu0 %v20_v7  ;;  %249 = vmatpush3.msra.mxu1 %v20_v7 }
   0xf   :  { %218 = vmatprep.subr.mxu0 %v273_v0  ;;  %220 = vmatprep.mubr.msk.f32.mxu0 %vm274_vm1, %v273_v0 }
  0x10   :  { %219 = vmatpush3.msra.mxu0 %v19_v8  ;;  %242 = vmatprep.subr.mxu1 %v273_v0 }
  0x11   :  { %221 = vmatmul.mubr.msk.f32.vlgmr.msra.gmra.mxu0 %vm34_vm0, %v14_v9  ;;  %250 = vmatpush3.msra.mxu1 %v19_v8 }
  0x12   :  { %229 = vmatprep.mubr.msk.f32.mxu1 %vm274_vm1, %v273_v0  ;;  %223 = vmatprep.mubr.msk.f32.mxu0 %vm274_vm1, %v273_v0 }
  0x13   :  { %230 = vmatmul.mubr.msk.f32.vlgmr.msra.gmra.mxu1 %vm34_vm0, %v17_v10 }
  0x14   :  { %232 = vmatprep.mubr.msk.f32.mxu1 %vm274_vm1, %v273_v0 }
  0x15   :  { %224 = vmatmul.mubr.msk.f32.gmra.mxu0 %vm34_vm0, %v15_v11 }
  0x16   :  { %226 = vmatprep.mubr.msk.f32.mxu0 %vm274_vm1, %v273_v0 }
  0x17   :  { %233 = vmatmul.mubr.msk.f32.gmra.mxu1 %vm34_vm0, %v18_v12 }
  0x19   :  { %227 = vmatmul.mubr.msk.f32.gmra.mxu0 %vm34_vm0, %v16_v13 }
  0xd1   :  { %v116_v15 = vpop.f32.mrf.mxu0 }
  0xd2   :  { %v117_v16 = vadd.f32 %v180_v14, %v116_v15 }
  0xd3   :  { %v222_v17 = vpop.f32.mrf.mxu0  ;;  %v131_v18 = vpop.f32.mrf.mxu1 }
  0xd4   :  { %v186_v19 = vmul.f32 -1.442695, %v117_v16  ;;  %v132_v20 = vadd.f32 %v180_v14, %v131_v18 }
  0xd5   :  { %v121_v21 = vpop.f32.mrf.mxu0  ;;  %v231_v22 = vpop.f32.mrf.mxu1 }
  0xd6   :  { %253 = vpow2.f32 %v186_v19  ;;  %v189_v23 = vmul.f32 -1.442695, %v132_v20  ;;  %v122_v24 = vadd.f32 %v180_v14, %v121_v21 }
  0xd7   :  { %v225_v25 = vpop.f32.mrf.mxu0  ;;  %v136_v26 = vpop.f32.mrf.mxu1 }
  0xd8   :  { %255 = vpow2.f32 %v189_v23  ;;  %v187_v27 = vmul.f32 -1.442695, %v122_v24  ;;  %v137_v28 = vadd.f32 %v180_v14, %v136_v26 }
  0xd9   :  { %v126_v29 = vpop.f32.mrf.mxu0  ;;  %v234_v30 = vpop.f32.mrf.mxu1 }
  0xda   :  { %257 = vpow2.f32 %v187_v27  ;;  %v190_v31 = vmul.f32 -1.442695, %v137_v28  ;;  %v127_v32 = vadd.f32 %v180_v14, %v126_v29 }
  0xdb   :  { %v228_v33 = vpop.f32.mrf.mxu0 }
  0xdc   :  { %259 = vpow2.f32 %v190_v31  ;;  %v188_v34 = vmul.f32 -1.442695, %v127_v32 }
  0xde   :  { %261 = vpow2.f32 %v188_v34 }
  0xe3   :  { %v254_v35 = vpop.eup %253 }
  0xe4   :  { %v155_v36 = vadd.f32 1.0, %v254_v35 }
  0xe5   :  { %v256_v37 = vpop.eup %255 }
  0xe6   :  { %263 = vrcp.f32 %v155_v36  ;;  %v158_v38 = vadd.f32 1.0, %v256_v37 }
  0xe7   :  { %v258_v39 = vpop.eup %257 }
  0xe8   :  { %265 = vrcp.f32 %v158_v38  ;;  %v156_v40 = vadd.f32 1.0, %v258_v39 }
  0xe9   :  { %v260_v41 = vpop.eup %259 }
  0xea   :  { %267 = vrcp.f32 %v156_v40  ;;  %v159_v42 = vadd.f32 1.0, %v260_v41 }
  0xeb   :  { %v262_v43 = vpop.eup %261 }
  0xec   :  { %269 = vrcp.f32 %v159_v42  ;;  %v157_v44 = vadd.f32 1.0, %v262_v43 }
  0xee   :  { %271 = vrcp.f32 %v157_v44 }
  0xf3   :  { %v264_v45 = vpop.eup %263 }
  0xf4   :  { %171 = vst.msk [vmem:[%s360_s3] sm:$0xff] %vm170_vm2, %v264_v45 }
  0xf5   :  { %v266_v46 = vpop.eup %265 }
  0xf6   :  { %174 = vst.msk [vmem:[%s360_s3 + $0x18] sm:$0xff] %vm170_vm2, %v266_v46 }
  0xf7   :  { %v268_v47 = vpop.eup %267 }
  0xf8   :  { %172 = vst.msk [vmem:[%s360_s3 + $0x8] sm:$0xff] %vm170_vm2, %v268_v47 }
  0xf9   :  { %v270_v48 = vpop.eup %269 }
  0xfa   :  { %175 = vst.msk [vmem:[%s360_s3 + $0x20] sm:$0xff] %vm170_vm2, %v270_v48 }
  0xfb   :  { %v272_v49 = vpop.eup %271 }
  0xfc   :  { %173 = vst.msk [vmem:[%s360_s3 + $0x10] sm:$0xff] %vm170_vm2, %v272_v49 }

// kernel: bdg_ode_forward.3
= control target key start
LH: loop header
LB: loop body
LE: loop exit
PB: predicated region body
PF: predicated region fallthrough
CT: control target
= control target key end

     0   :  { %21 = vsyncpa [#allocation3], 0  ;;  %s1239_s0 = inlined_call_operand.vmem [shape: f32[8,16], index: 0, kind: input, shape index: {}]   ;;  %s1240_s1 = inlined_call_operand.vmem [shape: f32[8,16], index: 1, kind: input, shape index: {}]   ;;  %s1241_s2 = inlined_call_operand.hbm [shape: f32[16,16], index: 2, kind: input, shape index: {}]   ;;  %s1242_s3 = inlined_call_operand.hbm [shape: f32[1,16], index: 3, kind: input, shape index: {}]   ;;  %s1243_s4 = inlined_call_operand.vmem [shape: f32[16,16], index: 4, kind: input, shape index: {}]   ;;  %s1244_s5 = inlined_call_operand.vmem [shape: f32[1,16], index: 5, kind: input, shape index: {}]   ;;  %s1245_s6 = inlined_call_operand.hbm [shape: f32[16,32], index: 6, kind: input, shape index: {}]   ;;  %s1246_s7 = inlined_call_operand.hbm [shape: f32[1,32], index: 7, kind: input, shape index: {}]   ;;  %s1247_s8 = inlined_call_operand.hbm [shape: f32[32,32], index: 8, kind: input, shape index: {}]   ;;  %s1248_s9 = inlined_call_operand.hbm [shape: f32[1,32], index: 9, kind: input, shape index: {}]   ;;  %s1249_s10 = inlined_call_operand.hbm [shape: f32[16,32], index: 10, kind: input, shape index: {}]   ;;  %s1250_s11 = inlined_call_operand.hbm [shape: f32[1,32], index: 11, kind: input, shape index: {}]   ;;  %s1251_s12 = inlined_call_operand.vmem [shape: f32[32,32], index: 12, kind: input, shape index: {}]   ;;  %s1252_s13 = inlined_call_operand.hbm [shape: f32[1,32], index: 13, kind: input, shape index: {}]   ;;  %s1253_s14 = inlined_call_operand.vmem [shape: f32[8,64], index: 14, kind: output, shape index: {0}]   ;;  %s1254_s15 = inlined_call_operand.hbm [shape: f32[8,16], index: 15, kind: output, shape index: {1}]  }
   0x1   :  { %22 = vsyncpa [#allocation6], 0 }
   0x2   :  { %23 = vsyncpa [#allocation9], 0 }
   0x3   :  { %24 = vsyncpa [#allocation12], 0 }
   0x4   :  { %25 = vsyncpa [#allocation15], 0 }
   0x5   :  { %26 = vsyncpa [#allocation4], 0  ;;  %s1033_s18 = smov [#allocation5]   ;;  %s1034_s20 = smov [#allocation8]  }
   0x6   :  { %s49_s19 = sshll.u32 %s1033_s18, 4  ;;  %s75_s21 = sshll.u32 %s1034_s20, 4  ;;  %s50_s19 = int_to_ptr.vmem [resolvable:$true] %s49_s19  ;;  %s76_s21 = int_to_ptr.vmem [resolvable:$true] %s75_s21 }
   0x7   :  { %s829_s22 = scalar_lea.vmem %s50_s19, 16  ;;  %s833_s23 = scalar_lea.vmem %s50_s19, 32 }
   0x8   :  { %p830_p0 = scmp.ne.s32.totalorder %s50_s19, %s829_s22  ;;  %p834_p1 = scmp.lt.s32.totalorder %s50_s19, %s50_s19 }
   0x9   :  { %p835_p2 = scmp.lt.s32.totalorder %s833_s23, %s829_s22 }
   0xb   :  { %p836_p3 = por %p835_p2, %p834_p1 }
   0xd   :  { %p837_p4 = pnand %p836_p3, %p830_p0 }
   0xf   :  { %840 = shalt.err (!%p837_p4)
}
  0x10   :  { %52 = dma.hbm_to_vmem [thread:$0]  %s1242_s3, 16, %s50_s19, [#allocation6]  }
  0x11   :  { %s849_s26 = scalar_lea.vmem %s76_s21, 16  ;;  %s853_s27 = scalar_lea.vmem %s76_s21, 32 }
  0x12   :  { %p850_p5 = scmp.ne.s32.totalorder %s76_s21, %s849_s26  ;;  %p854_p6 = scmp.lt.s32.totalorder %s76_s21, %s76_s21 }
  0x13   :  { %p855_p7 = scmp.lt.s32.totalorder %s853_s27, %s849_s26 }
  0x15   :  { %p856_p8 = por %p855_p7, %p854_p6 }
  0x17   :  { %p857_p9 = pnand %p856_p8, %p850_p5 }
  0x19   :  { %860 = shalt.err (!%p857_p9)
}
  0x1a   :  { %78 = dma.hbm_to_vmem [thread:$0]  %s1246_s7, 16, %s76_s21, [#allocation9]  }
  0x1b   :  { %s1035_s30 = smov [#allocation11]   ;;  %s1036_s17 = smov [#allocation14]  }
  0x1c   :  { %s97_s16 = sshll.u32 %s1035_s30, 4  ;;  %s119_s18 = sshll.u32 %s1036_s17, 4  ;;  %s98_s16 = int_to_ptr.vmem [resolvable:$true] %s97_s16  ;;  %s120_s18 = int_to_ptr.vmem [resolvable:$true] %s119_s18 }
  0x1d   :  { %s869_s20 = scalar_lea.vmem %s98_s16, 16  ;;  %s873_s3 = scalar_lea.vmem %s98_s16, 32 }
  0x1e   :  { %p870_p10 = scmp.ne.s32.totalorder %s98_s16, %s869_s20  ;;  %p874_p11 = scmp.lt.s32.totalorder %s98_s16, %s98_s16 }
  0x1f   :  { %p875_p12 = scmp.lt.s32.totalorder %s873_s3, %s869_s20 }
  0x21   :  { %p876_p13 = por %p875_p12, %p874_p11 }
  0x23   :  { %p877_p0 = pnand %p876_p13, %p870_p10 }
  0x25   :  { %880 = shalt.err (!%p877_p0)
}
  0x26   :  { %100 = dma.hbm_to_vmem [thread:$0]  %s1248_s9, 16, %s98_s16, [#allocation12]  }
  0x27   :  { %s889_s23 = scalar_lea.vmem %s120_s18, 16  ;;  %s893_s7 = scalar_lea.vmem %s120_s18, 32 }
  0x28   :  { %p890_p1 = scmp.ne.s32.totalorder %s120_s18, %s889_s23  ;;  %p894_p2 = scmp.lt.s32.totalorder %s120_s18, %s120_s18 }
  0x29   :  { %p895_p3 = scmp.lt.s32.totalorder %s893_s7, %s889_s23 }
  0x2b   :  { %p896_p4 = por %p895_p3, %p894_p2 }
  0x2d   :  { %p897_p5 = pnand %p896_p4, %p890_p1 }
  0x2f   :  { %900 = shalt.err (!%p897_p5)
}
  0x30   :  { %122 = dma.hbm_to_vmem [thread:$0]  %s1250_s11, 16, %s120_s18, [#allocation15]  }
  0x31   :  { %s1037_s25 = smov [#allocation2]  }
  0x32   :  { %s36_s26 = sshll.u32 %s1037_s25, 4  ;;  %s37_s26 = int_to_ptr.vmem [resolvable:$true] %s36_s26 }
  0x33   :  { %s909_s27 = scalar_lea.vmem %s37_s26, 256  ;;  %p914_p7 = scmp.lt.s32.totalorder %s37_s26, %s37_s26 }
  0x34   :  { %p910_p6 = scmp.ne.s32.totalorder %s37_s26, %s909_s27  ;;  %p915_p8 = scmp.lt.s32.totalorder %s909_s27, %s909_s27 }
  0x36   :  { %p916_p9 = por %p915_p8, %p914_p7 }
  0x38   :  { %p917_p10 = pnand %p916_p9, %p910_p6 }
  0x3a   :  { %920 = shalt.err (!%p917_p10)
}
  0x3b   :  { %s1038_s9 = smov 128   ;;  %s1039_s28 = smov 8  }
  0x3c   :  { %42 = dma.hbm_to_vmem [thread:$0]  %s1241_s2, 256, %s37_s26, [#allocation3], %s1038_s9, %s1038_s9, %s1039_s28  }
  0x3d   :  { %s1040_s11 = smov [#allocation7]   ;;  %s1041_s17 = smov [#allocation10]  }
  0x3e   :  { %s62_s16 = sshll.u32 %s1040_s11, 4  ;;  %s84_s18 = sshll.u32 %s1041_s17, 4  ;;  %s63_s16 = int_to_ptr.vmem [resolvable:$true] %s62_s16  ;;  %s85_s18 = int_to_ptr.vmem [resolvable:$true] %s84_s18 }
  0x3f   :  { %s929_s20 = scalar_lea.vmem %s63_s16, 256  ;;  %p934_p12 = scmp.lt.s32.totalorder %s63_s16, %s63_s16 }
  0x40   :  { %p930_p11 = scmp.ne.s32.totalorder %s63_s16, %s929_s20  ;;  %p935_p13 = scmp.lt.s32.totalorder %s929_s20, %s929_s20 }
  0x42   :  { %p936_p0 = por %p935_p13, %p934_p12 }
  0x44   :  { %p937_p1 = pnand %p936_p0, %p930_p11 }
  0x46   :  { %940 = shalt.err (!%p937_p1)
}
  0x47   :  { %68 = dma.hbm_to_vmem [thread:$0]  %s1245_s6, 256, %s63_s16, [#allocation6], %s1038_s9, %s1038_s9, %s1039_s28  }
  0x48   :  { %s949_s2 = scalar_lea.vmem %s85_s18, 512  ;;  %p954_p3 = scmp.lt.s32.totalorder %s85_s18, %s85_s18 }
  0x49   :  { %p950_p2 = scmp.ne.s32.totalorder %s85_s18, %s949_s2  ;;  %p955_p4 = scmp.lt.s32.totalorder %s949_s2, %s949_s2 }
  0x4b   :  { %p956_p5 = por %p955_p4, %p954_p3 }
  0x4d   :  { %p957_p6 = pnand %p956_p5, %p950_p2 }
  0x4f   :  { %960 = shalt.err (!%p957_p6)
}
  0x50   :  { %90 = dma.hbm_to_vmem [thread:$0]  %s1247_s8, 512, %s85_s18, [#allocation9], %s1038_s9, %s1038_s9, %s1039_s28  }
  0x51   :  { %s1042_s7 = smov [#allocation13]   ;;  %s1043_s24 = smov [#allocation16]  }
  0x52   :  { %s106_s21 = sshll.u32 %s1042_s7, 4  ;;  %s131_s6 = sshll.u32 %s1043_s24, 4  ;;  %s107_s21 = int_to_ptr.vmem [resolvable:$true] %s106_s21  ;;  %s132_s6 = int_to_ptr.vmem [resolvable:$true] %s131_s6 }
  0x53   :  { %s969_s25 = scalar_lea.vmem %s107_s21, 256  ;;  %p974_p8 = scmp.lt.s32.totalorder %s107_s21, %s107_s21 }
  0x54   :  { %p970_p7 = scmp.ne.s32.totalorder %s107_s21, %s969_s25  ;;  %p975_p9 = scmp.lt.s32.totalorder %s969_s25, %s969_s25 }
  0x56   :  { %p976_p10 = por %p975_p9, %p974_p8 }
  0x58   :  { %p977_p11 = pnand %p976_p10, %p970_p7 }
  0x5a   :  { %980 = shalt.err (!%p977_p11)
}
  0x5b   :  { %112 = dma.hbm_to_vmem [thread:$0]  %s1249_s10, 256, %s107_s21, [#allocation12], %s1038_s9, %s1038_s9, %s1039_s28  }
  0x5c   :  { %s989_s8 = scalar_lea.vmem %s132_s6, 16  ;;  %s993_s29 = scalar_lea.vmem %s132_s6, 32 }
  0x5d   :  { %p990_p12 = scmp.ne.s32.totalorder %s132_s6, %s989_s8  ;;  %p994_p13 = scmp.lt.s32.totalorder %s132_s6, %s132_s6 }
  0x5e   :  { %p995_p0 = scmp.lt.s32.totalorder %s993_s29, %s989_s8 }
  0x60   :  { %p996_p1 = por %p995_p0, %p994_p13 }
  0x62   :  { %p997_p2 = pnand %p996_p1, %p990_p12 }
  0x64   :  { %1000 = shalt.err (!%p997_p2)
}
  0x65   :  { %134 = dma.hbm_to_vmem [thread:$0]  %s1252_s13, 16, %s132_s6, [#allocation15]  }
  0x66   :  { %1021 = dma.done.wait [#allocation3], 256  }
  0x67   :  { %1022 = vsyncadd [#allocation3], 4294967040 }
  0x68   :  { %1023 = dma.done.wait [#allocation6], 272  }
  0x69   :  { %1024 = vsyncadd [#allocation6], 4294967024 }
  0x6a   :  { %1025 = dma.done.wait [#allocation9], 528  }
  0x6b   :  { %1026 = vsyncadd [#allocation9], 4294966768 }
  0x6c   :  { %1027 = dma.done.wait [#allocation12], 272  }
  0x6d   :  { %1028 = vsyncadd [#allocation12], 4294967024 }
  0x6e   :  { %1029 = dma.done.wait [#allocation15], 32  }
  0x6f   :  { %1030 = vsyncadd [#allocation15], 4294967264  ;;  %v1044_v0 = vmov 0.0   ;;  %vm1045_vm0 = vmmov 0   ;;  %v164_v1 = vld [vmem:[#allocation2 + $0x8] sm:$0xff]  ;;  %v163_v2 = vld [vmem:[#allocation2] sm:$0xff] }
  0x70   :  { %744 = vmatprep.subr.mxu1 %v1044_v0  ;;  %748 = vmatprep.mubr.msk.f32.mxu1 %vm1045_vm0, %v1044_v0  ;;  %v162_v3 = vld [vmem:[%s1239_s0] sm:$0xff]  ;;  %vm172_vm1 = vcmask 130048   ;;  %v254_v4 = vld [vmem:[%s1243_s4 + $0x8] sm:$0xff]  ;;  %v343_v8 = vld [vmem:[#allocation7] sm:$0xff]  ;;  %vm437_vm2 = vcmask 261120  }
  0x71   :  { %758 = vmatprep.subr.mxu0 %v1044_v0  ;;  %762 = vmatprep.mubr.msk.f32.mxu0 %vm1045_vm0, %v1044_v0  ;;  %v253_v5 = vld [vmem:[%s1243_s4] sm:$0xff]  ;;  %v708_v9 = vld [vmem:[#allocation5] ss:$0 sm:$0xff]  ;;  %v428_v29 = vld [vmem:[#allocation10 + $0x10] sm:$0xff] }
  0x72   :  { %745 = vmatpush3.msra.mxu1 %v164_v1  ;;  %v252_v6 = vld [vmem:[%s1240_s1] sm:$0xff]  ;;  %v512_v23 = vld [vmem:[#allocation13 + $0x8] sm:$0xff]  ;;  %v597_v30 = vld [vmem:[%s1251_s12 + $0x18] sm:$0xff] }
  0x73   :  { %746 = vmatprep.subr.mxu1 %v1044_v0  ;;  %v344_v7 = vld [vmem:[#allocation7 + $0x8] sm:$0xff]  ;;  %v511_v25 = vld [vmem:[#allocation13] sm:$0xff]  ;;  %v596_v31 = vld [vmem:[%s1251_s12 + $0x10] sm:$0xff] }
  0x74   :  { %747 = vmatpush3.msra.mxu1 %v163_v2  ;;  %759 = vmatpush3.msra.mxu0 %v344_v7  ;;  %v711_v13 = vld [vmem:[%s1244_s5] ss:$0 sm:$0xff]  ;;  %v427_v32 = vld [vmem:[#allocation10 + $0x8] sm:$0xff]  ;;  %v426_v33 = vld [vmem:[#allocation10] sm:$0xff] }
  0x75   :  { %749 = vmatmul.mubr.msk.f32.vlgmr.msra.gmra.mxu1 %vm172_vm1, %v162_v3  ;;  %751 = vmatprep.subr.mxu1 %v1044_v0  ;;  %v429_v28 = vld [vmem:[#allocation10 + $0x18] sm:$0xff]  ;;  %v595_v34 = vld [vmem:[%s1251_s12 + $0x8] sm:$0xff]  ;;  %v718_v40 = vld [vmem:[#allocation14] ss:$0 sm:$0xff] }
  0x76   :  { %752 = vmatpush3.msra.mxu1 %v254_v4  ;;  %755 = vmatprep.mubr.msk.f32.mxu1 %vm1045_vm0, %v1044_v0  ;;  %v594_v35 = vld [vmem:[%s1251_s12] sm:$0xff]  ;;  %s1046_s12 = smov [#allocation17]  }
  0x77   :  { %753 = vmatprep.subr.mxu1 %v1044_v0  ;;  %760 = vmatprep.subr.mxu0 %v1044_v0  ;;  %v714_v36 = vld [vmem:[#allocation8] ss:$0 sm:$0xff]  ;;  %s693_s21 = sshll.u32 %s1046_s12, 4  ;;  %s694_s21 = int_to_ptr.vmem [resolvable:$true] %s693_s21 }
  0x78   :  { %754 = vmatpush3.msra.mxu1 %v253_v5  ;;  %761 = vmatpush3.msra.mxu0 %v343_v8  ;;  %s1001_s24 = scalar_lea.vmem %s694_s21, 128  ;;  %p1006_p4 = scmp.lt.s32.totalorder %s694_s21, %s694_s21 }
  0x79   :  { %756 = vmatmul.mubr.msk.f32.vlgmr.msra.gmra.mxu1 %vm172_vm1, %v252_v6  ;;  %765 = vmatprep.subr.mxu1 %v1044_v0  ;;  %p1002_p3 = scmp.ne.s32.totalorder %s694_s21, %s1001_s24  ;;  %p1007_p5 = scmp.lt.s32.totalorder %s1001_s24, %s1001_s24 }
  0x7a   :  { %773 = vmatprep.mubr.msk.f32.mxu1 %vm1045_vm0, %v1044_v0  ;;  %776 = vmatprep.subr.mxu0 %v1044_v0 }
  0x7b   :  { %766 = vmatpush3.msra.mxu1 %v429_v28  ;;  %p1008_p6 = por %p1007_p5, %p1006_p4 }
  0x7c   :  { %767 = vmatprep.subr.mxu1 %v1044_v0 }
  0x7d   :  { %768 = vmatpush3.msra.mxu1 %v428_v29  ;;  %p1009_p7 = pnand %p1008_p6, %p1002_p3 }
  0x7e   :  { %769 = vmatprep.subr.mxu1 %v1044_v0 }
  0x7f   :  { %770 = vmatpush3.msra.mxu1 %v427_v32 }
  0x80   :  { %771 = vmatprep.subr.mxu1 %v1044_v0 }
  0x81   :  { %772 = vmatpush3.msra.mxu1 %v426_v33 }
 0x135   :  { %v242_v10 = vpop.f32.mrf.mxu1 }
 0x136   :  { %v243_v11 = vadd.f32 %v708_v9, %v242_v10 }
 0x137   :  { %v750_v12 = vpop.f32.mrf.mxu1 }
 0x138   :  { %v710_v14 = vmul.f32 -1.442695, %v243_v11 }
 0x139   :  { %v331_v15 = vpop.f32.mrf.mxu1 }
 0x13a   :  { %809 = vpow2.f32 %v710_v14  ;;  %v332_v16 = vadd.f32 %v711_v13, %v331_v15 }
 0x13b   :  { %v757_v17 = vpop.f32.mrf.mxu1 }
 0x13c   :  { %v713_v18 = vmul.f32 -1.442695, %v332_v16 }
 0x13e   :  { %811 = vpow2.f32 %v713_v18 }
 0x147   :  { %v810_v19 = vpop.eup %809 }
 0x148   :  { %v249_v20 = vadd.f32 1.0, %v810_v19 }
 0x14a   :  { %813 = vrcp.f32 %v249_v20 }
 0x14b   :  { %v812_v21 = vpop.eup %811 }
 0x14c   :  { %v338_v22 = vadd.f32 1.0, %v812_v21 }
 0x14e   :  { %815 = vrcp.f32 %v338_v22 }
 0x157   :  { %v814_v24 = vpop.eup %813 }
 0x158   :  { %763 = vmatmul.mubr.msk.f32.vlgmr.msra.gmra.mxu0 %vm172_vm1, %v814_v24 }
 0x159   :  { %777 = vmatpush3.msra.mxu0 %v512_v23  ;;  %780 = vmatprep.mubr.msk.f32.mxu0 %vm1045_vm0, %v1044_v0 }
 0x15a   :  { %778 = vmatprep.subr.mxu0 %v1044_v0 }
 0x15b   :  { %v816_v26 = vpop.eup %815  ;;  %779 = vmatpush3.msra.mxu0 %v511_v25 }
 0x15c   :  { %781 = vmatmul.mubr.msk.f32.vlgmr.msra.gmra.mxu0 %vm172_vm1, %v816_v26  ;;  %783 = vmatprep.subr.mxu0 %v1044_v0  ;;  %v341_v27 = vsub.f32 %v814_v24, %v816_v26 }
 0x15d   :  { %791 = vmatprep.mubr.msk.f32.mxu0 %vm1045_vm0, %v1044_v0  ;;  %784 = vmatpush3.msra.mxu0 %v597_v30 }
 0x15e   :  { %342 = vst.msk [vmem:[#allocation17] sm:$0xff] %vm172_vm1, %v341_v27  ;;  %785 = vmatprep.subr.mxu0 %v1044_v0 }
 0x15f   :  { %786 = vmatpush3.msra.mxu0 %v596_v31 }
 0x160   :  { %787 = vmatprep.subr.mxu0 %v1044_v0 }
 0x161   :  { %788 = vmatpush3.msra.mxu0 %v595_v34 }
 0x162   :  { %789 = vmatprep.subr.mxu0 %v1044_v0 }
 0x163   :  { %790 = vmatpush3.msra.mxu0 %v594_v35 }
 0x218   :  { %v421_v37 = vpop.f32.mrf.mxu0 }
 0x219   :  { %v422_v38 = vadd.f32 %v714_v36, %v421_v37 }
 0x21a   :  { %v764_v39 = vpop.f32.mrf.mxu0 }
 0x21b   :  { %817 = vtanh.f32 %v422_v38 }
 0x21c   :  { %v589_v41 = vpop.f32.mrf.mxu0 }
 0x21d   :  { %v590_v42 = vadd.f32 %v718_v40, %v589_v41 }
 0x21e   :  { %v782_v43 = vpop.f32.mrf.mxu0 }
 0x21f   :  { %819 = vtanh.f32 %v590_v42 }
 0x228   :  { %v818_v44 = vpop.eup %817 }
 0x229   :  { %774 = vmatmul.mubr.msk.f32.vlgmr.msra.gmra.mxu1 %vm437_vm2, %v818_v44 }
 0x22c   :  { %v820_v45 = vpop.eup %819 }
 0x22d   :  { %792 = vmatmul.mubr.msk.f32.vlgmr.msra.gmra.mxu0 %vm437_vm2, %v820_v45 }
 0x22e   :  { %1012 = shalt.err (!%p1009_p7)
}
 0x22f   :  { %696 = dma.vmem_to_hbm [thread:$0]  %s694_s21, 128, %s1254_s15, [#allocation4]   ;;  %v716_v46 = vld [vmem:[#allocation11] ss:$0 sm:$0xff]  ;;  %v720_v50 = vld [vmem:[#allocation16] ss:$0 sm:$0xff] }
 0x230   :  { %s1047_s8 = smov 32   ;;  %vm683_vm3 = vcmask 523520  }
 0x2e9   :  { %v507_v47 = vpop.f32.mrf.mxu1 }
 0x2ea   :  { %v508_v48 = vadd.f32 %v716_v46, %v507_v47 }
 0x2eb   :  { %v775_v49 = vpop.f32.mrf.mxu1 }
 0x2ec   :  { %678 = vst.msk [vmem:[%s1253_s14] sm:$0xff] %vm437_vm2, %v508_v48 }
 0x2ed   :  { %v674_v51 = vpop.f32.mrf.mxu0 }
 0x2ee   :  { %v675_v52 = vadd.f32 %v720_v50, %v674_v51 }
 0x2ef   :  { %v793_v53 = vpop.f32.mrf.mxu0 }
 0x2f0   :  { %680 = vrot.lane.b32.xlu0 %v675_v52, %s1047_s8 }
 0x362   :  { %v681_v54 = vpop.permute.xlu0 %680 }
 0x363   :  { %684 = vst.msk [vmem:[%s1253_s14] sm:$0xff] %vm683_vm3, %v681_v54 }
 0x364   :  { %1031 = dma.done.wait [#allocation4], 128  }
 0x365   :  { %1032 = vsyncadd [#allocation4], 4294967168 }
 0x366   :  { %702 = vsyncpa [#allocation3], 1 }
 0x367   :  { %703 = vsyncpa [#allocation6], 1 }
 0x368   :  { %704 = vsyncpa [#allocation9], 1 }
 0x369   :  { %705 = vsyncpa [#allocation12], 1 }
 0x36a   :  { %706 = vsyncpa [#allocation15], 1 }
 0x36b   :  { %707 = vsyncpa [#allocation4], 1 }

// kernel: bdg_ode_forward.4
= control target key start
LH: loop header
LB: loop body
LE: loop exit
PB: predicated region body
PF: predicated region fallthrough
CT: control target
= control target key end

     0   :  { %s7321_s0 = inlined_call_operand.vmem [shape: f32[5], index: 0, kind: input, shape index: {}]   ;;  %s7322_s1 = inlined_call_operand.vmem [shape: f32[8,64], index: 1, kind: input, shape index: {}]   ;;  %s7323_s2 = inlined_call_operand.vmem [shape: f32[8,8], index: 2, kind: input, shape index: {}]   ;;  %s7324_s3 = inlined_call_operand.vmem [shape: f32[64,64], index: 3, kind: input, shape index: {}]   ;;  %s7325_s4 = inlined_call_operand.vmem [shape: f32[1,64], index: 4, kind: input, shape index: {}]   ;;  %s7326_s5 = inlined_call_operand.vmem [shape: f32[5,8,64], index: 5, kind: output, shape index: {}]  }
   0x1   :  { %s10_s20 = sshll.u32 %s7321_s0, 4  ;;  %s11_s20 = int_to_ptr.vmem [resolvable:$true] %s10_s20 }
   0x2   :  { %s6203_s21 = scalar_lea.vmem %s11_s20, 16  ;;  %p6208_p1 = scmp.lt.s32.totalorder %s11_s20, %s11_s20 }
   0x3   :  { %p6204_p0 = scmp.ne.s32.totalorder %s11_s20, %s6203_s21  ;;  %p6209_p2 = scmp.lt.s32.totalorder %s6203_s21, %s6203_s21 }
   0x5   :  { %p6210_p3 = por %p6209_p2, %p6208_p1 }
   0x7   :  { %p6211_p4 = pnand %p6210_p3, %p6204_p0 }
   0x9   :  { %6214 = shalt.err (!%p6211_p4)  }
   0xa   :  { %s6225_s22 = smov [#allocation4]  }
   0xb   :  { %13 = dma.vmem_to_smem %s11_s20, 16, %s6225_s22, [#allocation3] }
   0xc   :  { %6219 = dma.done.wait [#allocation3], 16 }
   0xd   :  { %6220 = vsyncadd [#allocation3], 4294967280 }
   0xe   :  { %15 = sfence }
   0xf   :  { %s6261_s23 = smov 0  }
  0x10 LB: > { %s6267_s0 = sadd.s32 4294967295, %s6223_s23   ;;  %p4990_p5 = scmp.ge.s32.totalorder %s6223_s23, 1  ;;  %s6223_s23 = sphi %s6261_s23, %s21_s23  }
  0x11   : > { %p159_p6 = scmp.lt.s32.totalorder %s6223_s23, 6 }
  0x13   : > { %p160_p7 = pnand %p4990_p5, %p159_p6 }
  0x14   : > { %p179_p8 = scmp.lt.s32.totalorder (!%p160_p7), %s6267_s0, 4  ;;  %p4992_p9 = scmp.ne.s32.totalorder (!%p160_p7), %s6267_s0, 0 }
  0x15   : > { %163 = sbr.rel (%p160_p7) target bundleno = 12708 (0x31a4), region = 36 }
  0x1a   : > { %s180_s24 = scalar_select %p179_p8, %s6267_s0, 4 }
  0x1b   : > { %186 = sbr.rel (%p4992_p9) target bundleno = 34 (0x22), region = 40 }
  0x1c   : > { %s4991_s25 = sshll.u32 %s180_s24, 3 }
  0x1d   : > { %s6276_s28 = scalar_lea.vmem %s7326_s5, %s4991_s25 }
  0x20   : > { %v187_v0 = vld [vmem:[%s7322_s1] sm:$0xff]  ;;  %vm188_vm0 = vcmask 523264  }
  0x21   : > { %189 = vst.msk [vmem:[#allocation2] sm:$0xff] %vm188_vm0, %v187_v0 }
  0x22 PF: > { %p4993_p10 = scmp.le.s32.totalorder %s6267_s0, 0 }
  0x23   : > { %s4995_s25 = sadd.s32 (!%p4993_p10), 4294967295, %s6267_s0  ;;  %s212_s26 = sld [smem:[#allocation4 + %s6267_s0]] (!%p4993_p10) }
  0x24   : > { %193 = sbr.rel (%p4993_p10) target bundleno = 12700 (0x319c), region = 44  ;;  %s211_s27 = sld [smem:[#allocation4 + %s4995_s25]] (!%p4993_p10) }
  0x29   : > { %v6283_v1 = vld [vmem:[#allocation2] sm:$0xff]  ;;  %vm218_vm1 = vcmask 64512   ;;  %v6226_v3 = vmov 0.0   ;;  %vm6227_vm2 = vmmov 0   ;;  %v6296_v4 = vld [vmem:[%s7324_s3 + $0x38] sm:$0xff]  ;;  %v6306_v5 = vld [vmem:[%s7324_s3 + $0x30] sm:$0xff] }
  0x2a   : > { %v6288_v2 = vld [vmem:[%s7323_s2] sm:$0xff]  ;;  %5414 = vmatprep.subr.mxu1 %v6226_v3  ;;  %5416 = vmatprep.mubr.msk.f32.mxu1 %vm6227_vm2, %v6226_v3  ;;  %v6315_v6 = vld [vmem:[%s7324_s3 + $0x28] sm:$0xff]  ;;  %v6331_v8 = vld [vmem:[%s7324_s3 + $0x18] sm:$0xff]  ;;  %vm292_vm3 = vcmask 523264   ;;  %s213_s29 = ssub.f32 %s212_s26, %s211_s27 }
  0x2b   : > { %5415 = vmatpush3.msra.mxu1 %v6283_v1  ;;  %5438 = vmatprep.subr.mxu0 %v6226_v3  ;;  %v6324_v7 = vld [vmem:[%s7324_s3 + $0x20] sm:$0xff]  ;;  %v6338_v9 = vld [vmem:[%s7324_s3 + $0x10] sm:$0xff]  ;;  %v6345_v10 = vld [vmem:[%s7324_s3 + $0x8] sm:$0xff] }
  0x2c   : > { %5417 = vmatmul.mubr.msk.f32.vlgmr.msra.gmra.mxu1 %vm218_vm1, %v6288_v2  ;;  %5419 = vmatprep.subr.mxu1 %v6226_v3  ;;  %v6354_v11 = vld [vmem:[%s7324_s3] sm:$0xff]  ;;  %s6363_s30 = smul.f32 0.125, %s213_s29 }
  0x2d   : > { %5420 = vmatpush3.msra.mxu1 %v6296_v4  ;;  %5435 = vmatprep.mubr.msk.f32.mxu1 %vm6227_vm2, %v6226_v3  ;;  %v6368_v14 = vld [vmem:[%s7325_s4] ss:$0 sm:$0xff] }
  0x2e   : > { %5421 = vmatprep.subr.mxu1 %v6226_v3  ;;  %5440 = vmatprep.mubr.msk.f32.mxu0 %vm6227_vm2, %v6226_v3  ;;  %s367_s8 = smul.f32 0.5, %s6363_s30  ;;  %v6434_v35 = vstv %s6363_s30 }
  0x2f   : > { %5422 = vmatpush3.msra.mxu1 %v6306_v5  ;;  %s810_s0 = smul.f32 0.16666667, %s6363_s30 }
  0x30   : > { %5423 = vmatprep.subr.mxu1 %v6226_v3  ;;  %v6374_v17 = vstv %s367_s8 }
  0x31   : > { %5424 = vmatpush3.msra.mxu1 %v6315_v6  ;;  %v6466_v49 = vstv %s810_s0 }
  0x32   : > { %5425 = vmatprep.subr.mxu1 %v6226_v3 }
  0x33   : > { %5426 = vmatpush3.msra.mxu1 %v6324_v7 }
  0x34   : > { %5427 = vmatprep.subr.mxu1 %v6226_v3 }
  0x35   : > { %5428 = vmatpush3.msra.mxu1 %v6331_v8 }
  0x36   : > { %5429 = vmatprep.subr.mxu1 %v6226_v3 }
  0x37   : > { %5430 = vmatpush3.msra.mxu1 %v6338_v9 }
  0x38   : > { %5431 = vmatprep.subr.mxu1 %v6226_v3 }
  0x39   : > { %5432 = vmatpush3.msra.mxu1 %v6345_v10 }
  0x3a   : > { %5433 = vmatprep.subr.mxu1 %v6226_v3 }
  0x3b   : > { %5434 = vmatpush3.msra.mxu1 %v6354_v11 }
  0x3c   : > { %5462 = vmatprep.subr.mxu1 %v6226_v3 }
  0xec   : > { %v288_v12 = vpop.f32.mrf.mxu1 }
  0xed   : > { %5436 = vmatmul.mubr.msk.f32.vlgmr.msra.gmra.mxu1 %vm292_vm3, %v288_v12 }
  0xee   : > { %v5418_v13 = vpop.f32.mrf.mxu1  ;;  %5464 = vmatprep.mubr.msk.f32.mxu1 %vm6227_vm2, %v6226_v3 }
 0x1ad   : > { %v362_v15 = vpop.f32.mrf.mxu1 }
 0x1ae   : > { %v6372_v16 = vadd.f32 %v6368_v14, %v362_v15 }
 0x1af   : > { %v5437_v18 = vpop.f32.mrf.mxu1 }
 0x1b0   : > { %v366_v19 = vmax.f32 %v6372_v16, 0.0 }
 0x1b2   : > { %v369_v20 = vmul.f32 %v6374_v17, %v366_v19 }
 0x1b4   : > { %v370_v21 = vadd.f32 %v369_v20, %v6283_v1 }
 0x1b6   : > { %5439 = vmatpush3.msra.mxu0 %v370_v21 }
 0x1b7   : > { %5441 = vmatmul.mubr.msk.f32.vlgmr.msra.gmra.mxu0 %vm218_vm1, %v6288_v2  ;;  %5443 = vmatprep.subr.mxu0 %v6226_v3 }
 0x1b8   : > { %5444 = vmatpush3.msra.mxu0 %v6296_v4  ;;  %5459 = vmatprep.mubr.msk.f32.mxu0 %vm6227_vm2, %v6226_v3 }
 0x1b9   : > { %5445 = vmatprep.subr.mxu0 %v6226_v3 }
 0x1ba   : > { %5446 = vmatpush3.msra.mxu0 %v6306_v5 }
 0x1bb   : > { %5447 = vmatprep.subr.mxu0 %v6226_v3 }
 0x1bc   : > { %5448 = vmatpush3.msra.mxu0 %v6315_v6 }
 0x1bd   : > { %5449 = vmatprep.subr.mxu0 %v6226_v3 }
 0x1be   : > { %5450 = vmatpush3.msra.mxu0 %v6324_v7 }
 0x1bf   : > { %5451 = vmatprep.subr.mxu0 %v6226_v3 }
 0x1c0   : > { %5452 = vmatpush3.msra.mxu0 %v6331_v8 }
 0x1c1   : > { %5453 = vmatprep.subr.mxu0 %v6226_v3 }
 0x1c2   : > { %5454 = vmatpush3.msra.mxu0 %v6338_v9 }
 0x1c3   : > { %5455 = vmatprep.subr.mxu0 %v6226_v3 }
 0x1c4   : > { %5456 = vmatpush3.msra.mxu0 %v6345_v10 }
 0x1c5   : > { %5457 = vmatprep.subr.mxu0 %v6226_v3 }
 0x1c6   : > { %5458 = vmatpush3.msra.mxu0 %v6354_v11 }
 0x1c7   : > { %5486 = vmatprep.subr.mxu0 %v6226_v3 }
 0x277   : > { %v437_v22 = vpop.f32.mrf.mxu0 }
 0x278   : > { %5460 = vmatmul.mubr.msk.f32.vlgmr.msra.gmra.mxu0 %vm292_vm3, %v437_v22 }
 0x279   : > { %v5442_v23 = vpop.f32.mrf.mxu0  ;;  %5488 = vmatprep.mubr.msk.f32.mxu0 %vm6227_vm2, %v6226_v3 }
 0x338   : > { %v510_v24 = vpop.f32.mrf.mxu0 }
 0x339   : > { %v511_v25 = vadd.f32 %v6368_v14, %v510_v24 }
 0x33a   : > { %v5461_v26 = vpop.f32.mrf.mxu0 }
 0x33b   : > { %v514_v27 = vmax.f32 %v511_v25, 0.0 }
 0x33d   : > { %v515_v28 = vmul.f32 %v514_v27, %v6374_v17  ;;  %v811_v33 = vmul.f32 2.0, %v514_v27 }
 0x33f   : > { %v516_v29 = vadd.f32 %v515_v28, %v6283_v1  ;;  %v812_v38 = vadd.f32 %v811_v33, %v366_v19 }
 0x341   : > { %5463 = vmatpush3.msra.mxu1 %v516_v29 }
 0x342   : > { %5465 = vmatmul.mubr.msk.f32.vlgmr.msra.gmra.mxu1 %vm218_vm1, %v6288_v2  ;;  %5467 = vmatprep.subr.mxu1 %v6226_v3 }
 0x343   : > { %5468 = vmatpush3.msra.mxu1 %v6296_v4  ;;  %5483 = vmatprep.mubr.msk.f32.mxu1 %vm6227_vm2, %v6226_v3 }
 0x344   : > { %5469 = vmatprep.subr.mxu1 %v6226_v3 }
 0x345   : > { %5470 = vmatpush3.msra.mxu1 %v6306_v5 }
 0x346   : > { %5471 = vmatprep.subr.mxu1 %v6226_v3 }
 0x347   : > { %5472 = vmatpush3.msra.mxu1 %v6315_v6 }
 0x348   : > { %5473 = vmatprep.subr.mxu1 %v6226_v3 }
 0x349   : > { %5474 = vmatpush3.msra.mxu1 %v6324_v7 }
 0x34a   : > { %5475 = vmatprep.subr.mxu1 %v6226_v3 }
 0x34b   : > { %5476 = vmatpush3.msra.mxu1 %v6331_v8 }
 0x34c   : > { %5477 = vmatprep.subr.mxu1 %v6226_v3 }
 0x34d   : > { %5478 = vmatpush3.msra.mxu1 %v6338_v9 }
 0x34e   : > { %5479 = vmatprep.subr.mxu1 %v6226_v3 }
 0x34f   : > { %5480 = vmatpush3.msra.mxu1 %v6345_v10 }
 0x350   : > { %5481 = vmatprep.subr.mxu1 %v6226_v3 }
 0x351   : > { %5482 = vmatpush3.msra.mxu1 %v6354_v11 }
 0x352   : > { %5510 = vmatprep.subr.mxu1 %v6226_v3 }
 0x402   : > { %v583_v30 = vpop.f32.mrf.mxu1 }
 0x403   : > { %5484 = vmatmul.mubr.msk.f32.vlgmr.msra.gmra.mxu1 %vm292_vm3, %v583_v30 }
 0x404   : > { %v5466_v31 = vpop.f32.mrf.mxu1  ;;  %5512 = vmatprep.mubr.msk.f32.mxu1 %vm6227_vm2, %v6226_v3 }
 0x4c3   : > { %v656_v32 = vpop.f32.mrf.mxu1 }
 0x4c4   : > { %v657_v34 = vadd.f32 %v6368_v14, %v656_v32 }
 0x4c5   : > { %v5485_v36 = vpop.f32.mrf.mxu1 }
 0x4c6   : > { %v660_v37 = vmax.f32 %v657_v34, 0.0 }
 0x4c8   : > { %v662_v39 = vmul.f32 %v6434_v35, %v660_v37  ;;  %v813_v40 = vmul.f32 2.0, %v660_v37 }
 0x4ca   : > { %v663_v41 = vadd.f32 %v662_v39, %v6283_v1  ;;  %v814_v42 = vadd.f32 %v813_v40, %v812_v38 }
 0x4cc   : > { %5487 = vmatpush3.msra.mxu0 %v663_v41 }
 0x4cd   : > { %5489 = vmatmul.mubr.msk.f32.vlgmr.msra.gmra.mxu0 %vm218_vm1, %v6288_v2  ;;  %5491 = vmatprep.subr.mxu0 %v6226_v3 }
 0x4ce   : > { %5492 = vmatpush3.msra.mxu0 %v6296_v4  ;;  %5507 = vmatprep.mubr.msk.f32.mxu0 %vm6227_vm2, %v6226_v3 }
 0x4cf   : > { %5493 = vmatprep.subr.mxu0 %v6226_v3 }
 0x4d0   : > { %5494 = vmatpush3.msra.mxu0 %v6306_v5 }
 0x4d1   : > { %5495 = vmatprep.subr.mxu0 %v6226_v3 }
 0x4d2   : > { %5496 = vmatpush3.msra.mxu0 %v6315_v6 }
 0x4d3   : > { %5497 = vmatprep.subr.mxu0 %v6226_v3 }
 0x4d4   : > { %5498 = vmatpush3.msra.mxu0 %v6324_v7 }
 0x4d5   : > { %5499 = vmatprep.subr.mxu0 %v6226_v3 }
 0x4d6   : > { %5500 = vmatpush3.msra.mxu0 %v6331_v8 }
 0x4d7   : > { %5501 = vmatprep.subr.mxu0 %v6226_v3 }
 0x4d8   : > { %5502 = vmatpush3.msra.mxu0 %v6338_v9 }
 0x4d9   : > { %5503 = vmatprep.subr.mxu0 %v6226_v3 }
 0x4da   : > { %5504 = vmatpush3.msra.mxu0 %v6345_v10 }
 0x4db   : > { %5505 = vmatprep.subr.mxu0 %v6226_v3 }
 0x4dc   : > { %5506 = vmatpush3.msra.mxu0 %v6354_v11 }
 0x4dd   : > { %5534 = vmatprep.subr.mxu0 %v6226_v3 }
 0x58d   : > { %v730_v43 = vpop.f32.mrf.mxu0 }
 0x58e   : > { %5508 = vmatmul.mubr.msk.f32.vlgmr.msra.gmra.mxu0 %vm292_vm3, %v730_v43 }
 0x58f   : > { %v5490_v44 = vpop.f32.mrf.mxu0  ;;  %5536 = vmatprep.mubr.msk.f32.mxu0 %vm6227_vm2, %v6226_v3 }
 0x64e   : > { %v803_v45 = vpop.f32.mrf.mxu0 }
 0x64f   : > { %v804_v46 = vadd.f32 %v6368_v14, %v803_v45 }
 0x650   : > { %v5509_v47 = vpop.f32.mrf.mxu0 }
 0x651   : > { %v807_v48 = vmax.f32 %v804_v46, 0.0 }
 0x653   : > { %v815_v50 = vadd.f32 %v814_v42, %v807_v48 }
 0x655   : > { %v817_v51 = vmul.f32 %v6466_v49, %v815_v50 }
 0x657   : > { %v6470_v52 = vadd.f32 %v817_v51, %v6283_v1 }
 0x659   : > { %5511 = vmatpush3.msra.mxu1 %v6470_v52 }
 0x65a   : > { %5513 = vmatmul.mubr.msk.f32.vlgmr.msra.gmra.mxu1 %vm218_vm1, %v6288_v2  ;;  %5515 = vmatprep.subr.mxu1 %v6226_v3 }
 0x65b   : > { %5516 = vmatpush3.msra.mxu1 %v6296_v4  ;;  %5531 = vmatprep.mubr.msk.f32.mxu1 %vm6227_vm2, %v6226_v3 }
 0x65c   : > { %5517 = vmatprep.subr.mxu1 %v6226_v3 }
 0x65d   : > { %5518 = vmatpush3.msra.mxu1 %v6306_v5 }
 0x65e   : > { %5519 = vmatprep.subr.mxu1 %v6226_v3 }
 0x65f   : > { %5520 = vmatpush3.msra.mxu1 %v6315_v6 }
 0x660   : > { %5521 = vmatprep.subr.mxu1 %v6226_v3 }
 0x661   : > { %5522 = vmatpush3.msra.mxu1 %v6324_v7 }
 0x662   : > { %5523 = vmatprep.subr.mxu1 %v6226_v3 }
 0x663   : > { %5524 = vmatpush3.msra.mxu1 %v6331_v8 }
 0x664   : > { %5525 = vmatprep.subr.mxu1 %v6226_v3 }
 0x665   : > { %5526 = vmatpush3.msra.mxu1 %v6338_v9 }
 0x666   : > { %5527 = vmatprep.subr.mxu1 %v6226_v3 }
 0x667   : > { %5528 = vmatpush3.msra.mxu1 %v6345_v10 }
 0x668   : > { %5529 = vmatprep.subr.mxu1 %v6226_v3 }
 0x669   : > { %5530 = vmatpush3.msra.mxu1 %v6354_v11 }
 0x66a   : > { %5558 = vmatprep.subr.mxu1 %v6226_v3 }
 0x71a   : > { %v885_v53 = vpop.f32.mrf.mxu1 }
 0x71b   : > { %5532 = vmatmul.mubr.msk.f32.vlgmr.msra.gmra.mxu1 %vm292_vm3, %v885_v53 }
 0x71c   : > { %v5514_v54 = vpop.f32.mrf.mxu1  ;;  %5560 = vmatprep.mubr.msk.f32.mxu1 %vm6227_vm2, %v6226_v3 }
 0x7db   : > { %v958_v55 = vpop.f32.mrf.mxu1 }
 0x7dc   : > { %v6498_v56 = vadd.f32 %v6368_v14, %v958_v55 }
 0x7dd   : > { %v5533_v57 = vpop.f32.mrf.mxu1 }
 0x7de   : > { %v962_v58 = vmax.f32 %v6498_v56, 0.0 }
 0x7e0   : > { %v963_v59 = vmul.f32 %v962_v58, %v6374_v17 }
 0x7e2   : > { %v964_v60 = vadd.f32 %v963_v59, %v6470_v52 }
 0x7e4   : > { %5535 = vmatpush3.msra.mxu0 %v964_v60 }
 0x7e5   : > { %5537 = vmatmul.mubr.msk.f32.vlgmr.msra.gmra.mxu0 %vm218_vm1, %v6288_v2  ;;  %5539 = vmatprep.subr.mxu0 %v6226_v3 }
 0x7e6   : > { %5540 = vmatpush3.msra.mxu0 %v6296_v4  ;;  %5555 = vmatprep.mubr.msk.f32.mxu0 %vm6227_vm2, %v6226_v3 }
 0x7e7   : > { %5541 = vmatprep.subr.mxu0 %v6226_v3 }
 0x7e8   : > { %5542 = vmatpush3.msra.mxu0 %v6306_v5 }
 0x7e9   : > { %5543 = vmatprep.subr.mxu0 %v6226_v3 }
 0x7ea   : > { %5544 = vmatpush3.msra.mxu0 %v6315_v6 }
 0x7eb   : > { %5545 = vmatprep.subr.mxu0 %v6226_v3 }
 0x7ec   : > { %5546 = vmatpush3.msra.mxu0 %v6324_v7 }
 0x7ed   : > { %5547 = vmatprep.subr.mxu0 %v6226_v3 }
 0x7ee   : > { %5548 = vmatpush3.msra.mxu0 %v6331_v8 }
 0x7ef   : > { %5549 = vmatprep.subr.mxu0 %v6226_v3 }
 0x7f0   : > { %5550 = vmatpush3.msra.mxu0 %v6338_v9 }
 0x7f1   : > { %5551 = vmatprep.subr.mxu0 %v6226_v3 }
 0x7f2   : > { %5552 = vmatpush3.msra.mxu0 %v6345_v10 }
 0x7f3   : > { %5553 = vmatprep.subr.mxu0 %v6226_v3 }
 0x7f4   : > { %5554 = vmatpush3.msra.mxu0 %v6354_v11 }
 0x7f5   : > { %5582 = vmatprep.subr.mxu0 %v6226_v3 }
 0x8a5   : > { %v1031_v61 = vpop.f32.mrf.mxu0 }
 0x8a6   : > { %5556 = vmatmul.mubr.msk.f32.vlgmr.msra.gmra.mxu0 %vm292_vm3, %v1031_v61 }
 0x8a7   : > { %v5538_v62 = vpop.f32.mrf.mxu0  ;;  %5584 = vmatprep.mubr.msk.f32.mxu0 %vm6227_vm2, %v6226_v3 }
 0x966   : > { %v1104_v63 = vpop.f32.mrf.mxu0 }
 0x967   : > { %v1105_v0 = vadd.f32 %v6368_v14, %v1104_v63 }
 0x968   : > { %v5557_v1 = vpop.f32.mrf.mxu0 }
 0x969   : > { %v1108_v12 = vmax.f32 %v1105_v0, 0.0 }
 0x96b   : > { %v1109_v13 = vmul.f32 %v1108_v12, %v6374_v17  ;;  %v1401_v20 = vmul.f32 2.0, %v1108_v12 }
 0x96d   : > { %v1110_v15 = vadd.f32 %v1109_v13, %v6470_v52  ;;  %v1402_v24 = vadd.f32 %v1401_v20, %v962_v58 }
 0x96f   : > { %5559 = vmatpush3.msra.mxu1 %v1110_v15 }
 0x970   : > { %5561 = vmatmul.mubr.msk.f32.vlgmr.msra.gmra.mxu1 %vm218_vm1, %v6288_v2  ;;  %5563 = vmatprep.subr.mxu1 %v6226_v3 }
 0x971   : > { %5564 = vmatpush3.msra.mxu1 %v6296_v4  ;;  %5579 = vmatprep.mubr.msk.f32.mxu1 %vm6227_vm2, %v6226_v3 }
 0x972   : > { %5565 = vmatprep.subr.mxu1 %v6226_v3 }
 0x973   : > { %5566 = vmatpush3.msra.mxu1 %v6306_v5 }
 0x974   : > { %5567 = vmatprep.subr.mxu1 %v6226_v3 }
 0x975   : > { %5568 = vmatpush3.msra.mxu1 %v6315_v6 }
 0x976   : > { %5569 = vmatprep.subr.mxu1 %v6226_v3 }
 0x977   : > { %5570 = vmatpush3.msra.mxu1 %v6324_v7 }
 0x978   : > { %5571 = vmatprep.subr.mxu1 %v6226_v3 }
 0x979   : > { %5572 = vmatpush3.msra.mxu1 %v6331_v8 }
 0x97a   : > { %5573 = vmatprep.subr.mxu1 %v6226_v3 }
 0x97b   : > { %5574 = vmatpush3.msra.mxu1 %v6338_v9 }
 0x97c   : > { %5575 = vmatprep.subr.mxu1 %v6226_v3 }
 0x97d   : > { %5576 = vmatpush3.msra.mxu1 %v6345_v10 }
 0x97e   : > { %5577 = vmatprep.subr.mxu1 %v6226_v3 }
 0x97f   : > { %5578 = vmatpush3.msra.mxu1 %v6354_v11 }
 0x980   : > { %5606 = vmatprep.subr.mxu1 %v6226_v3 }
 0xa30   : > { %v1177_v16 = vpop.f32.mrf.mxu1 }
 0xa31   : > { %5580 = vmatmul.mubr.msk.f32.vlgmr.msra.gmra.mxu1 %vm292_vm3, %v1177_v16 }
 0xa32   : > { %v5562_v18 = vpop.f32.mrf.mxu1  ;;  %5608 = vmatprep.mubr.msk.f32.mxu1 %vm6227_vm2, %v6226_v3 }
 0xaf1   : > { %v1250_v19 = vpop.f32.mrf.mxu1 }
 0xaf2   : > { %v1251_v21 = vadd.f32 %v6368_v14, %v1250_v19 }
 0xaf3   : > { %v5581_v22 = vpop.f32.mrf.mxu1 }
 0xaf4   : > { %v1254_v23 = vmax.f32 %v1251_v21, 0.0 }
 0xaf6   : > { %v1255_v25 = vmul.f32 %v1254_v23, %v6434_v35  ;;  %v1403_v26 = vmul.f32 2.0, %v1254_v23 }
 0xaf8   : > { %v1256_v27 = vadd.f32 %v1255_v25, %v6470_v52  ;;  %v1404_v28 = vadd.f32 %v1403_v26, %v1402_v24 }
 0xafa   : > { %5583 = vmatpush3.msra.mxu0 %v1256_v27 }
 0xafb   : > { %5585 = vmatmul.mubr.msk.f32.vlgmr.msra.gmra.mxu0 %vm218_vm1, %v6288_v2  ;;  %5587 = vmatprep.subr.mxu0 %v6226_v3 }
 0xafc   : > { %5588 = vmatpush3.msra.mxu0 %v6296_v4  ;;  %5603 = vmatprep.mubr.msk.f32.mxu0 %vm6227_vm2, %v6226_v3 }
 0xafd   : > { %5589 = vmatprep.subr.mxu0 %v6226_v3 }
 0xafe   : > { %5590 = vmatpush3.msra.mxu0 %v6306_v5 }
 0xaff   : > { %5591 = vmatprep.subr.mxu0 %v6226_v3 }
 0xb00   : > { %5592 = vmatpush3.msra.mxu0 %v6315_v6 }
 0xb01   : > { %5593 = vmatprep.subr.mxu0 %v6226_v3 }
 0xb02   : > { %5594 = vmatpush3.msra.mxu0 %v6324_v7 }
 0xb03   : > { %5595 = vmatprep.subr.mxu0 %v6226_v3 }
 0xb04   : > { %5596 = vmatpush3.msra.mxu0 %v6331_v8 }
 0xb05   : > { %5597 = vmatprep.subr.mxu0 %v6226_v3 }
 0xb06   : > { %5598 = vmatpush3.msra.mxu0 %v6338_v9 }
 0xb07   : > { %5599 = vmatprep.subr.mxu0 %v6226_v3 }
 0xb08   : > { %5600 = vmatpush3.msra.mxu0 %v6345_v10 }
 0xb09   : > { %5601 = vmatprep.subr.mxu0 %v6226_v3 }
 0xb0a   : > { %5602 = vmatpush3.msra.mxu0 %v6354_v11 }
 0xb0b   : > { %5630 = vmatprep.subr.mxu0 %v6226_v3 }
 0xbbb   : > { %v1323_v29 = vpop.f32.mrf.mxu0 }
 0xbbc   : > { %5604 = vmatmul.mubr.msk.f32.vlgmr.msra.gmra.mxu0 %vm292_vm3, %v1323_v29 }
 0xbbd   : > { %v5586_v30 = vpop.f32.mrf.mxu0  ;;  %5632 = vmatprep.mubr.msk.f32.mxu0 %vm6227_vm2, %v6226_v3 }
 0xc7c   : > { %v1396_v31 = vpop.f32.mrf.mxu0 }
 0xc7d   : > { %v1397_v32 = vadd.f32 %v6368_v14, %v1396_v31 }
 0xc7e   : > { %v5605_v33 = vpop.f32.mrf.mxu0 }
 0xc7f   : > { %v1400_v34 = vmax.f32 %v1397_v32, 0.0 }
 0xc81   : > { %v1405_v36 = vadd.f32 %v1404_v28, %v1400_v34 }
 0xc83   : > { %v1406_v37 = vmul.f32 %v1405_v36, %v6466_v49 }
 0xc85   : > { %v6584_v38 = vadd.f32 %v1406_v37, %v6470_v52 }
 0xc87   : > { %5607 = vmatpush3.msra.mxu1 %v6584_v38 }
 0xc88   : > { %5609 = vmatmul.mubr.msk.f32.vlgmr.msra.gmra.mxu1 %vm218_vm1, %v6288_v2  ;;  %5611 = vmatprep.subr.mxu1 %v6226_v3 }
 0xc89   : > { %5612 = vmatpush3.msra.mxu1 %v6296_v4  ;;  %5627 = vmatprep.mubr.msk.f32.mxu1 %vm6227_vm2, %v6226_v3 }
 0xc8a   : > { %5613 = vmatprep.subr.mxu1 %v6226_v3 }
 0xc8b   : > { %5614 = vmatpush3.msra.mxu1 %v6306_v5 }
 0xc8c   : > { %5615 = vmatprep.subr.mxu1 %v6226_v3 }
 0xc8d   : > { %5616 = vmatpush3.msra.mxu1 %v6315_v6 }
 0xc8e   : > { %5617 = vmatprep.subr.mxu1 %v6226_v3 }
 0xc8f   : > { %5618 = vmatpush3.msra.mxu1 %v6324_v7 }
 0xc90   : > { %5619 = vmatprep.subr.mxu1 %v6226_v3 }
 0xc91   : > { %5620 = vmatpush3.msra.mxu1 %v6331_v8 }
 0xc92   : > { %5621 = vmatprep.subr.mxu1 %v6226_v3 }
 0xc93   : > { %5622 = vmatpush3.msra.mxu1 %v6338_v9 }
 0xc94   : > { %5623 = vmatprep.subr.mxu1 %v6226_v3 }
 0xc95   : > { %5624 = vmatpush3.msra.mxu1 %v6345_v10 }
 0xc96   : > { %5625 = vmatprep.subr.mxu1 %v6226_v3 }
 0xc97   : > { %5626 = vmatpush3.msra.mxu1 %v6354_v11 }
 0xc98   : > { %5654 = vmatprep.subr.mxu1 %v6226_v3 }
 0xd48   : > { %v1474_v39 = vpop.f32.mrf.mxu1 }
 0xd49   : > { %5628 = vmatmul.mubr.msk.f32.vlgmr.msra.gmra.mxu1 %vm292_vm3, %v1474_v39 }
 0xd4a   : > { %v5610_v40 = vpop.f32.mrf.mxu1  ;;  %5656 = vmatprep.mubr.msk.f32.mxu1 %vm6227_vm2, %v6226_v3 }
 0xe09   : > { %v1547_v41 = vpop.f32.mrf.mxu1 }
 0xe0a   : > { %v6612_v42 = vadd.f32 %v6368_v14, %v1547_v41 }
 0xe0b   : > { %v5629_v43 = vpop.f32.mrf.mxu1 }
 0xe0c   : > { %v1551_v44 = vmax.f32 %v6612_v42, 0.0 }
 0xe0e   : > { %v1552_v45 = vmul.f32 %v1551_v44, %v6374_v17 }
 0xe10   : > { %v1553_v46 = vadd.f32 %v1552_v45, %v6584_v38 }
 0xe12   : > { %5631 = vmatpush3.msra.mxu0 %v1553_v46 }
 0xe13   : > { %5633 = vmatmul.mubr.msk.f32.vlgmr.msra.gmra.mxu0 %vm218_vm1, %v6288_v2  ;;  %5635 = vmatprep.subr.mxu0 %v6226_v3 }
 0xe14   : > { %5636 = vmatpush3.msra.mxu0 %v6296_v4  ;;  %5651 = vmatprep.mubr.msk.f32.mxu0 %vm6227_vm2, %v6226_v3 }
 0xe15   : > { %5637 = vmatprep.subr.mxu0 %v6226_v3 }
 0xe16   : > { %5638 = vmatpush3.msra.mxu0 %v6306_v5 }
 0xe17   : > { %5639 = vmatprep.subr.mxu0 %v6226_v3 }
 0xe18   : > { %5640 = vmatpush3.msra.mxu0 %v6315_v6 }
 0xe19   : > { %5641 = vmatprep.subr.mxu0 %v6226_v3 }
 0xe1a   : > { %5642 = vmatpush3.msra.mxu0 %v6324_v7 }
 0xe1b   : > { %5643 = vmatprep.subr.mxu0 %v6226_v3 }
 0xe1c   : > { %5644 = vmatpush3.msra.mxu0 %v6331_v8 }
 0xe1d   : > { %5645 = vmatprep.subr.mxu0 %v6226_v3 }
 0xe1e   : > { %5646 = vmatpush3.msra.mxu0 %v6338_v9 }
 0xe1f   : > { %5647 = vmatprep.subr.mxu0 %v6226_v3 }
 0xe20   : > { %5648 = vmatpush3.msra.mxu0 %v6345_v10 }
 0xe21   : > { %5649 = vmatprep.subr.mxu0 %v6226_v3 }
 0xe22   : > { %5650 = vmatpush3.msra.mxu0 %v6354_v11 }
 0xe23   : > { %5678 = vmatprep.subr.mxu0 %v6226_v3 }
 0xed3   : > { %v1620_v47 = vpop.f32.mrf.mxu0 }
 0xed4   : > { %5652 = vmatmul.mubr.msk.f32.vlgmr.msra.gmra.mxu0 %vm292_vm3, %v1620_v47 }
 0xed5   : > { %v5634_v48 = vpop.f32.mrf.mxu0  ;;  %5680 = vmatprep.mubr.msk.f32.mxu0 %vm6227_vm2, %v6226_v3 }
 0xf94   : > { %v1693_v50 = vpop.f32.mrf.mxu0 }
 0xf95   : > { %v1694_v51 = vadd.f32 %v6368_v14, %v1693_v50 }
 0xf96   : > { %v5653_v52 = vpop.f32.mrf.mxu0 }
 0xf97   : > { %v1697_v53 = vmax.f32 %v1694_v51, 0.0 }
 0xf99   : > { %v1698_v54 = vmul.f32 %v1697_v53, %v6374_v17  ;;  %v1990_v59 = vmul.f32 2.0, %v1697_v53 }
 0xf9b   : > { %v1699_v55 = vadd.f32 %v1698_v54, %v6584_v38  ;;  %v1991_v63 = vadd.f32 %v1990_v59, %v1551_v44  ;;  %v6849_v59 = vld [vmem:[%s7324_s3 + $0x20] sm:$0xff] }
 0xf9d   : > { %5655 = vmatpush3.msra.mxu1 %v1699_v55 }
 0xf9e   : > { %5657 = vmatmul.mubr.msk.f32.vlgmr.msra.gmra.mxu1 %vm218_vm1, %v6288_v2  ;;  %5659 = vmatprep.subr.mxu1 %v6226_v3 }
 0xf9f   : > { %5660 = vmatpush3.msra.mxu1 %v6296_v4  ;;  %5675 = vmatprep.mubr.msk.f32.mxu1 %vm6227_vm2, %v6226_v3 }
 0xfa0   : > { %5661 = vmatprep.subr.mxu1 %v6226_v3 }
 0xfa1   : > { %5662 = vmatpush3.msra.mxu1 %v6306_v5 }
 0xfa2   : > { %5663 = vmatprep.subr.mxu1 %v6226_v3 }
 0xfa3   : > { %5664 = vmatpush3.msra.mxu1 %v6315_v6 }
 0xfa4   : > { %5665 = vmatprep.subr.mxu1 %v6226_v3 }
 0xfa5   : > { %5666 = vmatpush3.msra.mxu1 %v6324_v7 }
 0xfa6   : > { %5667 = vmatprep.subr.mxu1 %v6226_v3 }
 0xfa7   : > { %5668 = vmatpush3.msra.mxu1 %v6331_v8 }
 0xfa8   : > { %5669 = vmatprep.subr.mxu1 %v6226_v3 }
 0xfa9   : > { %5670 = vmatpush3.msra.mxu1 %v6338_v9 }
 0xfaa   : > { %5671 = vmatprep.subr.mxu1 %v6226_v3 }
 0xfab   : > { %5672 = vmatpush3.msra.mxu1 %v6345_v10 }
 0xfac   : > { %5673 = vmatprep.subr.mxu1 %v6226_v3 }
 0xfad   : > { %5674 = vmatpush3.msra.mxu1 %v6354_v11 }
 0xfae   : > { %5702 = vmatprep.subr.mxu1 %v6226_v3 }
0x105e   : > { %v1766_v56 = vpop.f32.mrf.mxu1 }
0x105f   : > { %5676 = vmatmul.mubr.msk.f32.vlgmr.msra.gmra.mxu1 %vm292_vm3, %v1766_v56  ;;  %v6826_v56 = vld [vmem:[%s7324_s3 + $0x38] sm:$0xff] }
0x1060   : > { %v5658_v57 = vpop.f32.mrf.mxu1  ;;  %5704 = vmatprep.mubr.msk.f32.mxu1 %vm6227_vm2, %v6226_v3 }
0x1061   : > { %v6835_v57 = vld [vmem:[%s7324_s3 + $0x30] sm:$0xff] }
0x111f   : > { %v1839_v58 = vpop.f32.mrf.mxu1 }
0x1120   : > { %v1840_v60 = vadd.f32 %v6368_v14, %v1839_v58  ;;  %v6842_v58 = vld [vmem:[%s7324_s3 + $0x28] sm:$0xff] }
0x1121   : > { %v5677_v61 = vpop.f32.mrf.mxu1 }
0x1122   : > { %v1843_v62 = vmax.f32 %v1840_v60, 0.0  ;;  %v6856_v60 = vld [vmem:[%s7324_s3 + $0x18] sm:$0xff]  ;;  %v6863_v61 = vld [vmem:[%s7324_s3 + $0x10] sm:$0xff] }
0x1124   : > { %v1844_v0 = vmul.f32 %v1843_v62, %v6434_v35  ;;  %v1992_v1 = vmul.f32 2.0, %v1843_v62  ;;  %v6870_v62 = vld [vmem:[%s7324_s3 + $0x8] sm:$0xff] }
0x1126   : > { %v1845_v12 = vadd.f32 %v1844_v0, %v6584_v38  ;;  %v1993_v13 = vadd.f32 %v1992_v1, %v1991_v63  ;;  %v6877_v63 = vld [vmem:[%s7324_s3] sm:$0xff] }
0x1128   : > { %5679 = vmatpush3.msra.mxu0 %v1845_v12 }
0x1129   : > { %5681 = vmatmul.mubr.msk.f32.vlgmr.msra.gmra.mxu0 %vm218_vm1, %v6288_v2  ;;  %5683 = vmatprep.subr.mxu0 %v6226_v3 }
0x112a   : > { %5684 = vmatpush3.msra.mxu0 %v6296_v4  ;;  %5699 = vmatprep.mubr.msk.f32.mxu0 %vm6227_vm2, %v6226_v3 }
0x112b   : > { %5685 = vmatprep.subr.mxu0 %v6226_v3 }
0x112c   : > { %5686 = vmatpush3.msra.mxu0 %v6306_v5 }
0x112d   : > { %5687 = vmatprep.subr.mxu0 %v6226_v3 }
0x112e   : > { %5688 = vmatpush3.msra.mxu0 %v6315_v6 }
0x112f   : > { %5689 = vmatprep.subr.mxu0 %v6226_v3 }
0x1130   : > { %5690 = vmatpush3.msra.mxu0 %v6324_v7 }
0x1131   : > { %5691 = vmatprep.subr.mxu0 %v6226_v3 }
0x1132   : > { %5692 = vmatpush3.msra.mxu0 %v6331_v8 }
0x1133   : > { %5693 = vmatprep.subr.mxu0 %v6226_v3 }
0x1134   : > { %5694 = vmatpush3.msra.mxu0 %v6338_v9 }
0x1135   : > { %5695 = vmatprep.subr.mxu0 %v6226_v3 }
0x1136   : > { %5696 = vmatpush3.msra.mxu0 %v6345_v10 }
0x1137   : > { %5697 = vmatprep.subr.mxu0 %v6226_v3 }
0x1138   : > { %5698 = vmatpush3.msra.mxu0 %v6354_v11 }
0x1139   : > { %5726 = vmatprep.subr.mxu0 %v6226_v3 }
0x11e9   : > { %v1912_v15 = vpop.f32.mrf.mxu0 }
0x11ea   : > { %5700 = vmatmul.mubr.msk.f32.vlgmr.msra.gmra.mxu0 %vm292_vm3, %v1912_v15 }
0x11eb   : > { %v5682_v16 = vpop.f32.mrf.mxu0  ;;  %5728 = vmatprep.mubr.msk.f32.mxu0 %vm6227_vm2, %v6226_v3 }
0x12aa   : > { %v1985_v18 = vpop.f32.mrf.mxu0 }
0x12ab   : > { %v1986_v19 = vadd.f32 %v6368_v14, %v1985_v18 }
0x12ac   : > { %v5701_v20 = vpop.f32.mrf.mxu0 }
0x12ad   : > { %v1989_v21 = vmax.f32 %v1986_v19, 0.0 }
0x12af   : > { %v1994_v22 = vadd.f32 %v1993_v13, %v1989_v21 }
0x12b1   : > { %v1995_v23 = vmul.f32 %v1994_v22, %v6466_v49  ;;  %v6919_v22 = vld [vmem:[%s7325_s4] ss:$0 sm:$0xff] }
0x12b3   : > { %v6698_v24 = vadd.f32 %v1995_v23, %v6584_v38 }
0x12b5   : > { %5703 = vmatpush3.msra.mxu1 %v6698_v24 }
0x12b6   : > { %5705 = vmatmul.mubr.msk.f32.vlgmr.msra.gmra.mxu1 %vm218_vm1, %v6288_v2  ;;  %5707 = vmatprep.subr.mxu1 %v6226_v3 }
0x12b7   : > { %5708 = vmatpush3.msra.mxu1 %v6296_v4  ;;  %5723 = vmatprep.mubr.msk.f32.mxu1 %vm6227_vm2, %v6226_v3 }
0x12b8   : > { %5709 = vmatprep.subr.mxu1 %v6226_v3 }
0x12b9   : > { %5710 = vmatpush3.msra.mxu1 %v6306_v5 }
0x12ba   : > { %5711 = vmatprep.subr.mxu1 %v6226_v3 }
0x12bb   : > { %5712 = vmatpush3.msra.mxu1 %v6315_v6 }
0x12bc   : > { %5713 = vmatprep.subr.mxu1 %v6226_v3 }
0x12bd   : > { %5714 = vmatpush3.msra.mxu1 %v6324_v7 }
0x12be   : > { %5715 = vmatprep.subr.mxu1 %v6226_v3 }
0x12bf   : > { %5716 = vmatpush3.msra.mxu1 %v6331_v8 }
0x12c0   : > { %5717 = vmatprep.subr.mxu1 %v6226_v3 }
0x12c1   : > { %5718 = vmatpush3.msra.mxu1 %v6338_v9 }
0x12c2   : > { %5719 = vmatprep.subr.mxu1 %v6226_v3 }
0x12c3   : > { %5720 = vmatpush3.msra.mxu1 %v6345_v10 }
0x12c4   : > { %5721 = vmatprep.subr.mxu1 %v6226_v3 }
0x12c5   : > { %5722 = vmatpush3.msra.mxu1 %v6354_v11 }
0x12c6   : > { %5750 = vmatprep.subr.mxu1 %v6226_v3 }
0x1376   : > { %v2063_v25 = vpop.f32.mrf.mxu1 }
0x1377   : > { %5724 = vmatmul.mubr.msk.f32.vlgmr.msra.gmra.mxu1 %vm292_vm3, %v2063_v25 }
0x1378   : > { %v5706_v26 = vpop.f32.mrf.mxu1  ;;  %5752 = vmatprep.mubr.msk.f32.mxu1 %vm6227_vm2, %v6226_v3 }
0x1437   : > { %v2136_v27 = vpop.f32.mrf.mxu1 }
0x1438   : > { %v6726_v28 = vadd.f32 %v6368_v14, %v2136_v27 }
0x1439   : > { %v5725_v29 = vpop.f32.mrf.mxu1 }
0x143a   : > { %v2140_v30 = vmax.f32 %v6726_v28, 0.0 }
0x143c   : > { %v2141_v31 = vmul.f32 %v2140_v30, %v6374_v17 }
0x143e   : > { %v2142_v32 = vadd.f32 %v2141_v31, %v6698_v24 }
0x1440   : > { %5727 = vmatpush3.msra.mxu0 %v2142_v32 }
0x1441   : > { %5729 = vmatmul.mubr.msk.f32.vlgmr.msra.gmra.mxu0 %vm218_vm1, %v6288_v2  ;;  %5731 = vmatprep.subr.mxu0 %v6226_v3 }
0x1442   : > { %5732 = vmatpush3.msra.mxu0 %v6296_v4  ;;  %5747 = vmatprep.mubr.msk.f32.mxu0 %vm6227_vm2, %v6226_v3 }
0x1443   : > { %5733 = vmatprep.subr.mxu0 %v6226_v3 }
0x1444   : > { %5734 = vmatpush3.msra.mxu0 %v6306_v5 }
0x1445   : > { %5735 = vmatprep.subr.mxu0 %v6226_v3 }
0x1446   : > { %5736 = vmatpush3.msra.mxu0 %v6315_v6 }
0x1447   : > { %5737 = vmatprep.subr.mxu0 %v6226_v3 }
0x1448   : > { %5738 = vmatpush3.msra.mxu0 %v6324_v7 }
0x1449   : > { %5739 = vmatprep.subr.mxu0 %v6226_v3 }
0x144a   : > { %5740 = vmatpush3.msra.mxu0 %v6331_v8 }
0x144b   : > { %5741 = vmatprep.subr.mxu0 %v6226_v3 }
0x144c   : > { %5742 = vmatpush3.msra.mxu0 %v6338_v9 }
0x144d   : > { %5743 = vmatprep.subr.mxu0 %v6226_v3 }
0x144e   : > { %5744 = vmatpush3.msra.mxu0 %v6345_v10 }
0x144f   : > { %5745 = vmatprep.subr.mxu0 %v6226_v3 }
0x1450   : > { %5746 = vmatpush3.msra.mxu0 %v6354_v11 }
0x1451   : > { %5774 = vmatprep.subr.mxu0 %v6226_v3 }
0x1501   : > { %v2209_v33 = vpop.f32.mrf.mxu0 }
0x1502   : > { %5748 = vmatmul.mubr.msk.f32.vlgmr.msra.gmra.mxu0 %vm292_vm3, %v2209_v33 }
0x1503   : > { %v5730_v34 = vpop.f32.mrf.mxu0  ;;  %5776 = vmatprep.mubr.msk.f32.mxu0 %vm6227_vm2, %v6226_v3 }
0x15c2   : > { %v2282_v36 = vpop.f32.mrf.mxu0 }
0x15c3   : > { %v2283_v37 = vadd.f32 %v6368_v14, %v2282_v36 }
0x15c4   : > { %v5749_v38 = vpop.f32.mrf.mxu0 }
0x15c5   : > { %v2286_v39 = vmax.f32 %v2283_v37, 0.0 }
0x15c7   : > { %v2287_v40 = vmul.f32 %v2286_v39, %v6374_v17  ;;  %v2579_v45 = vmul.f32 2.0, %v2286_v39 }
0x15c9   : > { %v2288_v41 = vadd.f32 %v2287_v40, %v6698_v24  ;;  %v2580_v50 = vadd.f32 %v2579_v45, %v2140_v30 }
0x15cb   : > { %5751 = vmatpush3.msra.mxu1 %v2288_v41 }
0x15cc   : > { %5753 = vmatmul.mubr.msk.f32.vlgmr.msra.gmra.mxu1 %vm218_vm1, %v6288_v2  ;;  %5755 = vmatprep.subr.mxu1 %v6226_v3 }
0x15cd   : > { %5756 = vmatpush3.msra.mxu1 %v6296_v4  ;;  %5771 = vmatprep.mubr.msk.f32.mxu1 %vm6227_vm2, %v6226_v3 }
0x15ce   : > { %5757 = vmatprep.subr.mxu1 %v6226_v3 }
0x15cf   : > { %5758 = vmatpush3.msra.mxu1 %v6306_v5 }
0x15d0   : > { %5759 = vmatprep.subr.mxu1 %v6226_v3 }
0x15d1   : > { %5760 = vmatpush3.msra.mxu1 %v6315_v6 }
0x15d2   : > { %5761 = vmatprep.subr.mxu1 %v6226_v3 }
0x15d3   : > { %5762 = vmatpush3.msra.mxu1 %v6324_v7 }
0x15d4   : > { %5763 = vmatprep.subr.mxu1 %v6226_v3 }
0x15d5   : > { %5764 = vmatpush3.msra.mxu1 %v6331_v8 }
0x15d6   : > { %5765 = vmatprep.subr.mxu1 %v6226_v3 }
0x15d7   : > { %5766 = vmatpush3.msra.mxu1 %v6338_v9 }
0x15d8   : > { %5767 = vmatprep.subr.mxu1 %v6226_v3 }
0x15d9   : > { %5768 = vmatpush3.msra.mxu1 %v6345_v10 }
0x15da   : > { %5769 = vmatprep.subr.mxu1 %v6226_v3 }
0x15db   : > { %5770 = vmatpush3.msra.mxu1 %v6354_v11 }
0x15dc   : > { %5798 = vmatprep.subr.mxu1 %v6226_v3 }
0x168c   : > { %v2355_v42 = vpop.f32.mrf.mxu1 }
0x168d   : > { %5772 = vmatmul.mubr.msk.f32.vlgmr.msra.gmra.mxu1 %vm292_vm3, %v2355_v42 }
0x168e   : > { %v5754_v43 = vpop.f32.mrf.mxu1  ;;  %5800 = vmatprep.mubr.msk.f32.mxu1 %vm6227_vm2, %v6226_v3 }
0x174d   : > { %v2428_v44 = vpop.f32.mrf.mxu1 }
0x174e   : > { %v2429_v46 = vadd.f32 %v6368_v14, %v2428_v44 }
0x174f   : > { %v5773_v47 = vpop.f32.mrf.mxu1 }
0x1750   : > { %v2432_v48 = vmax.f32 %v2429_v46, 0.0 }
0x1752   : > { %v2433_v51 = vmul.f32 %v2432_v48, %v6434_v35  ;;  %v2581_v52 = vmul.f32 2.0, %v2432_v48 }
0x1754   : > { %v2434_v53 = vadd.f32 %v2433_v51, %v6698_v24  ;;  %v2582_v54 = vadd.f32 %v2581_v52, %v2580_v50 }
0x1756   : > { %5775 = vmatpush3.msra.mxu0 %v2434_v53 }
0x1757   : > { %5777 = vmatmul.mubr.msk.f32.vlgmr.msra.gmra.mxu0 %vm218_vm1, %v6288_v2  ;;  %5779 = vmatprep.subr.mxu0 %v6226_v3 }
0x1758   : > { %5780 = vmatpush3.msra.mxu0 %v6296_v4  ;;  %5795 = vmatprep.mubr.msk.f32.mxu0 %vm6227_vm2, %v6226_v3 }
0x1759   : > { %5781 = vmatprep.subr.mxu0 %v6226_v3 }
0x175a   : > { %5782 = vmatpush3.msra.mxu0 %v6306_v5 }
0x175b   : > { %5783 = vmatprep.subr.mxu0 %v6226_v3 }
0x175c   : > { %5784 = vmatpush3.msra.mxu0 %v6315_v6 }
0x175d   : > { %5785 = vmatprep.subr.mxu0 %v6226_v3 }
0x175e   : > { %5786 = vmatpush3.msra.mxu0 %v6324_v7 }
0x175f   : > { %5787 = vmatprep.subr.mxu0 %v6226_v3 }
0x1760   : > { %5788 = vmatpush3.msra.mxu0 %v6331_v8 }
0x1761   : > { %5789 = vmatprep.subr.mxu0 %v6226_v3 }
0x1762   : > { %5790 = vmatpush3.msra.mxu0 %v6338_v9 }
0x1763   : > { %5791 = vmatprep.subr.mxu0 %v6226_v3 }
0x1764   : > { %5792 = vmatpush3.msra.mxu0 %v6345_v10 }
0x1765   : > { %5793 = vmatprep.subr.mxu0 %v6226_v3 }
0x1766   : > { %5794 = vmatpush3.msra.mxu0 %v6354_v11  ;;  %v6818_v11 = vld [vmem:[%s7323_s2] sm:$0xff] }
0x1767   : > { %5822 = vmatprep.subr.mxu0 %v6226_v3 }
0x1817   : > { %v2501_v2 = vpop.f32.mrf.mxu0 }
0x1818   : > { %5796 = vmatmul.mubr.msk.f32.vlgmr.msra.gmra.mxu0 %vm292_vm3, %v2501_v2 }
0x1819   : > { %v5778_v4 = vpop.f32.mrf.mxu0  ;;  %5824 = vmatprep.mubr.msk.f32.mxu0 %vm6227_vm2, %v6226_v3 }
0x18d8   : > { %v2574_v5 = vpop.f32.mrf.mxu0 }
0x18d9   : > { %v2575_v6 = vadd.f32 %v6368_v14, %v2574_v5 }
0x18da   : > { %v5797_v7 = vpop.f32.mrf.mxu0 }
0x18db   : > { %v2578_v8 = vmax.f32 %v2575_v6, 0.0 }
0x18dd   : > { %v2583_v9 = vadd.f32 %v2582_v54, %v2578_v8 }
0x18df   : > { %v2584_v10 = vmul.f32 %v2583_v9, %v6466_v49 }
0x18e1   : > { %v6812_v55 = vadd.f32 %v2584_v10, %v6698_v24 }
0x18e3   : > { %5799 = vmatpush3.msra.mxu1 %v6812_v55 }
0x18e4   : > { %5801 = vmatmul.mubr.msk.f32.vlgmr.msra.gmra.mxu1 %vm218_vm1, %v6818_v11  ;;  %5803 = vmatprep.subr.mxu1 %v6226_v3 }
0x18e5   : > { %5804 = vmatpush3.msra.mxu1 %v6826_v56  ;;  %5819 = vmatprep.mubr.msk.f32.mxu1 %vm6227_vm2, %v6226_v3 }
0x18e6   : > { %5805 = vmatprep.subr.mxu1 %v6226_v3 }
0x18e7   : > { %5806 = vmatpush3.msra.mxu1 %v6835_v57 }
0x18e8   : > { %5807 = vmatprep.subr.mxu1 %v6226_v3 }
0x18e9   : > { %5808 = vmatpush3.msra.mxu1 %v6842_v58 }
0x18ea   : > { %5809 = vmatprep.subr.mxu1 %v6226_v3 }
0x18eb   : > { %5810 = vmatpush3.msra.mxu1 %v6849_v59 }
0x18ec   : > { %5811 = vmatprep.subr.mxu1 %v6226_v3 }
0x18ed   : > { %5812 = vmatpush3.msra.mxu1 %v6856_v60 }
0x18ee   : > { %5813 = vmatprep.subr.mxu1 %v6226_v3 }
0x18ef   : > { %5814 = vmatpush3.msra.mxu1 %v6863_v61 }
0x18f0   : > { %5815 = vmatprep.subr.mxu1 %v6226_v3 }
0x18f1   : > { %5816 = vmatpush3.msra.mxu1 %v6870_v62 }
0x18f2   : > { %5817 = vmatprep.subr.mxu1 %v6226_v3 }
0x18f3   : > { %5818 = vmatpush3.msra.mxu1 %v6877_v63 }
0x18f4   : > { %5846 = vmatprep.subr.mxu1 %v6226_v3 }
0x19a4   : > { %v2652_v0 = vpop.f32.mrf.mxu1 }
0x19a5   : > { %5820 = vmatmul.mubr.msk.f32.vlgmr.msra.gmra.mxu1 %vm292_vm3, %v2652_v0 }
0x19a6   : > { %v5802_v1 = vpop.f32.mrf.mxu1  ;;  %5848 = vmatprep.mubr.msk.f32.mxu1 %vm6227_vm2, %v6226_v3 }
0x1a65   : > { %v2725_v12 = vpop.f32.mrf.mxu1 }
0x1a66   : > { %v6885_v13 = vadd.f32 %v6368_v14, %v2725_v12 }
0x1a67   : > { %v5821_v15 = vpop.f32.mrf.mxu1 }
0x1a68   : > { %v2729_v16 = vmax.f32 %v6885_v13, 0.0 }
0x1a6a   : > { %v2730_v18 = vmul.f32 %v2729_v16, %v6374_v17 }
0x1a6c   : > { %v2731_v19 = vadd.f32 %v2730_v18, %v6812_v55 }
0x1a6e   : > { %5823 = vmatpush3.msra.mxu0 %v2731_v19 }
0x1a6f   : > { %5825 = vmatmul.mubr.msk.f32.vlgmr.msra.gmra.mxu0 %vm218_vm1, %v6818_v11  ;;  %5827 = vmatprep.subr.mxu0 %v6226_v3 }
0x1a70   : > { %5828 = vmatpush3.msra.mxu0 %v6826_v56  ;;  %5843 = vmatprep.mubr.msk.f32.mxu0 %vm6227_vm2, %v6226_v3 }
0x1a71   : > { %5829 = vmatprep.subr.mxu0 %v6226_v3 }
0x1a72   : > { %5830 = vmatpush3.msra.mxu0 %v6835_v57 }
0x1a73   : > { %5831 = vmatprep.subr.mxu0 %v6226_v3 }
0x1a74   : > { %5832 = vmatpush3.msra.mxu0 %v6842_v58 }
0x1a75   : > { %5833 = vmatprep.subr.mxu0 %v6226_v3 }
0x1a76   : > { %5834 = vmatpush3.msra.mxu0 %v6849_v59 }
0x1a77   : > { %5835 = vmatprep.subr.mxu0 %v6226_v3 }
0x1a78   : > { %5836 = vmatpush3.msra.mxu0 %v6856_v60 }
0x1a79   : > { %5837 = vmatprep.subr.mxu0 %v6226_v3 }
0x1a7a   : > { %5838 = vmatpush3.msra.mxu0 %v6863_v61 }
0x1a7b   : > { %5839 = vmatprep.subr.mxu0 %v6226_v3 }
0x1a7c   : > { %5840 = vmatpush3.msra.mxu0 %v6870_v62 }
0x1a7d   : > { %5841 = vmatprep.subr.mxu0 %v6226_v3 }
0x1a7e   : > { %5842 = vmatpush3.msra.mxu0 %v6877_v63 }
0x1a7f   : > { %5870 = vmatprep.subr.mxu0 %v6226_v3 }
0x1b2f   : > { %v2798_v14 = vpop.f32.mrf.mxu0 }
0x1b30   : > { %5844 = vmatmul.mubr.msk.f32.vlgmr.msra.gmra.mxu0 %vm292_vm3, %v2798_v14 }
0x1b31   : > { %v5826_v20 = vpop.f32.mrf.mxu0  ;;  %5872 = vmatprep.mubr.msk.f32.mxu0 %vm6227_vm2, %v6226_v3 }
0x1bf0   : > { %v2871_v21 = vpop.f32.mrf.mxu0 }
0x1bf1   : > { %v2872_v23 = vadd.f32 %v6919_v22, %v2871_v21 }
0x1bf2   : > { %v5845_v24 = vpop.f32.mrf.mxu0 }
0x1bf3   : > { %v2875_v25 = vmax.f32 %v2872_v23, 0.0 }
0x1bf5   : > { %v2876_v26 = vmul.f32 %v2875_v25, %v6374_v17  ;;  %v3168_v31 = vmul.f32 2.0, %v2875_v25 }
0x1bf7   : > { %v2877_v27 = vadd.f32 %v2876_v26, %v6812_v55  ;;  %v3169_v36 = vadd.f32 %v3168_v31, %v2729_v16 }
0x1bf9   : > { %5847 = vmatpush3.msra.mxu1 %v2877_v27 }
0x1bfa   : > { %5849 = vmatmul.mubr.msk.f32.vlgmr.msra.gmra.mxu1 %vm218_vm1, %v6818_v11  ;;  %5851 = vmatprep.subr.mxu1 %v6226_v3 }
0x1bfb   : > { %5852 = vmatpush3.msra.mxu1 %v6826_v56  ;;  %5867 = vmatprep.mubr.msk.f32.mxu1 %vm6227_vm2, %v6226_v3 }
0x1bfc   : > { %5853 = vmatprep.subr.mxu1 %v6226_v3 }
0x1bfd   : > { %5854 = vmatpush3.msra.mxu1 %v6835_v57 }
0x1bfe   : > { %5855 = vmatprep.subr.mxu1 %v6226_v3 }
0x1bff   : > { %5856 = vmatpush3.msra.mxu1 %v6842_v58 }
0x1c00   : > { %5857 = vmatprep.subr.mxu1 %v6226_v3 }
0x1c01   : > { %5858 = vmatpush3.msra.mxu1 %v6849_v59 }
0x1c02   : > { %5859 = vmatprep.subr.mxu1 %v6226_v3 }
0x1c03   : > { %5860 = vmatpush3.msra.mxu1 %v6856_v60 }
0x1c04   : > { %5861 = vmatprep.subr.mxu1 %v6226_v3 }
0x1c05   : > { %5862 = vmatpush3.msra.mxu1 %v6863_v61 }
0x1c06   : > { %5863 = vmatprep.subr.mxu1 %v6226_v3 }
0x1c07   : > { %5864 = vmatpush3.msra.mxu1 %v6870_v62 }
0x1c08   : > { %5865 = vmatprep.subr.mxu1 %v6226_v3 }
0x1c09   : > { %5866 = vmatpush3.msra.mxu1 %v6877_v63 }
0x1c0a   : > { %5894 = vmatprep.subr.mxu1 %v6226_v3 }
0x1cba   : > { %v2944_v28 = vpop.f32.mrf.mxu1 }
0x1cbb   : > { %5868 = vmatmul.mubr.msk.f32.vlgmr.msra.gmra.mxu1 %vm292_vm3, %v2944_v28 }
0x1cbc   : > { %v5850_v29 = vpop.f32.mrf.mxu1  ;;  %5896 = vmatprep.mubr.msk.f32.mxu1 %vm6227_vm2, %v6226_v3 }
0x1d7b   : > { %v3017_v30 = vpop.f32.mrf.mxu1 }
0x1d7c   : > { %v3018_v32 = vadd.f32 %v6919_v22, %v3017_v30 }
0x1d7d   : > { %v5869_v33 = vpop.f32.mrf.mxu1 }
0x1d7e   : > { %v3021_v34 = vmax.f32 %v3018_v32, 0.0 }
0x1d80   : > { %v3022_v37 = vmul.f32 %v3021_v34, %v6434_v35  ;;  %v3170_v38 = vmul.f32 2.0, %v3021_v34 }
0x1d82   : > { %v3023_v39 = vadd.f32 %v3022_v37, %v6812_v55  ;;  %v3171_v40 = vadd.f32 %v3170_v38, %v3169_v36 }
0x1d84   : > { %5871 = vmatpush3.msra.mxu0 %v3023_v39 }
0x1d85   : > { %5873 = vmatmul.mubr.msk.f32.vlgmr.msra.gmra.mxu0 %vm218_vm1, %v6818_v11  ;;  %5875 = vmatprep.subr.mxu0 %v6226_v3 }
0x1d86   : > { %5876 = vmatpush3.msra.mxu0 %v6826_v56  ;;  %5891 = vmatprep.mubr.msk.f32.mxu0 %vm6227_vm2, %v6226_v3 }
0x1d87   : > { %5877 = vmatprep.subr.mxu0 %v6226_v3 }
0x1d88   : > { %5878 = vmatpush3.msra.mxu0 %v6835_v57 }
0x1d89   : > { %5879 = vmatprep.subr.mxu0 %v6226_v3 }
0x1d8a   : > { %5880 = vmatpush3.msra.mxu0 %v6842_v58 }
0x1d8b   : > { %5881 = vmatprep.subr.mxu0 %v6226_v3 }
0x1d8c   : > { %5882 = vmatpush3.msra.mxu0 %v6849_v59 }
0x1d8d   : > { %5883 = vmatprep.subr.mxu0 %v6226_v3 }
0x1d8e   : > { %5884 = vmatpush3.msra.mxu0 %v6856_v60 }
0x1d8f   : > { %5885 = vmatprep.subr.mxu0 %v6226_v3 }
0x1d90   : > { %5886 = vmatpush3.msra.mxu0 %v6863_v61 }
0x1d91   : > { %5887 = vmatprep.subr.mxu0 %v6226_v3 }
0x1d92   : > { %5888 = vmatpush3.msra.mxu0 %v6870_v62 }
0x1d93   : > { %5889 = vmatprep.subr.mxu0 %v6226_v3 }
0x1d94   : > { %5890 = vmatpush3.msra.mxu0 %v6877_v63 }
0x1d95   : > { %5918 = vmatprep.subr.mxu0 %v6226_v3 }
0x1e45   : > { %v3090_v41 = vpop.f32.mrf.mxu0 }
0x1e46   : > { %5892 = vmatmul.mubr.msk.f32.vlgmr.msra.gmra.mxu0 %vm292_vm3, %v3090_v41 }
0x1e47   : > { %v5874_v42 = vpop.f32.mrf.mxu0  ;;  %5920 = vmatprep.mubr.msk.f32.mxu0 %vm6227_vm2, %v6226_v3 }
0x1f06   : > { %v3163_v43 = vpop.f32.mrf.mxu0 }
0x1f07   : > { %v3164_v44 = vadd.f32 %v6919_v22, %v3163_v43 }
0x1f08   : > { %v5893_v45 = vpop.f32.mrf.mxu0 }
0x1f09   : > { %v3167_v46 = vmax.f32 %v3164_v44, 0.0 }
0x1f0b   : > { %v3172_v47 = vadd.f32 %v3171_v40, %v3167_v46 }
0x1f0d   : > { %v3173_v48 = vmul.f32 %v3172_v47, %v6466_v49 }
0x1f0f   : > { %v6980_v50 = vadd.f32 %v3173_v48, %v6812_v55 }
0x1f11   : > { %5895 = vmatpush3.msra.mxu1 %v6980_v50 }
0x1f12   : > { %5897 = vmatmul.mubr.msk.f32.vlgmr.msra.gmra.mxu1 %vm218_vm1, %v6818_v11  ;;  %5899 = vmatprep.subr.mxu1 %v6226_v3 }
0x1f13   : > { %5900 = vmatpush3.msra.mxu1 %v6826_v56  ;;  %5915 = vmatprep.mubr.msk.f32.mxu1 %vm6227_vm2, %v6226_v3 }
0x1f14   : > { %5901 = vmatprep.subr.mxu1 %v6226_v3 }
0x1f15   : > { %5902 = vmatpush3.msra.mxu1 %v6835_v57 }
0x1f16   : > { %5903 = vmatprep.subr.mxu1 %v6226_v3 }
0x1f17   : > { %5904 = vmatpush3.msra.mxu1 %v6842_v58 }
0x1f18   : > { %5905 = vmatprep.subr.mxu1 %v6226_v3 }
0x1f19   : > { %5906 = vmatpush3.msra.mxu1 %v6849_v59 }
0x1f1a   : > { %5907 = vmatprep.subr.mxu1 %v6226_v3 }
0x1f1b   : > { %5908 = vmatpush3.msra.mxu1 %v6856_v60 }
0x1f1c   : > { %5909 = vmatprep.subr.mxu1 %v6226_v3 }
0x1f1d   : > { %5910 = vmatpush3.msra.mxu1 %v6863_v61 }
0x1f1e   : > { %5911 = vmatprep.subr.mxu1 %v6226_v3 }
0x1f1f   : > { %5912 = vmatpush3.msra.mxu1 %v6870_v62 }
0x1f20   : > { %5913 = vmatprep.subr.mxu1 %v6226_v3 }
0x1f21   : > { %5914 = vmatpush3.msra.mxu1 %v6877_v63 }
0x1f22   : > { %5942 = vmatprep.subr.mxu1 %v6226_v3 }
0x1fd2   : > { %v3241_v51 = vpop.f32.mrf.mxu1 }
0x1fd3   : > { %5916 = vmatmul.mubr.msk.f32.vlgmr.msra.gmra.mxu1 %vm292_vm3, %v3241_v51 }
0x1fd4   : > { %v5898_v52 = vpop.f32.mrf.mxu1  ;;  %5944 = vmatprep.mubr.msk.f32.mxu1 %vm6227_vm2, %v6226_v3 }
0x2093   : > { %v3314_v53 = vpop.f32.mrf.mxu1 }
0x2094   : > { %v7008_v54 = vadd.f32 %v6919_v22, %v3314_v53 }
0x2095   : > { %v5917_v2 = vpop.f32.mrf.mxu1 }
0x2096   : > { %v3318_v4 = vmax.f32 %v7008_v54, 0.0 }
0x2098   : > { %v3319_v5 = vmul.f32 %v3318_v4, %v6374_v17 }
0x209a   : > { %v3320_v6 = vadd.f32 %v3319_v5, %v6980_v50 }
0x209c   : > { %5919 = vmatpush3.msra.mxu0 %v3320_v6 }
0x209d   : > { %5921 = vmatmul.mubr.msk.f32.vlgmr.msra.gmra.mxu0 %vm218_vm1, %v6818_v11  ;;  %5923 = vmatprep.subr.mxu0 %v6226_v3 }
0x209e   : > { %5924 = vmatpush3.msra.mxu0 %v6826_v56  ;;  %5939 = vmatprep.mubr.msk.f32.mxu0 %vm6227_vm2, %v6226_v3 }
0x209f   : > { %5925 = vmatprep.subr.mxu0 %v6226_v3 }
0x20a0   : > { %5926 = vmatpush3.msra.mxu0 %v6835_v57 }
0x20a1   : > { %5927 = vmatprep.subr.mxu0 %v6226_v3 }
0x20a2   : > { %5928 = vmatpush3.msra.mxu0 %v6842_v58 }
0x20a3   : > { %5929 = vmatprep.subr.mxu0 %v6226_v3 }
0x20a4   : > { %5930 = vmatpush3.msra.mxu0 %v6849_v59 }
0x20a5   : > { %5931 = vmatprep.subr.mxu0 %v6226_v3 }
0x20a6   : > { %5932 = vmatpush3.msra.mxu0 %v6856_v60 }
0x20a7   : > { %5933 = vmatprep.subr.mxu0 %v6226_v3 }
0x20a8   : > { %5934 = vmatpush3.msra.mxu0 %v6863_v61 }
0x20a9   : > { %5935 = vmatprep.subr.mxu0 %v6226_v3 }
0x20aa   : > { %5936 = vmatpush3.msra.mxu0 %v6870_v62 }
0x20ab   : > { %5937 = vmatprep.subr.mxu0 %v6226_v3 }
0x20ac   : > { %5938 = vmatpush3.msra.mxu0 %v6877_v63 }
0x20ad   : > { %5966 = vmatprep.subr.mxu0 %v6226_v3 }
0x215d   : > { %v3387_v7 = vpop.f32.mrf.mxu0 }
0x215e   : > { %5940 = vmatmul.mubr.msk.f32.vlgmr.msra.gmra.mxu0 %vm292_vm3, %v3387_v7 }
0x215f   : > { %v5922_v8 = vpop.f32.mrf.mxu0  ;;  %5968 = vmatprep.mubr.msk.f32.mxu0 %vm6227_vm2, %v6226_v3 }
0x221e   : > { %v3460_v9 = vpop.f32.mrf.mxu0 }
0x221f   : > { %v3461_v10 = vadd.f32 %v6919_v22, %v3460_v9 }
0x2220   : > { %v5941_v55 = vpop.f32.mrf.mxu0 }
0x2221   : > { %v3464_v0 = vmax.f32 %v3461_v10, 0.0 }
0x2223   : > { %v3465_v1 = vmul.f32 %v3464_v0, %v6374_v17  ;;  %v3757_v18 = vmul.f32 2.0, %v3464_v0 }
0x2225   : > { %v3466_v12 = vadd.f32 %v3465_v1, %v6980_v50  ;;  %v3758_v21 = vadd.f32 %v3757_v18, %v3318_v4 }
0x2227   : > { %5943 = vmatpush3.msra.mxu1 %v3466_v12 }
0x2228   : > { %5945 = vmatmul.mubr.msk.f32.vlgmr.msra.gmra.mxu1 %vm218_vm1, %v6818_v11  ;;  %5947 = vmatprep.subr.mxu1 %v6226_v3 }
0x2229   : > { %5948 = vmatpush3.msra.mxu1 %v6826_v56  ;;  %5963 = vmatprep.mubr.msk.f32.mxu1 %vm6227_vm2, %v6226_v3 }
0x222a   : > { %5949 = vmatprep.subr.mxu1 %v6226_v3 }
0x222b   : > { %5950 = vmatpush3.msra.mxu1 %v6835_v57 }
0x222c   : > { %5951 = vmatprep.subr.mxu1 %v6226_v3 }
0x222d   : > { %5952 = vmatpush3.msra.mxu1 %v6842_v58 }
0x222e   : > { %5953 = vmatprep.subr.mxu1 %v6226_v3 }
0x222f   : > { %5954 = vmatpush3.msra.mxu1 %v6849_v59 }
0x2230   : > { %5955 = vmatprep.subr.mxu1 %v6226_v3 }
0x2231   : > { %5956 = vmatpush3.msra.mxu1 %v6856_v60 }
0x2232   : > { %5957 = vmatprep.subr.mxu1 %v6226_v3 }
0x2233   : > { %5958 = vmatpush3.msra.mxu1 %v6863_v61 }
0x2234   : > { %5959 = vmatprep.subr.mxu1 %v6226_v3 }
0x2235   : > { %5960 = vmatpush3.msra.mxu1 %v6870_v62 }
0x2236   : > { %5961 = vmatprep.subr.mxu1 %v6226_v3 }
0x2237   : > { %5962 = vmatpush3.msra.mxu1 %v6877_v63 }
0x2238   : > { %5990 = vmatprep.subr.mxu1 %v6226_v3 }
0x22e8   : > { %v3533_v13 = vpop.f32.mrf.mxu1 }
0x22e9   : > { %5964 = vmatmul.mubr.msk.f32.vlgmr.msra.gmra.mxu1 %vm292_vm3, %v3533_v13 }
0x22ea   : > { %v5946_v15 = vpop.f32.mrf.mxu1  ;;  %5992 = vmatprep.mubr.msk.f32.mxu1 %vm6227_vm2, %v6226_v3 }
0x23a9   : > { %v3606_v16 = vpop.f32.mrf.mxu1 }
0x23aa   : > { %v3607_v19 = vadd.f32 %v6919_v22, %v3606_v16 }
0x23ab   : > { %v5965_v14 = vpop.f32.mrf.mxu1 }
0x23ac   : > { %v3610_v20 = vmax.f32 %v3607_v19, 0.0 }
0x23ae   : > { %v3611_v23 = vmul.f32 %v3610_v20, %v6434_v35  ;;  %v3759_v24 = vmul.f32 2.0, %v3610_v20 }
0x23b0   : > { %v3612_v25 = vadd.f32 %v3611_v23, %v6980_v50  ;;  %v3760_v26 = vadd.f32 %v3759_v24, %v3758_v21 }
0x23b2   : > { %5967 = vmatpush3.msra.mxu0 %v3612_v25 }
0x23b3   : > { %5969 = vmatmul.mubr.msk.f32.vlgmr.msra.gmra.mxu0 %vm218_vm1, %v6818_v11  ;;  %5971 = vmatprep.subr.mxu0 %v6226_v3 }
0x23b4   : > { %5972 = vmatpush3.msra.mxu0 %v6826_v56  ;;  %5987 = vmatprep.mubr.msk.f32.mxu0 %vm6227_vm2, %v6226_v3 }
0x23b5   : > { %5973 = vmatprep.subr.mxu0 %v6226_v3 }
0x23b6   : > { %5974 = vmatpush3.msra.mxu0 %v6835_v57 }
0x23b7   : > { %5975 = vmatprep.subr.mxu0 %v6226_v3 }
0x23b8   : > { %5976 = vmatpush3.msra.mxu0 %v6842_v58 }
0x23b9   : > { %5977 = vmatprep.subr.mxu0 %v6226_v3 }
0x23ba   : > { %5978 = vmatpush3.msra.mxu0 %v6849_v59 }
0x23bb   : > { %5979 = vmatprep.subr.mxu0 %v6226_v3 }
0x23bc   : > { %5980 = vmatpush3.msra.mxu0 %v6856_v60 }
0x23bd   : > { %5981 = vmatprep.subr.mxu0 %v6226_v3 }
0x23be   : > { %5982 = vmatpush3.msra.mxu0 %v6863_v61 }
0x23bf   : > { %5983 = vmatprep.subr.mxu0 %v6226_v3 }
0x23c0   : > { %5984 = vmatpush3.msra.mxu0 %v6870_v62 }
0x23c1   : > { %5985 = vmatprep.subr.mxu0 %v6226_v3 }
0x23c2   : > { %5986 = vmatpush3.msra.mxu0 %v6877_v63 }
0x23c3   : > { %6014 = vmatprep.subr.mxu0 %v6226_v3 }
0x2473   : > { %v3679_v27 = vpop.f32.mrf.mxu0 }
0x2474   : > { %5988 = vmatmul.mubr.msk.f32.vlgmr.msra.gmra.mxu0 %vm292_vm3, %v3679_v27 }
0x2475   : > { %v5970_v28 = vpop.f32.mrf.mxu0  ;;  %6016 = vmatprep.mubr.msk.f32.mxu0 %vm6227_vm2, %v6226_v3 }
0x2534   : > { %v3752_v29 = vpop.f32.mrf.mxu0 }
0x2535   : > { %v3753_v30 = vadd.f32 %v6919_v22, %v3752_v29 }
0x2536   : > { %v5989_v31 = vpop.f32.mrf.mxu0 }
0x2537   : > { %v3756_v32 = vmax.f32 %v3753_v30, 0.0 }
0x2539   : > { %v3761_v33 = vadd.f32 %v3760_v26, %v3756_v32 }
0x253b   : > { %v3762_v34 = vmul.f32 %v3761_v33, %v6466_v49 }
0x253d   : > { %v7094_v36 = vadd.f32 %v3762_v34, %v6980_v50 }
0x253f   : > { %5991 = vmatpush3.msra.mxu1 %v7094_v36 }
0x2540   : > { %5993 = vmatmul.mubr.msk.f32.vlgmr.msra.gmra.mxu1 %vm218_vm1, %v6818_v11  ;;  %5995 = vmatprep.subr.mxu1 %v6226_v3 }
0x2541   : > { %5996 = vmatpush3.msra.mxu1 %v6826_v56  ;;  %6011 = vmatprep.mubr.msk.f32.mxu1 %vm6227_vm2, %v6226_v3 }
0x2542   : > { %5997 = vmatprep.subr.mxu1 %v6226_v3 }
0x2543   : > { %5998 = vmatpush3.msra.mxu1 %v6835_v57 }
0x2544   : > { %5999 = vmatprep.subr.mxu1 %v6226_v3 }
0x2545   : > { %6000 = vmatpush3.msra.mxu1 %v6842_v58 }
0x2546   : > { %6001 = vmatprep.subr.mxu1 %v6226_v3 }
0x2547   : > { %6002 = vmatpush3.msra.mxu1 %v6849_v59 }
0x2548   : > { %6003 = vmatprep.subr.mxu1 %v6226_v3 }
0x2549   : > { %6004 = vmatpush3.msra.mxu1 %v6856_v60 }
0x254a   : > { %6005 = vmatprep.subr.mxu1 %v6226_v3 }
0x254b   : > { %6006 = vmatpush3.msra.mxu1 %v6863_v61 }
0x254c   : > { %6007 = vmatprep.subr.mxu1 %v6226_v3 }
0x254d   : > { %6008 = vmatpush3.msra.mxu1 %v6870_v62 }
0x254e   : > { %6009 = vmatprep.subr.mxu1 %v6226_v3 }
0x254f   : > { %6010 = vmatpush3.msra.mxu1 %v6877_v63 }
0x2550   : > { %6038 = vmatprep.subr.mxu1 %v6226_v3 }
0x2600   : > { %v3830_v37 = vpop.f32.mrf.mxu1 }
0x2601   : > { %6012 = vmatmul.mubr.msk.f32.vlgmr.msra.gmra.mxu1 %vm292_vm3, %v3830_v37 }
0x2602   : > { %v5994_v38 = vpop.f32.mrf.mxu1  ;;  %6040 = vmatprep.mubr.msk.f32.mxu1 %vm6227_vm2, %v6226_v3 }
0x26c1   : > { %v3903_v39 = vpop.f32.mrf.mxu1 }
0x26c2   : > { %v7122_v40 = vadd.f32 %v6919_v22, %v3903_v39 }
0x26c3   : > { %v6013_v41 = vpop.f32.mrf.mxu1 }
0x26c4   : > { %v3907_v42 = vmax.f32 %v7122_v40, 0.0 }
0x26c6   : > { %v3908_v43 = vmul.f32 %v3907_v42, %v6374_v17 }
0x26c8   : > { %v3909_v44 = vadd.f32 %v3908_v43, %v7094_v36 }
0x26ca   : > { %6015 = vmatpush3.msra.mxu0 %v3909_v44 }
0x26cb   : > { %6017 = vmatmul.mubr.msk.f32.vlgmr.msra.gmra.mxu0 %vm218_vm1, %v6818_v11  ;;  %6019 = vmatprep.subr.mxu0 %v6226_v3 }
0x26cc   : > { %6020 = vmatpush3.msra.mxu0 %v6826_v56  ;;  %6035 = vmatprep.mubr.msk.f32.mxu0 %vm6227_vm2, %v6226_v3 }
0x26cd   : > { %6021 = vmatprep.subr.mxu0 %v6226_v3 }
0x26ce   : > { %6022 = vmatpush3.msra.mxu0 %v6835_v57 }
0x26cf   : > { %6023 = vmatprep.subr.mxu0 %v6226_v3 }
0x26d0   : > { %6024 = vmatpush3.msra.mxu0 %v6842_v58 }
0x26d1   : > { %6025 = vmatprep.subr.mxu0 %v6226_v3 }
0x26d2   : > { %6026 = vmatpush3.msra.mxu0 %v6849_v59 }
0x26d3   : > { %6027 = vmatprep.subr.mxu0 %v6226_v3 }
0x26d4   : > { %6028 = vmatpush3.msra.mxu0 %v6856_v60 }
0x26d5   : > { %6029 = vmatprep.subr.mxu0 %v6226_v3 }
0x26d6   : > { %6030 = vmatpush3.msra.mxu0 %v6863_v61 }
0x26d7   : > { %6031 = vmatprep.subr.mxu0 %v6226_v3 }
0x26d8   : > { %6032 = vmatpush3.msra.mxu0 %v6870_v62 }
0x26d9   : > { %6033 = vmatprep.subr.mxu0 %v6226_v3 }
0x26da   : > { %6034 = vmatpush3.msra.mxu0 %v6877_v63 }
0x26db   : > { %6062 = vmatprep.subr.mxu0 %v6226_v3 }
0x278b   : > { %v3976_v45 = vpop.f32.mrf.mxu0 }
0x278c   : > { %6036 = vmatmul.mubr.msk.f32.vlgmr.msra.gmra.mxu0 %vm292_vm3, %v3976_v45 }
0x278d   : > { %v6018_v46 = vpop.f32.mrf.mxu0  ;;  %6064 = vmatprep.mubr.msk.f32.mxu0 %vm6227_vm2, %v6226_v3 }
0x284c   : > { %v4049_v47 = vpop.f32.mrf.mxu0 }
0x284d   : > { %v4050_v48 = vadd.f32 %v6919_v22, %v4049_v47 }
0x284e   : > { %v6037_v50 = vpop.f32.mrf.mxu0 }
0x284f   : > { %v4053_v51 = vmax.f32 %v4050_v48, 0.0 }
0x2851   : > { %v4054_v52 = vmul.f32 %v4053_v51, %v6374_v17  ;;  %v4346_v5 = vmul.f32 2.0, %v4053_v51 }
0x2853   : > { %v4055_v53 = vadd.f32 %v4054_v52, %v7094_v36  ;;  %v4347_v9 = vadd.f32 %v4346_v5, %v3907_v42 }
0x2855   : > { %6039 = vmatpush3.msra.mxu1 %v4055_v53 }
0x2856   : > { %6041 = vmatmul.mubr.msk.f32.vlgmr.msra.gmra.mxu1 %vm218_vm1, %v6818_v11  ;;  %6043 = vmatprep.subr.mxu1 %v6226_v3 }
0x2857   : > { %6044 = vmatpush3.msra.mxu1 %v6826_v56  ;;  %6059 = vmatprep.mubr.msk.f32.mxu1 %vm6227_vm2, %v6226_v3 }
0x2858   : > { %6045 = vmatprep.subr.mxu1 %v6226_v3 }
0x2859   : > { %6046 = vmatpush3.msra.mxu1 %v6835_v57 }
0x285a   : > { %6047 = vmatprep.subr.mxu1 %v6226_v3 }
0x285b   : > { %6048 = vmatpush3.msra.mxu1 %v6842_v58 }
0x285c   : > { %6049 = vmatprep.subr.mxu1 %v6226_v3 }
0x285d   : > { %6050 = vmatpush3.msra.mxu1 %v6849_v59 }
0x285e   : > { %6051 = vmatprep.subr.mxu1 %v6226_v3 }
0x285f   : > { %6052 = vmatpush3.msra.mxu1 %v6856_v60 }
0x2860   : > { %6053 = vmatprep.subr.mxu1 %v6226_v3 }
0x2861   : > { %6054 = vmatpush3.msra.mxu1 %v6863_v61 }
0x2862   : > { %6055 = vmatprep.subr.mxu1 %v6226_v3 }
0x2863   : > { %6056 = vmatpush3.msra.mxu1 %v6870_v62 }
0x2864   : > { %6057 = vmatprep.subr.mxu1 %v6226_v3 }
0x2865   : > { %6058 = vmatpush3.msra.mxu1 %v6877_v63 }
0x2866   : > { %6086 = vmatprep.subr.mxu1 %v6226_v3 }
0x2916   : > { %v4122_v54 = vpop.f32.mrf.mxu1 }
0x2917   : > { %6060 = vmatmul.mubr.msk.f32.vlgmr.msra.gmra.mxu1 %vm292_vm3, %v4122_v54 }
0x2918   : > { %v6042_v2 = vpop.f32.mrf.mxu1  ;;  %6088 = vmatprep.mubr.msk.f32.mxu1 %vm6227_vm2, %v6226_v3 }
0x29d7   : > { %v4195_v4 = vpop.f32.mrf.mxu1 }
0x29d8   : > { %v4196_v6 = vadd.f32 %v6919_v22, %v4195_v4 }
0x29d9   : > { %v6061_v7 = vpop.f32.mrf.mxu1 }
0x29da   : > { %v4199_v8 = vmax.f32 %v4196_v6, 0.0 }
0x29dc   : > { %v4200_v10 = vmul.f32 %v4199_v8, %v6434_v35  ;;  %v4348_v55 = vmul.f32 2.0, %v4199_v8 }
0x29de   : > { %v4201_v0 = vadd.f32 %v4200_v10, %v7094_v36  ;;  %v4349_v1 = vadd.f32 %v4348_v55, %v4347_v9 }
0x29e0   : > { %6063 = vmatpush3.msra.mxu0 %v4201_v0 }
0x29e1   : > { %6065 = vmatmul.mubr.msk.f32.vlgmr.msra.gmra.mxu0 %vm218_vm1, %v6818_v11  ;;  %6067 = vmatprep.subr.mxu0 %v6226_v3 }
0x29e2   : > { %6068 = vmatpush3.msra.mxu0 %v6826_v56  ;;  %6083 = vmatprep.mubr.msk.f32.mxu0 %vm6227_vm2, %v6226_v3 }
0x29e3   : > { %6069 = vmatprep.subr.mxu0 %v6226_v3 }
0x29e4   : > { %6070 = vmatpush3.msra.mxu0 %v6835_v57 }
0x29e5   : > { %6071 = vmatprep.subr.mxu0 %v6226_v3 }
0x29e6   : > { %6072 = vmatpush3.msra.mxu0 %v6842_v58 }
0x29e7   : > { %6073 = vmatprep.subr.mxu0 %v6226_v3 }
0x29e8   : > { %6074 = vmatpush3.msra.mxu0 %v6849_v59 }
0x29e9   : > { %6075 = vmatprep.subr.mxu0 %v6226_v3 }
0x29ea   : > { %6076 = vmatpush3.msra.mxu0 %v6856_v60 }
0x29eb   : > { %6077 = vmatprep.subr.mxu0 %v6226_v3 }
0x29ec   : > { %6078 = vmatpush3.msra.mxu0 %v6863_v61 }
0x29ed   : > { %6079 = vmatprep.subr.mxu0 %v6226_v3 }
0x29ee   : > { %6080 = vmatpush3.msra.mxu0 %v6870_v62 }
0x29ef   : > { %6081 = vmatprep.subr.mxu0 %v6226_v3 }
0x29f0   : > { %6082 = vmatpush3.msra.mxu0 %v6877_v63 }
0x29f1   : > { %6110 = vmatprep.subr.mxu0 %v6226_v3 }
0x2aa1   : > { %v4268_v12 = vpop.f32.mrf.mxu0 }
0x2aa2   : > { %6084 = vmatmul.mubr.msk.f32.vlgmr.msra.gmra.mxu0 %vm292_vm3, %v4268_v12 }
0x2aa3   : > { %v6066_v13 = vpop.f32.mrf.mxu0  ;;  %6112 = vmatprep.mubr.msk.f32.mxu0 %vm6227_vm2, %v6226_v3 }
0x2b62   : > { %v4341_v15 = vpop.f32.mrf.mxu0 }
0x2b63   : > { %v4342_v16 = vadd.f32 %v6919_v22, %v4341_v15 }
0x2b64   : > { %v6085_v18 = vpop.f32.mrf.mxu0 }
0x2b65   : > { %v4345_v19 = vmax.f32 %v4342_v16, 0.0 }
0x2b67   : > { %v4350_v14 = vadd.f32 %v4349_v1, %v4345_v19 }
0x2b69   : > { %v4351_v20 = vmul.f32 %v4350_v14, %v6466_v49 }
0x2b6b   : > { %v7208_v21 = vadd.f32 %v4351_v20, %v7094_v36 }
0x2b6d   : > { %6087 = vmatpush3.msra.mxu1 %v7208_v21 }
0x2b6e   : > { %6089 = vmatmul.mubr.msk.f32.vlgmr.msra.gmra.mxu1 %vm218_vm1, %v6818_v11  ;;  %6091 = vmatprep.subr.mxu1 %v6226_v3 }
0x2b6f   : > { %6092 = vmatpush3.msra.mxu1 %v6826_v56  ;;  %6107 = vmatprep.mubr.msk.f32.mxu1 %vm6227_vm2, %v6226_v3 }
0x2b70   : > { %6093 = vmatprep.subr.mxu1 %v6226_v3 }
0x2b71   : > { %6094 = vmatpush3.msra.mxu1 %v6835_v57 }
0x2b72   : > { %6095 = vmatprep.subr.mxu1 %v6226_v3 }
0x2b73   : > { %6096 = vmatpush3.msra.mxu1 %v6842_v58 }
0x2b74   : > { %6097 = vmatprep.subr.mxu1 %v6226_v3 }
0x2b75   : > { %6098 = vmatpush3.msra.mxu1 %v6849_v59 }
0x2b76   : > { %6099 = vmatprep.subr.mxu1 %v6226_v3 }
0x2b77   : > { %6100 = vmatpush3.msra.mxu1 %v6856_v60 }
0x2b78   : > { %6101 = vmatprep.subr.mxu1 %v6226_v3 }
0x2b79   : > { %6102 = vmatpush3.msra.mxu1 %v6863_v61 }
0x2b7a   : > { %6103 = vmatprep.subr.mxu1 %v6226_v3 }
0x2b7b   : > { %6104 = vmatpush3.msra.mxu1 %v6870_v62 }
0x2b7c   : > { %6105 = vmatprep.subr.mxu1 %v6226_v3 }
0x2b7d   : > { %6106 = vmatpush3.msra.mxu1 %v6877_v63 }
0x2b7e   : > { %6134 = vmatprep.subr.mxu1 %v6226_v3 }
0x2c2e   : > { %v4419_v23 = vpop.f32.mrf.mxu1 }
0x2c2f   : > { %6108 = vmatmul.mubr.msk.f32.vlgmr.msra.gmra.mxu1 %vm292_vm3, %v4419_v23 }
0x2c30   : > { %v6090_v24 = vpop.f32.mrf.mxu1  ;;  %6136 = vmatprep.mubr.msk.f32.mxu1 %vm6227_vm2, %v6226_v3 }
0x2cef   : > { %v4492_v25 = vpop.f32.mrf.mxu1 }
0x2cf0   : > { %v7236_v26 = vadd.f32 %v6919_v22, %v4492_v25 }
0x2cf1   : > { %v6109_v27 = vpop.f32.mrf.mxu1 }
0x2cf2   : > { %v4496_v28 = vmax.f32 %v7236_v26, 0.0 }
0x2cf4   : > { %v4497_v29 = vmul.f32 %v4496_v28, %v6374_v17 }
0x2cf6   : > { %v4498_v30 = vadd.f32 %v4497_v29, %v7208_v21 }
0x2cf8   : > { %6111 = vmatpush3.msra.mxu0 %v4498_v30 }
0x2cf9   : > { %6113 = vmatmul.mubr.msk.f32.vlgmr.msra.gmra.mxu0 %vm218_vm1, %v6818_v11  ;;  %6115 = vmatprep.subr.mxu0 %v6226_v3 }
0x2cfa   : > { %6116 = vmatpush3.msra.mxu0 %v6826_v56  ;;  %6131 = vmatprep.mubr.msk.f32.mxu0 %vm6227_vm2, %v6226_v3 }
0x2cfb   : > { %6117 = vmatprep.subr.mxu0 %v6226_v3 }
0x2cfc   : > { %6118 = vmatpush3.msra.mxu0 %v6835_v57 }
0x2cfd   : > { %6119 = vmatprep.subr.mxu0 %v6226_v3 }
0x2cfe   : > { %6120 = vmatpush3.msra.mxu0 %v6842_v58 }
0x2cff   : > { %6121 = vmatprep.subr.mxu0 %v6226_v3 }
0x2d00   : > { %6122 = vmatpush3.msra.mxu0 %v6849_v59 }
0x2d01   : > { %6123 = vmatprep.subr.mxu0 %v6226_v3 }
0x2d02   : > { %6124 = vmatpush3.msra.mxu0 %v6856_v60 }
0x2d03   : > { %6125 = vmatprep.subr.mxu0 %v6226_v3 }
0x2d04   : > { %6126 = vmatpush3.msra.mxu0 %v6863_v61 }
0x2d05   : > { %6127 = vmatprep.subr.mxu0 %v6226_v3 }
0x2d06   : > { %6128 = vmatpush3.msra.mxu0 %v6870_v62 }
0x2d07   : > { %6129 = vmatprep.subr.mxu0 %v6226_v3 }
0x2d08   : > { %6130 = vmatpush3.msra.mxu0 %v6877_v63 }
0x2d09   : > { %6158 = vmatprep.subr.mxu0 %v6226_v3 }
0x2db9   : > { %v4565_v31 = vpop.f32.mrf.mxu0 }
0x2dba   : > { %6132 = vmatmul.mubr.msk.f32.vlgmr.msra.gmra.mxu0 %vm292_vm3, %v4565_v31 }
0x2dbb   : > { %v6114_v32 = vpop.f32.mrf.mxu0  ;;  %6160 = vmatprep.mubr.msk.f32.mxu0 %vm6227_vm2, %v6226_v3 }
0x2e7a   : > { %v4638_v33 = vpop.f32.mrf.mxu0 }
0x2e7b   : > { %v4639_v34 = vadd.f32 %v6919_v22, %v4638_v33 }
0x2e7c   : > { %v6133_v36 = vpop.f32.mrf.mxu0 }
0x2e7d   : > { %v4642_v37 = vmax.f32 %v4639_v34, 0.0 }
0x2e7f   : > { %v4643_v38 = vmul.f32 %v4642_v37, %v6374_v17  ;;  %v4935_v42 = vmul.f32 2.0, %v4642_v37 }
0x2e81   : > { %v4644_v39 = vadd.f32 %v4643_v38, %v7208_v21  ;;  %v4936_v46 = vadd.f32 %v4935_v42, %v4496_v28 }
0x2e83   : > { %6135 = vmatpush3.msra.mxu1 %v4644_v39 }
0x2e84   : > { %6137 = vmatmul.mubr.msk.f32.vlgmr.msra.gmra.mxu1 %vm218_vm1, %v6818_v11  ;;  %6139 = vmatprep.subr.mxu1 %v6226_v3 }
0x2e85   : > { %6140 = vmatpush3.msra.mxu1 %v6826_v56  ;;  %6155 = vmatprep.mubr.msk.f32.mxu1 %vm6227_vm2, %v6226_v3 }
0x2e86   : > { %6141 = vmatprep.subr.mxu1 %v6226_v3 }
0x2e87   : > { %6142 = vmatpush3.msra.mxu1 %v6835_v57 }
0x2e88   : > { %6143 = vmatprep.subr.mxu1 %v6226_v3 }
0x2e89   : > { %6144 = vmatpush3.msra.mxu1 %v6842_v58 }
0x2e8a   : > { %6145 = vmatprep.subr.mxu1 %v6226_v3 }
0x2e8b   : > { %6146 = vmatpush3.msra.mxu1 %v6849_v59 }
0x2e8c   : > { %6147 = vmatprep.subr.mxu1 %v6226_v3 }
0x2e8d   : > { %6148 = vmatpush3.msra.mxu1 %v6856_v60 }
0x2e8e   : > { %6149 = vmatprep.subr.mxu1 %v6226_v3 }
0x2e8f   : > { %6150 = vmatpush3.msra.mxu1 %v6863_v61 }
0x2e90   : > { %6151 = vmatprep.subr.mxu1 %v6226_v3 }
0x2e91   : > { %6152 = vmatpush3.msra.mxu1 %v6870_v62 }
0x2e92   : > { %6153 = vmatprep.subr.mxu1 %v6226_v3 }
0x2e93   : > { %6154 = vmatpush3.msra.mxu1 %v6877_v63 }
0x2f44   : > { %v4711_v17 = vpop.f32.mrf.mxu1 }
0x2f45   : > { %6156 = vmatmul.mubr.msk.f32.vlgmr.msra.gmra.mxu1 %vm292_vm3, %v4711_v17 }
0x2f46   : > { %v6138_v40 = vpop.f32.mrf.mxu1 }
0x3005   : > { %v4784_v41 = vpop.f32.mrf.mxu1 }
0x3006   : > { %v4785_v43 = vadd.f32 %v6919_v22, %v4784_v41 }
0x3007   : > { %v6157_v44 = vpop.f32.mrf.mxu1 }
0x3008   : > { %v4788_v45 = vmax.f32 %v4785_v43, 0.0 }
0x300a   : > { %v4789_v47 = vmul.f32 %v4788_v45, %v6434_v35  ;;  %v4937_v48 = vmul.f32 2.0, %v4788_v45 }
0x300c   : > { %v4790_v50 = vadd.f32 %v4789_v47, %v7208_v21  ;;  %v4938_v51 = vadd.f32 %v4937_v48, %v4936_v46 }
0x300e   : > { %6159 = vmatpush3.msra.mxu0 %v4790_v50 }
0x300f   : > { %6161 = vmatmul.mubr.msk.f32.vlgmr.msra.gmra.mxu0 %vm218_vm1, %v6818_v11  ;;  %6163 = vmatprep.subr.mxu0 %v6226_v3 }
0x3010   : > { %6164 = vmatpush3.msra.mxu0 %v6826_v56  ;;  %6179 = vmatprep.mubr.msk.f32.mxu0 %vm6227_vm2, %v6226_v3 }
0x3011   : > { %6165 = vmatprep.subr.mxu0 %v6226_v3 }
0x3012   : > { %6166 = vmatpush3.msra.mxu0 %v6835_v57 }
0x3013   : > { %6167 = vmatprep.subr.mxu0 %v6226_v3 }
0x3014   : > { %6168 = vmatpush3.msra.mxu0 %v6842_v58 }
0x3015   : > { %6169 = vmatprep.subr.mxu0 %v6226_v3 }
0x3016   : > { %6170 = vmatpush3.msra.mxu0 %v6849_v59 }
0x3017   : > { %6171 = vmatprep.subr.mxu0 %v6226_v3 }
0x3018   : > { %6172 = vmatpush3.msra.mxu0 %v6856_v60 }
0x3019   : > { %6173 = vmatprep.subr.mxu0 %v6226_v3 }
0x301a   : > { %6174 = vmatpush3.msra.mxu0 %v6863_v61 }
0x301b   : > { %6175 = vmatprep.subr.mxu0 %v6226_v3 }
0x301c   : > { %6176 = vmatpush3.msra.mxu0 %v6870_v62 }
0x301d   : > { %6177 = vmatprep.subr.mxu0 %v6226_v3 }
0x301e   : > { %6178 = vmatpush3.msra.mxu0 %v6877_v63 }
0x30cf   : > { %v4857_v35 = vpop.f32.mrf.mxu0 }
0x30d0   : > { %6180 = vmatmul.mubr.msk.f32.vlgmr.msra.gmra.mxu0 %vm292_vm3, %v4857_v35 }
0x30d1   : > { %v6162_v11 = vpop.f32.mrf.mxu0 }
0x3190   : > { %v4930_v56 = vpop.f32.mrf.mxu0 }
0x3191   : > { %v4931_v57 = vadd.f32 %v6919_v22, %v4930_v56 }
0x3192   : > { %v6181_v58 = vpop.f32.mrf.mxu0 }
0x3193   : > { %v4934_v59 = vmax.f32 %v4931_v57, 0.0 }
0x3195   : > { %v4939_v60 = vadd.f32 %v4938_v51, %v4934_v59 }
0x3197   : > { %v4940_v61 = vmul.f32 %v4939_v60, %v6466_v49 }
0x3199   : > { %v4941_v52 = vadd.f32 %v4940_v61, %v7208_v21 }
0x319b   : > { %4942 = vst.msk [vmem:[#allocation2] sm:$0xff] %vm292_vm3, %v4941_v52 }
0x319c PF: > { %vm4944_vm4 = vcmask 523264  }
0x31a2   : > { %v4943_v3 = vld [vmem:[#allocation2] sm:$0xff] }
0x31a3   : > { %4945 = vst.msk [vmem:[%s6276_s28] sm:$0xff] %vm4944_vm4, %v4943_v3 }
0x31a4 PF: > { %s21_s23 = sadd.s32 1, %s6223_s23  }
0x31a5   : > { %p18_p11 = scmp.ge.s32.totalorder %s21_s23, 7  }
0x31a7   :  { %20 = sbr.rel (!%p18_p11) target bundleno = 16 (0x10), region = 71 }

</bundles_post_ra>
